<compile_context>
chip_gen: v5e
topology: v5e:2x2
jax: 0.10.0
libtpu: 0.0.40
codegen_flags: <defaults>
</compile_context>

<pallas_src>
import jax
import jax.numpy as jnp
from jax.experimental import pallas as pl
from jax.experimental.pallas import tpu as pltpu


def cas_kernel(xi_ref, w_ref, shift_ref, wc_ref, logits_ref, feat_ref):
    """One grid step = one tile of TILE_M im2col rows.

    xi_ref    : (TILE_M, KP)     bf16 im2col rows (K = 3*C_in zero-padded to KP)
    w_ref     : (KP, C_hid)      bf16 fused conv-tap weights, BN scale folded in
    shift_ref : (1, C_hid)       f32  folded BN shift (includes conv bias)
    wc_ref    : (C_hid, NCP)     bf16 classifier weight, cols zero-padded to NCP
    logits_ref: (TILE_M, NCP)    f32  logits (lane-dense; real cols are [:NC])
    feat_ref  : (TILE_M, C_hid)  bf16 (default) post-ReLU features
    """
    # Single fused K-deep conv matmul (f32 accumulation on the MXU).
    h = jnp.dot(xi_ref[...], w_ref[...], preferred_element_type=jnp.float32)
    h = jnp.maximum(h + shift_ref[...], 0.0)          # folded BN shift + ReLU

    feat_ref[...] = h.astype(feat_ref.dtype)          # bf16 store halves writeback

    logits = jnp.dot(h.astype(wc_ref.dtype), wc_ref[...],
                     preferred_element_type=jnp.float32)
    logits_ref[...] = logits.astype(logits_ref.dtype)


def _const_spec(shape):
    """BlockSpec for a grid-invariant operand (constant index_map).

    Single-buffer it when the installed Pallas exposes pipeline_mode — the
    operand is fetched once, so double-buffering only burns VMEM (matters most
    on v7x's 64 MiB budget).  Fall back to the default spec otherwise.
    """
    try:
        return pl.BlockSpec(shape, lambda i: (0, 0),
                            pipeline_mode=pl.Buffered(1))
    except TypeError:
        return pl.BlockSpec(shape, lambda i: (0, 0))


def cas_forward(x, conv_w, conv_b, bn_gamma, bn_beta, bn_mean, bn_var, cls_w,
                eps=1e-5, tile_m=512, feature_dtype=jnp.bfloat16):
    """x: (B, T, C_in) f32. Returns (logits (B,T,NC), features (B,T,C_hid))."""
    B, T, C_in = x.shape
    C_hid = conv_w.shape[0]
    NC = cls_w.shape[0]

    # ---------- glue: BN folding + weight re-layout + im2col (plain JAX) -----
    inv_std = 1.0 / jnp.sqrt(bn_var.astype(jnp.float32) + eps)
    scale = bn_gamma.astype(jnp.float32) * inv_std                  # (C_hid,)
    shift = bn_beta + (conv_b - bn_mean) * scale
    shift = shift.reshape(1, C_hid).astype(jnp.float32)

    # conv_w (C_hid, C_in, 3) -> fused (3*C_in, C_hid), BN scale folded into it
    K = 3 * C_in
    KP = max(128, ((K + 127) // 128) * 128)        # contraction dim -> 128-mult
    w_fused = jnp.transpose(conv_w, (2, 1, 0)).reshape(K, C_hid)
    w_fused = w_fused.astype(jnp.float32) * scale[None, :]
    w_fused = jnp.pad(w_fused, ((0, KP - K), (0, 0))).astype(jnp.bfloat16)

    # classifier (NC, C_hid, 1) -> (C_hid, NCP) with zero-padded columns
    NCP = max(128, ((NC + 127) // 128) * 128)
    wc = jnp.transpose(cls_w[:, :, 0], (1, 0)).astype(jnp.float32)
    wc = jnp.pad(wc, ((0, 0), (0, NCP - NC))).astype(jnp.bfloat16)

    # im2col directly in bf16 (kernel operands are bf16 anyway; halves the HBM
    # traffic of materializing the 3x-expanded operand).
    xb = x.astype(jnp.bfloat16)
    xp = jnp.pad(xb, ((0, 0), (1, 1), (0, 0)))                      # (B,T+2,C)
    xi = jnp.concatenate([xp[:, 0:T], xp[:, 1:T + 1], xp[:, 2:T + 2]], axis=-1)
    M = B * T
    xi = xi.reshape(M, K)

    # Tile selection: big M tiles amortize per-step overhead (~0.35us/step) but
    # clamp for tiny inputs so we don't pad hundreds of dead rows.
    tile_m = max(128, min(int(tile_m), 1024))
    tile_m = min(tile_m, ((M + 127) // 128) * 128)
    MP = ((M + tile_m - 1) // tile_m) * tile_m
    xi = jnp.pad(xi, ((0, MP - M), (0, KP - K)))

    # Explicit scoped-VMEM limit: raise above v5e's 16 MiB default, stay under
    # v7x's 64 MiB physical VMEM.
    feat_bytes = jnp.dtype(feature_dtype).itemsize
    est_vmem = (
        2 * tile_m * KP * 2                       # xi tiles (double buffered)
        + 2 * tile_m * NCP * 4                    # logits tiles
        + 2 * tile_m * C_hid * feat_bytes         # feature tiles
        + KP * C_hid * 2 + C_hid * NCP * 2 + C_hid * 4   # invariant weights
        + tile_m * C_hid * (4 + 2))               # in-kernel f32 h + bf16 copy
    vmem_limit = int(min(64 * 1024 * 1024,
                         max(32 * 1024 * 1024, int(est_vmem * 1.5))))

    # ---------- pallas call ---------------------------------------------------
    grid_spec = pltpu.PrefetchScalarGridSpec(
        num_scalar_prefetch=0,
        grid=(MP // tile_m,),
        in_specs=[
            pl.BlockSpec((tile_m, KP), lambda i: (i, 0)),     # im2col rows
            _const_spec((KP, C_hid)),                         # fused conv W
            _const_spec((1, C_hid)),                          # folded shift
            _const_spec((C_hid, NCP)),                        # classifier W
        ],
        out_specs=[
            pl.BlockSpec((tile_m, NCP), lambda i: (i, 0)),    # logits (padded)
            pl.BlockSpec((tile_m, C_hid), lambda i: (i, 0)),  # features
        ],
    )
    out_shapes = (
        jax.ShapeDtypeStruct((MP, NCP), jnp.float32),
        jax.ShapeDtypeStruct((MP, C_hid), feature_dtype),
    )

    logits_p, feat_p = pl.pallas_call(
        cas_kernel,
        out_shape=out_shapes,
        grid_spec=grid_spec,
        compiler_params=pltpu.CompilerParams(
            dimension_semantics=("parallel",),
            vmem_limit_bytes=vmem_limit),
    )(xi, w_fused, shift, wc)

    logits = logits_p[:M, :NC].reshape(B, T, NC)
    feat_p = feat_p if MP == M else feat_p[:M]       # identity slice if MP == M
    features = feat_p.reshape(B, T, C_hid)
    return logits, features


def reference_forward(x, conv_w, conv_b, bn_gamma, bn_beta, bn_mean, bn_var,
                      cls_w, eps=1e-5, cast_dtype=jnp.float32):
    """Pure-jnp reference (eval-mode semantics).

    cast_dtype=f32   -> exact module math.
    cast_dtype=bf16  -> same operand quantization the kernel uses (f32 accum).
    """
    B, T, C_in = x.shape
    C_hid = conv_w.shape[0]
    xp = jnp.pad(x.astype(jnp.float32), ((0, 0), (1, 1), (0, 0)))
    xi = jnp.concatenate([xp[:, 0:T], xp[:, 1:T + 1], xp[:, 2:T + 2]], axis=-1)

    inv_std = 1.0 / jnp.sqrt(bn_var + eps)
    scale = bn_gamma * inv_std
    shift = bn_beta + (conv_b - bn_mean) * scale
    wf = jnp.transpose(conv_w, (2, 1, 0)).reshape(3 * C_in, C_hid) * scale[None, :]

    h = jnp.einsum('btk,kh->bth', xi.astype(cast_dtype), wf.astype(cast_dtype),
                   preferred_element_type=jnp.float32) + shift
    h = jnp.maximum(h, 0.0)

    wc = cls_w[:, :, 0].T
    logits = jnp.einsum('bth,ho->bto', h.astype(cast_dtype),
                        wc.astype(cast_dtype),
                        preferred_element_type=jnp.float32)
    return logits, h


if __name__ == "__main__":
    B, T = 2, 8
    len_feature = 32
    num_classes = 5
    C_hid = 2048  # hardcoded in the PyTorch module

    key = jax.random.PRNGKey(0)
    k_x, k_w1, k_b1, k_wc = jax.random.split(key, 4)

    x = jax.random.normal(k_x, (B, T, len_feature), dtype=jnp.float32)

    # kaiming_normal_ for Conv1d weights (fan_in mode, gain=sqrt(2))
    fan_in1 = len_feature * 3
    conv_w = jax.random.normal(k_w1, (C_hid, len_feature, 3), jnp.float32) * \
        jnp.sqrt(2.0 / fan_in1)
    bound1 = 1.0 / jnp.sqrt(fan_in1)
    conv_b = jax.random.uniform(k_b1, (C_hid,), jnp.float32, -bound1, bound1)

    # BatchNorm1d init values: gamma=1, beta=0, running_mean=0, running_var=1
    bn_gamma = jnp.ones((C_hid,), jnp.float32)
    bn_beta = jnp.zeros((C_hid,), jnp.float32)
    bn_mean = jnp.zeros((C_hid,), jnp.float32)
    bn_var = jnp.ones((C_hid,), jnp.float32)

    fan_in2 = C_hid * 1
    cls_w = jax.random.normal(k_wc, (num_classes, C_hid, 1), jnp.float32) * \
        jnp.sqrt(2.0 / fan_in2)

    logits, features = cas_forward(x, conv_w, conv_b, bn_gamma, bn_beta,
                                   bn_mean, bn_var, cls_w)
    jax.block_until_ready((logits, features))

    assert logits.shape == (B, T, num_classes)
    assert features.shape == (B, T, C_hid)

    feats_f32 = features.astype(jnp.float32)

    # Tight check against a reference using the same bf16 operand quantization.
    q_logits, q_feats = reference_forward(x, conv_w, conv_b, bn_gamma, bn_beta,
                                          bn_mean, bn_var, cls_w,
                                          cast_dtype=jnp.bfloat16)
    assert jnp.allclose(logits, q_logits, atol=3e-3, rtol=3e-3)
    # features are stored in bf16 -> allow bf16 rounding of the f32 reference h
    assert jnp.allclose(feats_f32, q_feats, atol=2e-2, rtol=2e-2)

    # Loose check against the exact f32 reference (bf16 MXU operand rounding).
    f_logits, f_feats = reference_forward(x, conv_w, conv_b, bn_gamma, bn_beta,
                                          bn_mean, bn_var, cls_w,
                                          cast_dtype=jnp.float32)
    assert jnp.allclose(logits, f_logits, atol=1e-1, rtol=1e-1)
    assert jnp.allclose(feats_f32, f_feats, atol=1e-1, rtol=1e-1)

    print("KERNEL_OK")
</pallas_src>

<mosaic_0001>
module attributes {stable_mosaic.version = 11 : i64} {
  func.func @cas_kernel(%arg0: i32, %arg1: memref<128x128xbf16, #tpu.memory_space<vmem>>, %arg2: memref<128x2048xbf16, #tpu.memory_space<vmem>>, %arg3: memref<1x2048xf32, #tpu.memory_space<vmem>>, %arg4: memref<2048x128xbf16, #tpu.memory_space<vmem>>, %arg5: memref<128x128xf32, #tpu.memory_space<vmem>>, %arg6: memref<128x2048xbf16, #tpu.memory_space<vmem>>) attributes {dimension_semantics = [#tpu.dimension_semantics<parallel>], iteration_bounds = array<i64: 1>, scalar_prefetch = 0 : i64, scratch_operands = 0 : i64, tpu.core_type = #tpu.core_type<tc>, window_params = [{transform_indices = @transform_0, window_bounds = array<i64: 128, 128>}, {pipeline_mode = #tpu.pipeline_mode<synchronous>, transform_indices = @transform_1, window_bounds = array<i64: 128, 2048>}, {pipeline_mode = #tpu.pipeline_mode<synchronous>, transform_indices = @transform_2, window_bounds = array<i64: 1, 2048>}, {pipeline_mode = #tpu.pipeline_mode<synchronous>, transform_indices = @transform_3, window_bounds = array<i64: 2048, 128>}, {transform_indices = @transform_4, window_bounds = array<i64: 128, 128>}, {transform_indices = @transform_5, window_bounds = array<i64: 128, 2048>}]} {
    %c0 = arith.constant 0 : index
    %c0_0 = arith.constant 0 : index
    %0 = vector.load %arg1[%c0, %c0_0] : memref<128x128xbf16, #tpu.memory_space<vmem>>, vector<128x128xbf16>
    %c0_1 = arith.constant 0 : index
    %c0_2 = arith.constant 0 : index
    %1 = vector.load %arg2[%c0_1, %c0_2] : memref<128x2048xbf16, #tpu.memory_space<vmem>>, vector<128x2048xbf16>
    %cst = arith.constant dense<0.000000e+00> : vector<128x2048xf32>
    %2 = tpu.matmul %0, %1, %cst {dimension_numbers = #tpu.dot_dimension_numbers<[1], [0], [0], [1], [0, 0, 1, 1], [], []>} : vector<128x128xbf16>, vector<128x2048xbf16>, vector<128x2048xf32> -> vector<128x2048xf32>
    %c0_3 = arith.constant 0 : index
    %c0_4 = arith.constant 0 : index
    %3 = vector.load %arg3[%c0_3, %c0_4] : memref<1x2048xf32, #tpu.memory_space<vmem>>, vector<1x2048xf32>
    %4 = vector.broadcast %3 : vector<1x2048xf32> to vector<128x2048xf32>
    %5 = arith.addf %2, %4 : vector<128x2048xf32>
    %cst_5 = arith.constant 0.000000e+00 : f32
    %6 = vector.broadcast %cst_5 : f32 to vector<128x2048xf32>
    %7 = arith.maximumf %5, %6 : vector<128x2048xf32>
    %8 = arith.truncf %7 : vector<128x2048xf32> to vector<128x2048xbf16>
    %c0_6 = arith.constant 0 : index
    %c0_7 = arith.constant 0 : index
    %9 = vector.load %arg6[%c0_6, %c0_7] : memref<128x2048xbf16, #tpu.memory_space<vmem>>, vector<128x2048xbf16>
    tpu.vector_store %arg6[%c0_6, %c0_7], %8 {strides = array<i32>} : memref<128x2048xbf16, #tpu.memory_space<vmem>>, vector<128x2048xbf16>,
    %10 = arith.truncf %7 : vector<128x2048xf32> to vector<128x2048xbf16>
    %c0_8 = arith.constant 0 : index
    %c0_9 = arith.constant 0 : index
    %11 = vector.load %arg4[%c0_8, %c0_9] : memref<2048x128xbf16, #tpu.memory_space<vmem>>, vector<2048x128xbf16>
    %cst_10 = arith.constant dense<0.000000e+00> : vector<128x128xf32>
    %12 = tpu.matmul %10, %11, %cst_10 {dimension_numbers = #tpu.dot_dimension_numbers<[1], [0], [0], [1], [0, 0, 1, 1], [], []>} : vector<128x2048xbf16>, vector<2048x128xbf16>, vector<128x128xf32> -> vector<128x128xf32>
    %c0_11 = arith.constant 0 : index
    %c0_12 = arith.constant 0 : index
    %13 = vector.load %arg5[%c0_11, %c0_12] : memref<128x128xf32, #tpu.memory_space<vmem>>, vector<128x128xf32>
    tpu.vector_store %arg5[%c0_11, %c0_12], %12 {strides = array<i32>} : memref<128x128xf32, #tpu.memory_space<vmem>>, vector<128x128xf32>,
    return
  }
  func.func @transform_0(%arg0: i32) -> (i32, i32) {
    %c0_i32 = arith.constant 0 : i32
    %c0_i32_0 = arith.constant 0 : i32
    return %arg0, %c0_i32 : i32, i32
  }
  func.func @transform_1(%arg0: i32) -> (i32, i32) {
    %c0_i32 = arith.constant 0 : i32
    %c0_i32_0 = arith.constant 0 : i32
    %c0_i32_1 = arith.constant 0 : i32
    return %c0_i32, %c0_i32_0 : i32, i32
  }
  func.func @transform_2(%arg0: i32) -> (i32, i32) {
    %c0_i32 = arith.constant 0 : i32
    %c0_i32_0 = arith.constant 0 : i32
    %c0_i32_1 = arith.constant 0 : i32
    return %c0_i32, %c0_i32_0 : i32, i32
  }
  func.func @transform_3(%arg0: i32) -> (i32, i32) {
    %c0_i32 = arith.constant 0 : i32
    %c0_i32_0 = arith.constant 0 : i32
    %c0_i32_1 = arith.constant 0 : i32
    return %c0_i32, %c0_i32_0 : i32, i32
  }
  func.func @transform_4(%arg0: i32) -> (i32, i32) {
    %c0_i32 = arith.constant 0 : i32
    %c0_i32_0 = arith.constant 0 : i32
    return %arg0, %c0_i32 : i32, i32
  }
  func.func @transform_5(%arg0: i32) -> (i32, i32) {
    %c0_i32 = arith.constant 0 : i32
    %c0_i32_0 = arith.constant 0 : i32
    return %arg0, %c0_i32 : i32, i32
  }
}

</mosaic_0001>

<bundles_post_ra>
// kernel: tpu_custom_call.1
= control target key start
LH: loop header
LB: loop body
LE: loop exit
PB: predicated region body
PF: predicated region fallthrough
CT: control target
= control target key end

     0   :  { %11 = vsyncpa [#allocation3], 0  ;;  %s7311_s0 = inlined_call_operand.hbm [shape: bf16[128,128], index: 0, kind: input, shape index: {}]   ;;  %s7312_s1 = inlined_call_operand.hbm [shape: bf16[128,2048], index: 1, kind: input, shape index: {}]   ;;  %s7313_s2 = inlined_call_operand.hbm [shape: f32[1,2048], index: 2, kind: input, shape index: {}]   ;;  %s7314_s3 = inlined_call_operand.hbm [shape: bf16[2048,128], index: 3, kind: input, shape index: {}]   ;;  %s7315_s4 = inlined_call_operand.hbm [shape: f32[128,128], index: 4, kind: output, shape index: {0}]   ;;  %s7316_s5 = inlined_call_operand.hbm [shape: bf16[128,2048], index: 5, kind: output, shape index: {1}]  }
   0x1   :  { %12 = vsyncpa [#allocation6], 0 }
   0x2   :  { %13 = vsyncpa [#allocation9], 0 }
   0x3   :  { %14 = vsyncpa [#allocation4], 0  ;;  %s33_s20 = sshll.u32 %s7312_s1, 4  ;;  %s34_s20 = int_to_ptr.hbm [resolvable:$true] %s33_s20 }
   0x4   :  { %15 = vsyncpa [#allocation12], 0  ;;  %s6243_s21 = smov [#allocation5]   ;;  %s20_s25 = sshll.u32 %s7311_s0, 4  ;;  %s21_s25 = int_to_ptr.hbm [resolvable:$true] %s20_s25 }
   0x5   :  { %s35_s22 = sshll.u32 %s6243_s21, 4  ;;  %s6244_s26 = smov 1024   ;;  %s36_s22 = int_to_ptr.vmem [resolvable:$true] %s35_s22 }
   0x6   :  { %s6245_s27 = smov 64   ;;  %s6246_s28 = smov [#allocation2]  }
   0x7   :  { %41 = dma.hbm_to_vmem [thread:$0]  %s34_s20, 16384, %s36_s22, [#allocation6], %s6244_s26, %s6244_s26, %s6245_s27  }
   0x8   :  { %s22_s29 = sshll.u32 %s6246_s28, 4  ;;  %s47_s6 = sshll.u32 %s7313_s2, 4  ;;  %s23_s29 = int_to_ptr.vmem [resolvable:$true] %s22_s29  ;;  %s48_s6 = int_to_ptr.hbm [resolvable:$true] %s47_s6 }
   0x9   :  { %s6247_s7 = smov 4   ;;  %s6248_s0 = smov [#allocation7]  }
   0xa   :  { %28 = dma.hbm_to_vmem [thread:$0]  %s21_s25, 1024, %s23_s29, [#allocation3], %s6245_s27, %s6245_s27, %s6247_s7  }
   0xb   :  { %s49_s8 = sshll.u32 %s6248_s0, 4  ;;  %s57_s11 = sshll.u32 %s7314_s3, 4  ;;  %s50_s8 = int_to_ptr.vmem [resolvable:$true] %s49_s8  ;;  %s58_s11 = int_to_ptr.hbm [resolvable:$true] %s57_s11 }
   0xc   :  { %52 = dma.hbm_to_vmem [thread:$0]  %s48_s6, 256, %s50_s8, [#allocation6]  }
   0xd   :  { %s6249_s12 = smov [#allocation8]  }
   0xe   :  { %s59_s13 = sshll.u32 %s6249_s12, 4  ;;  %s60_s13 = int_to_ptr.vmem [resolvable:$true] %s59_s13 }
   0xf   :  { %65 = dma.hbm_to_vmem [thread:$0]  %s58_s11, 16384, %s60_s13, [#allocation9], %s6245_s27, %s6245_s27, %s6247_s7  }
  0x10   :  { %6233 = dma.done.wait [#allocation3], 1024  }
  0x11   :  { %6234 = vsyncadd [#allocation3], 4294966272 }
  0x12   :  { %6235 = dma.done.wait [#allocation6], 16640  }
  0x13   :  { %6236 = vsyncadd [#allocation6], 4294950656 }
  0x14   :  { %6237 = dma.done.wait [#allocation9], 16384  }
  0x15   :  { %6238 = vsyncadd [#allocation9], 4294950912  ;;  %v5231_v0 = vld [vmem:[#allocation5 + $0x380] sm:$0xf]  ;;  %v5925_v2 = vld [vmem:[#allocation5 + $0x384] sm:$0xf] }
  0x16   :  { %v5933_v1 = vld [vmem:[#allocation5 + $0x3bc] sm:$0xf0]  ;;  %v5233_v4 = vld [vmem:[#allocation5 + $0x3c0] sm:$0xf0]  ;;  %v5239_v5 = vld [vmem:[#allocation5 + $0x388] sm:$0xf] }
  0x17   :  { %v5232_v3 = vor.u32 %v5933_v1, %v5231_v0  ;;  %v5934_v6 = vld [vmem:[#allocation5 + $0x3c4] sm:$0xf0]  ;;  %v5236_v7 = vor.u32 %v5925_v2, %v5233_v4  ;;  %v5926_v9 = vld [vmem:[#allocation5 + $0x38c] sm:$0xf]  ;;  %v5167_v11 = vld [vmem:[#allocation5 + $0x300] sm:$0xf] }
  0x18   :  { %v5240_v8 = vor.u32 %v5934_v6, %v5239_v5  ;;  %v5241_v10 = vld [vmem:[#allocation5 + $0x3c8] sm:$0xf0]  ;;  %v5917_v13 = vld [vmem:[#allocation5 + $0x33c] sm:$0xf0]  ;;  %v5909_v14 = vld [vmem:[#allocation5 + $0x304] sm:$0xf] }
  0x19   :  { %950 = vmatpush.bf16.msra.mxu0 %v5232_v3  ;;  %v5244_v12 = vor.u32 %v5926_v9, %v5241_v10  ;;  %v5169_v15 = vld [vmem:[#allocation5 + $0x340] sm:$0xf0]  ;;  %999 = vmatpush.bf16.msra.mxu1 %v5236_v7  ;;  %v5168_v16 = vor.u32 %v5917_v13, %v5167_v11  ;;  %v5175_v18 = vld [vmem:[#allocation5 + $0x308] sm:$0xf]  ;;  %v5910_v20 = vld [vmem:[#allocation5 + $0x30c] sm:$0xf] }
  0x1a   :  { %1048 = vmatpush.bf16.msra.mxu2 %v5240_v8  ;;  %v5172_v17 = vor.u32 %v5909_v14, %v5169_v15  ;;  %v5918_v19 = vld [vmem:[#allocation5 + $0x344] sm:$0xf0]  ;;  %v5177_v22 = vld [vmem:[#allocation5 + $0x348] sm:$0xf0]  ;;  %v5103_v23 = vld [vmem:[#allocation5 + $0x280] sm:$0xf] }
  0x1b   :  { %1097 = vmatpush.bf16.msra.mxu3 %v5244_v12  ;;  %v5176_v21 = vor.u32 %v5918_v19, %v5175_v18  ;;  %v5901_v24 = vld [vmem:[#allocation5 + $0x2bc] sm:$0xf0]  ;;  %v5180_v25 = vor.u32 %v5910_v20, %v5177_v22  ;;  %v5893_v26 = vld [vmem:[#allocation5 + $0x284] sm:$0xf]  ;;  %v5111_v28 = vld [vmem:[#allocation5 + $0x288] sm:$0xf] }
  0x1c   :  { %v5105_v27 = vld [vmem:[#allocation5 + $0x2c0] sm:$0xf0]  ;;  %v5104_v29 = vor.u32 %v5901_v24, %v5103_v23  ;;  %v5902_v30 = vld [vmem:[#allocation5 + $0x2c4] sm:$0xf0]  ;;  %v5894_v31 = vld [vmem:[#allocation5 + $0x28c] sm:$0xf] }
  0x1d   :  { %951 = vmatpush.bf16.msra.mxu0 %v5168_v16  ;;  %v5113_v32 = vld [vmem:[#allocation5 + $0x2c8] sm:$0xf0]  ;;  %1000 = vmatpush.bf16.msra.mxu1 %v5172_v17  ;;  %v5108_v33 = vor.u32 %v5893_v26, %v5105_v27  ;;  %v5112_v34 = vor.u32 %v5902_v30, %v5111_v28  ;;  %v5039_v35 = vld [vmem:[#allocation5 + $0x200] sm:$0xf]  ;;  %v5877_v37 = vld [vmem:[#allocation5 + $0x204] sm:$0xf] }
  0x1e   :  { %1049 = vmatpush.bf16.msra.mxu2 %v5176_v21  ;;  %v5885_v36 = vld [vmem:[#allocation5 + $0x23c] sm:$0xf0]  ;;  %v5116_v38 = vor.u32 %v5894_v31, %v5113_v32  ;;  %v5041_v39 = vld [vmem:[#allocation5 + $0x240] sm:$0xf0]  ;;  %v5047_v40 = vld [vmem:[#allocation5 + $0x208] sm:$0xf] }
  0x1f   :  { %1098 = vmatpush.bf16.msra.mxu3 %v5180_v25  ;;  %v5886_v41 = vld [vmem:[#allocation5 + $0x244] sm:$0xf0]  ;;  %v5878_v42 = vld [vmem:[#allocation5 + $0x20c] sm:$0xf]  ;;  %v5040_v44 = vor.u32 %v5885_v36, %v5039_v35  ;;  %v5044_v45 = vor.u32 %v5877_v37, %v5041_v39  ;;  %v4975_v47 = vld [vmem:[#allocation5 + $0x180] sm:$0xf] }
  0x20   :  { %v5049_v43 = vld [vmem:[#allocation5 + $0x248] sm:$0xf0]  ;;  %v5048_v46 = vor.u32 %v5886_v41, %v5047_v40  ;;  %v5869_v48 = vld [vmem:[#allocation5 + $0x1bc] sm:$0xf0]  ;;  %v5861_v49 = vld [vmem:[#allocation5 + $0x184] sm:$0xf] }
  0x21   :  { %952 = vmatpush.bf16.msra.mxu0 %v5104_v29  ;;  %1001 = vmatpush.bf16.msra.mxu1 %v5108_v33  ;;  %v5052_v50 = vor.u32 %v5878_v42, %v5049_v43  ;;  %v4977_v51 = vld [vmem:[#allocation5 + $0x1c0] sm:$0xf0]  ;;  %v4983_v52 = vld [vmem:[#allocation5 + $0x188] sm:$0xf]  ;;  %v5862_v54 = vld [vmem:[#allocation5 + $0x18c] sm:$0xf]  ;;  %v4976_v56 = vor.u32 %v5869_v48, %v4975_v47 }
  0x22   :  { %1050 = vmatpush.bf16.msra.mxu2 %v5112_v34  ;;  %v5870_v53 = vld [vmem:[#allocation5 + $0x1c4] sm:$0xf0]  ;;  %v4985_v55 = vld [vmem:[#allocation5 + $0x1c8] sm:$0xf0]  ;;  %v4980_v57 = vor.u32 %v5861_v49, %v4977_v51  ;;  %v4911_v59 = vld [vmem:[#allocation5 + $0x100] sm:$0xf] }
  0x23   :  { %1099 = vmatpush.bf16.msra.mxu3 %v5116_v38  ;;  %v4984_v58 = vor.u32 %v5870_v53, %v4983_v52  ;;  %v5853_v60 = vld [vmem:[#allocation5 + $0x13c] sm:$0xf0]  ;;  %v5845_v61 = vld [vmem:[#allocation5 + $0x104] sm:$0xf]  ;;  %v4988_v62 = vor.u32 %v5862_v54, %v4985_v55  ;;  %v4919_v0 = vld [vmem:[#allocation5 + $0x108] sm:$0xf] }
  0x24   :  { %v4913_v63 = vld [vmem:[#allocation5 + $0x140] sm:$0xf0]  ;;  %v5854_v1 = vld [vmem:[#allocation5 + $0x144] sm:$0xf0]  ;;  %v5846_v2 = vld [vmem:[#allocation5 + $0x10c] sm:$0xf]  ;;  %v4912_v4 = vor.u32 %v5853_v60, %v4911_v59 }
  0x25   :  { %953 = vmatpush.bf16.msra.mxu0 %v5040_v44  ;;  %1002 = vmatpush.bf16.msra.mxu1 %v5044_v45  ;;  %v4921_v3 = vld [vmem:[#allocation5 + $0x148] sm:$0xf0]  ;;  %v4916_v5 = vor.u32 %v5845_v61, %v4913_v63  ;;  %v4920_v6 = vor.u32 %v5854_v1, %v4919_v0  ;;  %v4847_v7 = vld [vmem:[#allocation5 + $0x80] sm:$0xf]  ;;  %v5829_v9 = vld [vmem:[#allocation5 + $0x84] sm:$0xf] }
  0x26   :  { %1051 = vmatpush.bf16.msra.mxu2 %v5048_v46  ;;  %v5837_v8 = vld [vmem:[#allocation5 + $0xbc] sm:$0xf0]  ;;  %v4924_v10 = vor.u32 %v5846_v2, %v4921_v3  ;;  %v4849_v11 = vld [vmem:[#allocation5 + $0xc0] sm:$0xf0]  ;;  %v4855_v12 = vld [vmem:[#allocation5 + $0x88] sm:$0xf] }
  0x27   :  { %1100 = vmatpush.bf16.msra.mxu3 %v5052_v50  ;;  %v5838_v13 = vld [vmem:[#allocation5 + $0xc4] sm:$0xf0]  ;;  %v5830_v14 = vld [vmem:[#allocation5 + $0x8c] sm:$0xf]  ;;  %v4848_v16 = vor.u32 %v5837_v8, %v4847_v7  ;;  %v4783_v17 = vld [vmem:[#allocation5] sm:$0xf]  ;;  %v4852_v18 = vor.u32 %v5829_v9, %v4849_v11 }
  0x28   :  { %v4857_v15 = vld [vmem:[#allocation5 + $0xc8] sm:$0xf0]  ;;  %v4856_v19 = vor.u32 %v5838_v13, %v4855_v12  ;;  %v5821_v20 = vld [vmem:[#allocation5 + $0x3c] sm:$0xf0]  ;;  %v5813_v21 = vld [vmem:[#allocation5 + $0x4] sm:$0xf] }
  0x29   :  { %954 = vmatpush.bf16.msra.mxu0 %v4976_v56  ;;  %1003 = vmatpush.bf16.msra.mxu1 %v4980_v57  ;;  %v4785_v22 = vld [vmem:[#allocation5 + $0x40] sm:$0xf0]  ;;  %v4860_v23 = vor.u32 %v5830_v14, %v4857_v15  ;;  %v4791_v24 = vld [vmem:[#allocation5 + $0x8] sm:$0xf]  ;;  %v5814_v26 = vld [vmem:[#allocation5 + $0xc] sm:$0xf]  ;;  %v4784_v30 = vor.u32 %v5821_v20, %v4783_v17 }
  0x2a   :  { %1052 = vmatpush.bf16.msra.mxu2 %v4984_v58  ;;  %v5822_v25 = vld [vmem:[#allocation5 + $0x44] sm:$0xf0]  ;;  %v4793_v27 = vld [vmem:[#allocation5 + $0x48] sm:$0xf0]  ;;  %v5255_v28 = vld [vmem:[#allocation5 + $0x398] sm:$0xf]  ;;  %v4788_v33 = vor.u32 %v5813_v21, %v4785_v22 }
  0x2b   :  { %1101 = vmatpush.bf16.msra.mxu3 %v4988_v62  ;;  %v5936_v29 = vld [vmem:[#allocation5 + $0x3d4] sm:$0xf0]  ;;  %v5928_v31 = vld [vmem:[#allocation5 + $0x39c] sm:$0xf]  ;;  %v4792_v34 = vor.u32 %v5822_v25, %v4791_v24  ;;  %v6303_v35 = vld [vmem:[#allocation2] sm:$0xff]  ;;  %v4796_v36 = vor.u32 %v5814_v26, %v4793_v27  ;;  %s6250_s2 = smov [#allocation11]  }
  0x2c   :  { %v5257_v32 = vld [vmem:[#allocation5 + $0x3d8] sm:$0xf0]  ;;  %v5256_v37 = vor.u32 %v5936_v29, %v5255_v28  ;;  %v5247_v38 = vld [vmem:[#allocation5 + $0x390] sm:$0xf]  ;;  %v5927_v40 = vld [vmem:[#allocation5 + $0x394] sm:$0xf] }
  0x2d   :  { %955 = vmatpush.bf16.msra.mxu0 %v4912_v4  ;;  %1004 = vmatpush.bf16.msra.mxu1 %v4916_v5  ;;  %v5935_v39 = vld [vmem:[#allocation5 + $0x3cc] sm:$0xf0]  ;;  %v5260_v41 = vor.u32 %v5928_v31, %v5257_v32  ;;  %v5249_v42 = vld [vmem:[#allocation5 + $0x3d0] sm:$0xf0]  ;;  %v5191_v43 = vld [vmem:[#allocation5 + $0x318] sm:$0xf] }
  0x2e   :  { %1053 = vmatpush.bf16.msra.mxu2 %v4920_v6  ;;  %v5920_v44 = vld [vmem:[#allocation5 + $0x354] sm:$0xf0]  ;;  %v5912_v45 = vld [vmem:[#allocation5 + $0x31c] sm:$0xf]  ;;  %v5248_v47 = vor.u32 %v5935_v39, %v5247_v38  ;;  %v5252_v48 = vor.u32 %v5927_v40, %v5249_v42  ;;  %v5183_v50 = vld [vmem:[#allocation5 + $0x310] sm:$0xf] }
  0x2f   :  { %1102 = vmatpush.bf16.msra.mxu3 %v4924_v10  ;;  %v5193_v46 = vld [vmem:[#allocation5 + $0x358] sm:$0xf0]  ;;  %v5192_v49 = vor.u32 %v5920_v44, %v5191_v43  ;;  %v5919_v51 = vld [vmem:[#allocation5 + $0x34c] sm:$0xf0]  ;;  %v5911_v53 = vld [vmem:[#allocation5 + $0x314] sm:$0xf] }
  0x30   :  { %v5196_v52 = vor.u32 %v5912_v45, %v5193_v46  ;;  %v5185_v54 = vld [vmem:[#allocation5 + $0x350] sm:$0xf0]  ;;  %v5184_v55 = vor.u32 %v5919_v51, %v5183_v50  ;;  %v5127_v56 = vld [vmem:[#allocation5 + $0x298] sm:$0xf]  ;;  %v5119_v58 = vld [vmem:[#allocation5 + $0x290] sm:$0xf] }
  0x31   :  { %956 = vmatpush.bf16.msra.mxu0 %v4848_v16  ;;  %1005 = vmatpush.bf16.msra.mxu1 %v4852_v18  ;;  %v5904_v57 = vld [vmem:[#allocation5 + $0x2d4] sm:$0xf0]  ;;  %v5188_v59 = vor.u32 %v5911_v53, %v5185_v54  ;;  %v5903_v61 = vld [vmem:[#allocation5 + $0x2cc] sm:$0xf0]  ;;  %v5896_v62 = vld [vmem:[#allocation5 + $0x29c] sm:$0xf] }
  0x32   :  { %1054 = vmatpush.bf16.msra.mxu2 %v4856_v19  ;;  %v5128_v60 = vor.u32 %v5904_v57, %v5127_v56  ;;  %v5129_v63 = vld [vmem:[#allocation5 + $0x2d8] sm:$0xf0]  ;;  %v5895_v1 = vld [vmem:[#allocation5 + $0x294] sm:$0xf]  ;;  %v5120_v3 = vor.u32 %v5903_v61, %v5119_v58  ;;  %v6309_v5 = vld [vmem:[#allocation2 + $0x8] sm:$0xff]  ;;  %s4727_s3 = sshll.u32 %s6250_s2, 4  ;;  %s4728_s3 = int_to_ptr.vmem [resolvable:$true] %s4727_s3 }
  0x33   :  { %1103 = vmatpush.bf16.msra.mxu3 %v4860_v23  ;;  %v5132_v0 = vor.u32 %v5896_v62, %v5129_v63  ;;  %v5121_v2 = vld [vmem:[#allocation5 + $0x2d0] sm:$0xf0]  ;;  %v5063_v6 = vld [vmem:[#allocation5 + $0x218] sm:$0xf]  ;;  %v5055_v8 = vld [vmem:[#allocation5 + $0x210] sm:$0xf] }
  0x34   :  { %v5124_v4 = vor.u32 %v5895_v1, %v5121_v2  ;;  %v5888_v7 = vld [vmem:[#allocation5 + $0x254] sm:$0xf0]  ;;  %v5887_v10 = vld [vmem:[#allocation5 + $0x24c] sm:$0xf0]  ;;  %v5880_v11 = vld [vmem:[#allocation5 + $0x21c] sm:$0xf] }
  0x35   :  { %957 = vmatpush.bf16.msra.mxu0 %v4784_v30  ;;  %1006 = vmatpush.bf16.msra.mxu1 %v4788_v33  ;;  %v5064_v9 = vor.u32 %v5888_v7, %v5063_v6  ;;  %v5065_v12 = vld [vmem:[#allocation5 + $0x258] sm:$0xf0]  ;;  %v5056_v13 = vor.u32 %v5887_v10, %v5055_v8  ;;  %v5879_v15 = vld [vmem:[#allocation5 + $0x214] sm:$0xf]  ;;  %v4999_v19 = vld [vmem:[#allocation5 + $0x198] sm:$0xf] }
  0x36   :  { %1055 = vmatpush.bf16.msra.mxu2 %v4792_v34  ;;  %v5068_v14 = vor.u32 %v5880_v11, %v5065_v12  ;;  %v5057_v16 = vld [vmem:[#allocation5 + $0x250] sm:$0xf0]  ;;  %v5872_v20 = vld [vmem:[#allocation5 + $0x1d4] sm:$0xf0]  ;;  %v4991_v21 = vld [vmem:[#allocation5 + $0x190] sm:$0xf] }
  0x37   :  { %1104 = vmatpush.bf16.msra.mxu3 %v4796_v36  ;;  %v5060_v17 = vor.u32 %v5879_v15, %v5057_v16  ;;  %v6315_v18 = vld [vmem:[#allocation2 + $0x10] sm:$0xff]  ;;  %v5000_v22 = vor.u32 %v5872_v20, %v4999_v19  ;;  %v5864_v24 = vld [vmem:[#allocation5 + $0x19c] sm:$0xf]  ;;  %v4935_v32 = vld [vmem:[#allocation5 + $0x118] sm:$0xf]  ;;  %s4729_s16 = sshll.u32 %s7316_s5, 4  ;;  %s4730_s16 = int_to_ptr.hbm [resolvable:$true] %s4729_s16 }
  0x38   :  { %958 = vmatmul.bf16.vlgmr.msra.gmra.mxu0 %v6303_v35  ;;  %1007 = vmatmul.bf16.vlgmr.msra.gmra.mxu1 %v6303_v35  ;;  %v5871_v23 = vld [vmem:[#allocation5 + $0x1cc] sm:$0xf0]  ;;  %v5001_v25 = vld [vmem:[#allocation5 + $0x1d8] sm:$0xf0]  ;;  %v5863_v28 = vld [vmem:[#allocation5 + $0x194] sm:$0xf] }
  0x39   :  { %1056 = vmatmul.bf16.vlgmr.msra.gmra.mxu2 %v6303_v35  ;;  %1146 = vmatpush.bf16.msrb.mxu0 %v5248_v47  ;;  %v4992_v26 = vor.u32 %v5871_v23, %v4991_v21  ;;  %v5004_v27 = vor.u32 %v5864_v24, %v5001_v25  ;;  %v4993_v29 = vld [vmem:[#allocation5 + $0x1d0] sm:$0xf0]  ;;  %v6321_v31 = vld [vmem:[#allocation2 + $0x18] sm:$0xff]  ;;  %v4927_v34 = vld [vmem:[#allocation5 + $0x110] sm:$0xf]  ;;  %s6251_s5 = smov [#allocation10]  }
  0x3a   :  { %1244 = vmatpush.bf16.msrb.mxu2 %v5256_v37  ;;  %1105 = vmatmul.bf16.vlgmr.msra.gmra.mxu3 %v6303_v35  ;;  %v4996_v30 = vor.u32 %v5863_v28, %v4993_v29  ;;  %v5856_v33 = vld [vmem:[#allocation5 + $0x154] sm:$0xf0]  ;;  %v5855_v37 = vld [vmem:[#allocation5 + $0x14c] sm:$0xf0]  ;;  %v5848_v38 = vld [vmem:[#allocation5 + $0x11c] sm:$0xf] }
  0x3b   :  { %1293 = vmatpush.bf16.msrb.mxu3 %v5260_v41  ;;  %1195 = vmatpush.bf16.msrb.mxu1 %v5252_v48  ;;  %v4936_v36 = vor.u32 %v5856_v33, %v4935_v32  ;;  %v4937_v39 = vld [vmem:[#allocation5 + $0x158] sm:$0xf0]  ;;  %v4928_v40 = vor.u32 %v5855_v37, %v4927_v34  ;;  %v5847_v42 = vld [vmem:[#allocation5 + $0x114] sm:$0xf]  ;;  %v6327_v45 = vld [vmem:[#allocation2 + $0x20] sm:$0xff]  ;;  %s4714_s17 = sshll.u32 %s6251_s5, 4  ;;  %s4715_s17 = int_to_ptr.vmem [resolvable:$true] %s4714_s17 }
  0x3c   :  { %v4940_v41 = vor.u32 %v5848_v38, %v4937_v39  ;;  %v4929_v43 = vld [vmem:[#allocation5 + $0x150] sm:$0xf0]  ;;  %v4871_v46 = vld [vmem:[#allocation5 + $0x98] sm:$0xf]  ;;  %v4863_v48 = vld [vmem:[#allocation5 + $0x90] sm:$0xf] }
  0x3d   :  { %1147 = vmatpush.bf16.msrb.mxu0 %v5184_v55  ;;  %v4932_v44 = vor.u32 %v5847_v42, %v4929_v43  ;;  %v5840_v47 = vld [vmem:[#allocation5 + $0xd4] sm:$0xf0]  ;;  %v5839_v50 = vld [vmem:[#allocation5 + $0xcc] sm:$0xf0]  ;;  %v5832_v51 = vld [vmem:[#allocation5 + $0x9c] sm:$0xf] }
  0x3e   :  { %1245 = vmatpush.bf16.msrb.mxu2 %v5192_v49  ;;  %v4872_v49 = vor.u32 %v5840_v47, %v4871_v46  ;;  %v4864_v53 = vor.u32 %v5839_v50, %v4863_v48  ;;  %v5831_v55 = vld [vmem:[#allocation5 + $0x94] sm:$0xf]  ;;  %v6333_v58 = vld [vmem:[#allocation2 + $0x28] sm:$0xff]  ;;  %v4799_v61 = vld [vmem:[#allocation5 + $0x10] sm:$0xf]  ;;  %s4716_s20 = sshll.u32 %s7315_s4, 4  ;;  %s4717_s20 = int_to_ptr.hbm [resolvable:$true] %s4716_s20 }
  0x3f   :  { %1294 = vmatpush.bf16.msrb.mxu3 %v5196_v52  ;;  %1196 = vmatpush.bf16.msrb.mxu1 %v5188_v59  ;;  %v4873_v52 = vld [vmem:[#allocation5 + $0xd8] sm:$0xf0]  ;;  %v4865_v56 = vld [vmem:[#allocation5 + $0xd0] sm:$0xf0]  ;;  %v4807_v59 = vld [vmem:[#allocation5 + $0x18] sm:$0xf] }
  0x40   :  { %v4876_v54 = vor.u32 %v5832_v51, %v4873_v52  ;;  %v4868_v57 = vor.u32 %v5831_v55, %v4865_v56  ;;  %v5823_v63 = vld [vmem:[#allocation5 + $0x4c] sm:$0xf0]  ;;  %v4809_v1 = vld [vmem:[#allocation5 + $0x58] sm:$0xf0]  ;;  %v4801_v6 = vld [vmem:[#allocation5 + $0x50] sm:$0xf0] }
  0x41   :  { %1148 = vmatpush.bf16.msrb.mxu0 %v5120_v3  ;;  %v4800_v2 = vor.u32 %v5823_v63, %v4799_v61  ;;  %v6339_v8 = vld [vmem:[#allocation2 + $0x30] sm:$0xff]  ;;  %v5938_v10 = vld [vmem:[#allocation5 + $0x3e4] sm:$0xf0]  ;;  %v5263_v11 = vld [vmem:[#allocation5 + $0x3a0] sm:$0xf]  ;;  %s6252_s21 = smov 128  }
  0x42   :  { %1246 = vmatpush.bf16.msrb.mxu2 %v5128_v60  ;;  %v5824_v60 = vld [vmem:[#allocation5 + $0x54] sm:$0xf0]  ;;  %v5273_v15 = vld [vmem:[#allocation5 + $0x3e8] sm:$0xf0]  ;;  %v5929_v20 = vld [vmem:[#allocation5 + $0x3a4] sm:$0xf] }
  0x43   :  { %1295 = vmatpush.bf16.msrb.mxu3 %v5132_v0  ;;  %1197 = vmatpush.bf16.msrb.mxu1 %v5124_v4  ;;  %v4808_v62 = vor.u32 %v5824_v60, %v4807_v59  ;;  %v5816_v0 = vld [vmem:[#allocation5 + $0x1c] sm:$0xf]  ;;  %v5815_v4 = vld [vmem:[#allocation5 + $0x14] sm:$0xf]  ;;  %v5265_v21 = vld [vmem:[#allocation5 + $0x3e0] sm:$0xf0] }
  0x44   :  { %v4812_v3 = vor.u32 %v5816_v0, %v4809_v1  ;;  %v4804_v7 = vor.u32 %v5815_v4, %v4801_v6  ;;  %v6345_v19 = vld [vmem:[#allocation2 + $0x38] sm:$0xff]  ;;  %v6351_v23 = vld [vmem:[#allocation7] sm:$0xff]  ;;  %v5207_v24 = vld [vmem:[#allocation5 + $0x328] sm:$0xf]  ;;  %s6253_s22 = smov 8  }
  0x45   :  { %1149 = vmatpush.bf16.msrb.mxu0 %v5056_v13  ;;  %v5937_v13 = vld [vmem:[#allocation5 + $0x3dc] sm:$0xf0]  ;;  %v5922_v25 = vld [vmem:[#allocation5 + $0x364] sm:$0xf0]  ;;  %v5914_v29 = vld [vmem:[#allocation5 + $0x32c] sm:$0xf] }
  0x46   :  { %1247 = vmatpush.bf16.msrb.mxu2 %v5064_v9  ;;  %v5271_v9 = vld [vmem:[#allocation5 + $0x3a8] sm:$0xf]  ;;  %v5264_v16 = vor.u32 %v5937_v13, %v5263_v11  ;;  %v5921_v28 = vld [vmem:[#allocation5 + $0x35c] sm:$0xf0]  ;;  %v6354_v34 = vperm.slane %v6351_v23, 0  ;;  %v6365_v47 = vperm.slane %v6351_v23, 2 }
  0x47   :  { %1296 = vmatpush.bf16.msrb.mxu3 %v5068_v14  ;;  %1198 = vmatpush.bf16.msrb.mxu1 %v5060_v17  ;;  %v5272_v12 = vor.u32 %v5938_v10, %v5271_v9  ;;  %v5930_v14 = vld [vmem:[#allocation5 + $0x3ac] sm:$0xf]  ;;  %v5913_v37 = vld [vmem:[#allocation5 + $0x324] sm:$0xf]  ;;  %v6369_v48 = vperm.slane %v6351_v23, 3 }
  0x48   :  { %963 = vmatmul.bf16.gmra.mxu0 %v6309_v5  ;;  %1012 = vmatmul.bf16.gmra.mxu1 %v6309_v5  ;;  %v5276_v17 = vor.u32 %v5930_v14, %v5273_v15  ;;  %v5201_v38 = vld [vmem:[#allocation5 + $0x360] sm:$0xf0]  ;;  %v5906_v55 = vld [vmem:[#allocation5 + $0x2e4] sm:$0xf0]  ;;  %v5135_v61 = vld [vmem:[#allocation5 + $0x2a0] sm:$0xf] }
  0x49   :  { %1061 = vmatmul.bf16.gmra.mxu2 %v6309_v5  ;;  %1150 = vmatpush.bf16.msrb.mxu0 %v4992_v26  ;;  %v5199_v26 = vld [vmem:[#allocation5 + $0x320] sm:$0xf]  ;;  %v5897_v14 = vld [vmem:[#allocation5 + $0x2a4] sm:$0xf] }
  0x4a   :  { %1110 = vmatmul.bf16.gmra.mxu3 %v6309_v5  ;;  %1248 = vmatpush.bf16.msrb.mxu2 %v5000_v22  ;;  %v5268_v22 = vor.u32 %v5929_v20, %v5265_v21  ;;  %v5200_v32 = vor.u32 %v5921_v28, %v5199_v26  ;;  %v5137_v15 = vld [vmem:[#allocation5 + $0x2e0] sm:$0xf0] }
  0x4b   :  { %1297 = vmatpush.bf16.msrb.mxu3 %v5004_v27  ;;  %1199 = vmatpush.bf16.msrb.mxu1 %v4996_v30  ;;  %v5208_v27 = vor.u32 %v5922_v25, %v5207_v24  ;;  %v5209_v30 = vld [vmem:[#allocation5 + $0x368] sm:$0xf0]  ;;  %v5140_v24 = vor.u32 %v5897_v14, %v5137_v15 }
  0x4c   :  { %v5212_v33 = vor.u32 %v5914_v29, %v5209_v30 }
  0x4d   :  { %1151 = vmatpush.bf16.msrb.mxu0 %v4928_v40  ;;  %v5204_v40 = vor.u32 %v5913_v37, %v5201_v38 }
  0x4e   :  { %1249 = vmatpush.bf16.msrb.mxu2 %v4936_v36  ;;  %v6357_v36 = vperm.slane %v6351_v23, 1 }
  0x4f   :  { %1298 = vmatpush.bf16.msrb.mxu3 %v4940_v41  ;;  %1200 = vmatpush.bf16.msrb.mxu1 %v4932_v44 }
  0x51   :  { %1152 = vmatpush.bf16.msrb.mxu0 %v4864_v53 }
  0x52   :  { %1250 = vmatpush.bf16.msrb.mxu2 %v4872_v49 }
  0x53   :  { %1299 = vmatpush.bf16.msrb.mxu3 %v4876_v54  ;;  %1201 = vmatpush.bf16.msrb.mxu1 %v4868_v57  ;;  %v5143_v54 = vld [vmem:[#allocation5 + $0x2a8] sm:$0xf] }
  0x54   :  { %v5144_v60 = vor.u32 %v5906_v55, %v5143_v54 }
  0x55   :  { %1153 = vmatpush.bf16.msrb.mxu0 %v4800_v2  ;;  %v5145_v2 = vld [vmem:[#allocation5 + $0x2e8] sm:$0xf0] }
  0x56   :  { %1251 = vmatpush.bf16.msrb.mxu2 %v4808_v62  ;;  %v5898_v62 = vld [vmem:[#allocation5 + $0x2ac] sm:$0xf] }
  0x57   :  { %1300 = vmatpush.bf16.msrb.mxu3 %v4812_v3  ;;  %1202 = vmatpush.bf16.msrb.mxu1 %v4804_v7  ;;  %v5148_v6 = vor.u32 %v5898_v62, %v5145_v2 }
  0x58   :  { %968 = vmatmul.bf16.gmra.mxu0 %v6315_v18  ;;  %1017 = vmatmul.bf16.gmra.mxu1 %v6315_v18 }
  0x59   :  { %1066 = vmatmul.bf16.gmra.mxu2 %v6315_v18  ;;  %1342 = vmatpush.bf16.msra.mxu0 %v5264_v16 }
  0x5a   :  { %1115 = vmatmul.bf16.gmra.mxu3 %v6315_v18  ;;  %1440 = vmatpush.bf16.msra.mxu2 %v5272_v12 }
  0x5b   :  { %1489 = vmatpush.bf16.msra.mxu3 %v5276_v17  ;;  %1391 = vmatpush.bf16.msra.mxu1 %v5268_v22 }
  0x5d   :  { %1343 = vmatpush.bf16.msra.mxu0 %v5200_v32 }
  0x5e   :  { %1441 = vmatpush.bf16.msra.mxu2 %v5208_v27 }
  0x5f   :  { %1490 = vmatpush.bf16.msra.mxu3 %v5212_v33  ;;  %1392 = vmatpush.bf16.msra.mxu1 %v5204_v40 }
  0x62   :  { %1442 = vmatpush.bf16.msra.mxu2 %v5144_v60  ;;  %v5889_v60 = vld [vmem:[#allocation5 + $0x25c] sm:$0xf0] }
  0x63   :  { %1491 = vmatpush.bf16.msra.mxu3 %v5148_v6  ;;  %1393 = vmatpush.bf16.msra.mxu1 %v5140_v24 }
  0x68   :  { %973 = vmatmul.bf16.gmra.mxu0 %v6321_v31  ;;  %1022 = vmatmul.bf16.gmra.mxu1 %v6321_v31 }
  0x69   :  { %1071 = vmatmul.bf16.gmra.mxu2 %v6321_v31 }
  0x6a   :  { %1120 = vmatmul.bf16.gmra.mxu3 %v6321_v31 }
  0x78   :  { %978 = vmatmul.bf16.gmra.mxu0 %v6327_v45  ;;  %1027 = vmatmul.bf16.gmra.mxu1 %v6327_v45 }
  0x79   :  { %1076 = vmatmul.bf16.gmra.mxu2 %v6327_v45 }
  0x7a   :  { %1125 = vmatmul.bf16.gmra.mxu3 %v6327_v45 }
  0x88   :  { %983 = vmatmul.bf16.gmra.mxu0 %v6333_v58  ;;  %1032 = vmatmul.bf16.gmra.mxu1 %v6333_v58 }
  0x89   :  { %1081 = vmatmul.bf16.gmra.mxu2 %v6333_v58 }
  0x8a   :  { %1130 = vmatmul.bf16.gmra.mxu3 %v6333_v58 }
  0x98   :  { %988 = vmatmul.bf16.gmra.mxu0 %v6339_v8  ;;  %1037 = vmatmul.bf16.gmra.mxu1 %v6339_v8 }
  0x99   :  { %1086 = vmatmul.bf16.gmra.mxu2 %v6339_v8 }
  0x9a   :  { %1135 = vmatmul.bf16.gmra.mxu3 %v6339_v8 }
  0xa8   :  { %993 = vmatmul.bf16.gmra.mxu0 %v6345_v19  ;;  %1042 = vmatmul.bf16.gmra.mxu1 %v6345_v19 }
  0xa9   :  { %1091 = vmatmul.bf16.gmra.mxu2 %v6345_v19 }
  0xaa   :  { %1140 = vmatmul.bf16.gmra.mxu3 %v6345_v19 }
  0xb5   :  { %v959_v39 = vpop.f32.mrf.mxu0  ;;  %v1008_v42 = vpop.f32.mrf.mxu1 }
  0xb6   :  { %v960_v41 = vadd.f32 %v959_v39, %v6354_v34  ;;  %v1009_v43 = vadd.f32 %v1008_v42, %v6357_v36 }
  0xb8   :  { %v1734_v44 = vmax.f32 %v960_v41, 0.0  ;;  %1154 = vmatmul.bf16.vlgmr.msrb.gmra.mxu0 %v6303_v35  ;;  %v1735_v46 = vmax.f32 %v1009_v43, 0.0  ;;  %1203 = vmatmul.bf16.vlgmr.msrb.gmra.mxu1 %v6303_v35 }
  0xb9   :  { %1252 = vmatmul.bf16.vlgmr.msrb.gmra.mxu2 %v6303_v35 }
  0xba   :  { %1301 = vmatmul.bf16.vlgmr.msrb.gmra.mxu3 %v6303_v35  ;;  %v1990_v49 = vpack.c.bf16 %v1735_v46, %v1734_v44  ;;  %v5905_v35 = vld [vmem:[#allocation5 + $0x2dc] sm:$0xf0] }
  0xbb   :  { %v5136_v1 = vor.u32 %v5905_v35, %v5135_v61  ;;  %v5882_v61 = vld [vmem:[#allocation5 + $0x22c] sm:$0xf] }
  0xbc   :  { %v1057_v50 = vpop.f32.mrf.mxu2  ;;  %2118 = vst [vmem:[#allocation11] sm:$0xff] %v1990_v49  ;;  %v2630_v11 = vunpack.c.l.b16 %v1990_v49  ;;  %v2631_v12 = vunpack.c.h.b16 %v1990_v49 }
  0xbd   :  { %v1058_v51 = vadd.f32 %v1057_v50, %v6365_v47  ;;  %v1106_v52 = vpop.f32.mrf.mxu3  ;;  %v961_v53 = vpop.f32.mrf.mxu0  ;;  %1344 = vmatpush.bf16.msra.mxu0 %v5136_v1  ;;  %v5081_v1 = vld [vmem:[#allocation5 + $0x268] sm:$0xf0] }
  0xbe   :  { %v1107_v56 = vadd.f32 %v1106_v52, %v6369_v48  ;;  %v962_v57 = vadd.f32 %v961_v53, %v6354_v34  ;;  %v1010_v59 = vpop.f32.mrf.mxu1  ;;  %v5079_v52 = vld [vmem:[#allocation5 + $0x228] sm:$0xf] }
  0xbf   :  { %v1736_v63 = vmax.f32 %v1058_v51, 0.0  ;;  %v1011_v0 = vadd.f32 %v1010_v59, %v6357_v36  ;;  %v5890_v53 = vld [vmem:[#allocation5 + $0x264] sm:$0xf0]  ;;  %v5071_v59 = vld [vmem:[#allocation5 + $0x220] sm:$0xf] }
  0xc0   :  { %v1737_v3 = vmax.f32 %v1107_v56, 0.0  ;;  %v1750_v4 = vmax.f32 %v962_v57, 0.0 }
  0xc1   :  { %v1751_v7 = vmax.f32 %v1011_v0, 0.0  ;;  %v5072_v0 = vor.u32 %v5889_v60, %v5071_v59  ;;  %v5007_v60 = vld [vmem:[#allocation5 + $0x1a0] sm:$0xf] }
  0xc2   :  { %v1991_v9 = vpack.c.bf16 %v1737_v3, %v1736_v63  ;;  %v5080_v63 = vor.u32 %v5890_v53, %v5079_v52  ;;  %v5015_v52 = vld [vmem:[#allocation5 + $0x1a8] sm:$0xf] }
  0xc3   :  { %v1998_v10 = vpack.c.bf16 %v1751_v7, %v1750_v4  ;;  %v5084_v4 = vor.u32 %v5882_v61, %v5081_v1  ;;  %1345 = vmatpush.bf16.msra.mxu0 %v5072_v0  ;;  %v5874_v53 = vld [vmem:[#allocation5 + $0x1e4] sm:$0xf0]  ;;  %v5873_v61 = vld [vmem:[#allocation5 + $0x1dc] sm:$0xf0] }
  0xc4   :  { %2119 = vst [vmem:[#allocation11 + $0x8] sm:$0xff] %v1991_v9  ;;  %v1059_v13 = vpop.f32.mrf.mxu2  ;;  %v2632_v41 = vunpack.c.l.b16 %v1991_v9  ;;  %v2633_v42 = vunpack.c.h.b16 %v1991_v9  ;;  %1443 = vmatpush.bf16.msra.mxu2 %v5080_v63  ;;  %v5008_v1 = vor.u32 %v5873_v61, %v5007_v60 }
  0xc5   :  { %2126 = vst [vmem:[#allocation11 + $0x40] sm:$0xff] %v1998_v10  ;;  %v2646_v16 = vunpack.c.l.b16 %v1998_v10  ;;  %v2647_v17 = vunpack.c.h.b16 %v1998_v10  ;;  %v1060_v20 = vadd.f32 %v1059_v13, %v6365_v47  ;;  %v1108_v21 = vpop.f32.mrf.mxu3  ;;  %v964_v22 = vpop.f32.mrf.mxu0  ;;  %1492 = vmatpush.bf16.msra.mxu3 %v5084_v4 }
  0xc6   :  { %v1109_v25 = vadd.f32 %v1108_v21, %v6369_v48  ;;  %v965_v26 = vadd.f32 %v964_v22, %v6354_v34  ;;  %v1013_v27 = vpop.f32.mrf.mxu1 }
  0xc7   :  { %v6378_v28 = vpack.c.b16 %v2646_v16, %v2630_v11  ;;  %v6380_v29 = vpack.c.b16 %v2647_v17, %v2631_v12  ;;  %v1752_v30 = vmax.f32 %v1060_v20, 0.0  ;;  %v1014_v32 = vadd.f32 %v1013_v27, %v6357_v36  ;;  %v5881_v11 = vld [vmem:[#allocation5 + $0x224] sm:$0xf]  ;;  %1346 = vmatpush.bf16.msra.mxu0 %v5008_v1  ;;  %v5850_v1 = vld [vmem:[#allocation5 + $0x12c] sm:$0xf] }
  0xc8   :  { %v1753_v33 = vmax.f32 %v1109_v25, 0.0  ;;  %v1766_v37 = vmax.f32 %v965_v26, 0.0  ;;  %1159 = vmatmul.bf16.gmra.mxu0 %v6309_v5  ;;  %1208 = vmatmul.bf16.gmra.mxu1 %v6309_v5  ;;  %v5073_v12 = vld [vmem:[#allocation5 + $0x260] sm:$0xf0] }
  0xc9   :  { %v1767_v38 = vmax.f32 %v1014_v32, 0.0  ;;  %1257 = vmatmul.bf16.gmra.mxu2 %v6309_v5  ;;  %v5076_v20 = vor.u32 %v5881_v11, %v5073_v12 }
  0xca   :  { %v1999_v39 = vpack.c.bf16 %v1753_v33, %v1752_v30  ;;  %1306 = vmatmul.bf16.gmra.mxu3 %v6309_v5 }
  0xcb   :  { %v2006_v40 = vpack.c.bf16 %v1767_v38, %v1766_v37  ;;  %1394 = vmatpush.bf16.msra.mxu1 %v5076_v20 }
  0xcc   :  { %2127 = vst [vmem:[#allocation11 + $0x48] sm:$0xff] %v1999_v39  ;;  %v2648_v43 = vunpack.c.l.b16 %v1999_v39  ;;  %v2649_v44 = vunpack.c.h.b16 %v1999_v39  ;;  %v1062_v46 = vpop.f32.mrf.mxu2 }
  0xcd   :  { %2134 = vst [vmem:[#allocation11 + $0x80] sm:$0xff] %v2006_v40  ;;  %v1063_v49 = vadd.f32 %v1062_v46, %v6365_v47  ;;  %v1111_v50 = vpop.f32.mrf.mxu3  ;;  %v966_v51 = vpop.f32.mrf.mxu0  ;;  %v2662_v13 = vunpack.c.l.b16 %v2006_v40  ;;  %v2663_v14 = vunpack.c.h.b16 %v2006_v40 }
  0xce   :  { %v6388_v54 = vpack.c.b16 %v2648_v43, %v2632_v41  ;;  %v6390_v55 = vpack.c.b16 %v2649_v44, %v2633_v42  ;;  %v1112_v5 = vadd.f32 %v1111_v50, %v6369_v48  ;;  %v967_v56 = vadd.f32 %v966_v51, %v6354_v34  ;;  %v1015_v57 = vpop.f32.mrf.mxu1 }
  0xcf   :  { %v1768_v35 = vmax.f32 %v1063_v49, 0.0  ;;  %v1016_v62 = vadd.f32 %v1015_v57, %v6357_v36 }
  0xd0   :  { %v1769_v2 = vmax.f32 %v1112_v5, 0.0  ;;  %v1782_v3 = vmax.f32 %v967_v56, 0.0 }
  0xd1   :  { %v1783_v6 = vmax.f32 %v1016_v62, 0.0 }
  0xd2   :  { %v2007_v7 = vpack.c.bf16 %v1769_v2, %v1768_v35  ;;  %v5866_v35 = vld [vmem:[#allocation5 + $0x1ac] sm:$0xf] }
  0xd3   :  { %v2014_v9 = vpack.c.bf16 %v1783_v6, %v1782_v3  ;;  %v5017_v2 = vld [vmem:[#allocation5 + $0x1e8] sm:$0xf0] }
  0xd4   :  { %2135 = vst [vmem:[#allocation11 + $0x88] sm:$0xff] %v2007_v7  ;;  %v1064_v10 = vpop.f32.mrf.mxu2  ;;  %v2664_v43 = vunpack.c.l.b16 %v2007_v7  ;;  %v2665_v5 = vunpack.c.h.b16 %v2007_v7  ;;  %v5020_v7 = vor.u32 %v5866_v35, %v5017_v2 }
  0xd5   :  { %2142 = vst [vmem:[#allocation11 + $0xc0] sm:$0xff] %v2014_v9  ;;  %v1065_v15 = vadd.f32 %v1064_v10, %v6365_v47  ;;  %v1113_v16 = vpop.f32.mrf.mxu3  ;;  %v969_v17 = vpop.f32.mrf.mxu0  ;;  %v2678_v21 = vunpack.c.l.b16 %v2014_v9  ;;  %v2679_v22 = vunpack.c.h.b16 %v2014_v9 }
  0xd6   :  { %v1114_v24 = vadd.f32 %v1113_v16, %v6369_v48  ;;  %v970_v25 = vadd.f32 %v969_v17, %v6354_v34  ;;  %v1018_v26 = vpop.f32.mrf.mxu1  ;;  %1493 = vmatpush.bf16.msra.mxu3 %v5020_v7 }
  0xd7   :  { %v1784_v27 = vmax.f32 %v1065_v15, 0.0  ;;  %v1019_v30 = vadd.f32 %v1018_v26, %v6357_v36  ;;  %v6399_v32 = vpack.c.b16 %v2678_v21, %v2662_v13  ;;  %v6401_v33 = vpack.c.b16 %v2679_v22, %v2663_v14  ;;  %v5865_v13 = vld [vmem:[#allocation5 + $0x1a4] sm:$0xf] }
  0xd8   :  { %v1785_v37 = vmax.f32 %v1114_v24, 0.0  ;;  %v1798_v38 = vmax.f32 %v970_v25, 0.0  ;;  %1164 = vmatmul.bf16.gmra.mxu0 %v6315_v18  ;;  %1213 = vmatmul.bf16.gmra.mxu1 %v6315_v18  ;;  %v5009_v14 = vld [vmem:[#allocation5 + $0x1e0] sm:$0xf0] }
  0xd9   :  { %v1799_v39 = vmax.f32 %v1019_v30, 0.0  ;;  %1262 = vmatmul.bf16.gmra.mxu2 %v6315_v18  ;;  %v5012_v22 = vor.u32 %v5865_v13, %v5009_v14 }
  0xda   :  { %v2015_v40 = vpack.c.bf16 %v1785_v37, %v1784_v27  ;;  %1311 = vmatmul.bf16.gmra.mxu3 %v6315_v18  ;;  %v5016_v18 = vor.u32 %v5874_v53, %v5015_v52 }
  0xdb   :  { %v2022_v41 = vpack.c.bf16 %v1799_v39, %v1798_v38  ;;  %1395 = vmatpush.bf16.msra.mxu1 %v5012_v22 }
  0xdc   :  { %2143 = vst [vmem:[#allocation11 + $0xc8] sm:$0xff] %v2015_v40  ;;  %v1067_v42 = vpop.f32.mrf.mxu2  ;;  %v2680_v44 = vunpack.c.l.b16 %v2015_v40  ;;  %v2681_v46 = vunpack.c.h.b16 %v2015_v40  ;;  %1444 = vmatpush.bf16.msra.mxu2 %v5016_v18 }
  0xdd   :  { %2150 = vst [vmem:[#allocation11 + $0x100] sm:$0xff] %v2022_v41  ;;  %v1068_v49 = vadd.f32 %v1067_v42, %v6365_v47  ;;  %v1116_v50 = vpop.f32.mrf.mxu3  ;;  %v971_v51 = vpop.f32.mrf.mxu0  ;;  %v2694_v15 = vunpack.c.l.b16 %v2022_v41  ;;  %v2695_v16 = vunpack.c.h.b16 %v2022_v41 }
  0xde   :  { %v1117_v56 = vadd.f32 %v1116_v50, %v6369_v48  ;;  %v972_v57 = vadd.f32 %v971_v51, %v6354_v34  ;;  %v1020_v59 = vpop.f32.mrf.mxu1  ;;  %v6410_v62 = vpack.c.b16 %v2680_v44, %v2664_v43  ;;  %v6413_v3 = vpack.c.b16 %v2681_v46, %v2665_v5 }
  0xdf   :  { %v1800_v63 = vmax.f32 %v1068_v49, 0.0  ;;  %v1021_v0 = vadd.f32 %v1020_v59, %v6357_v36  ;;  %v5858_v59 = vld [vmem:[#allocation5 + $0x164] sm:$0xf0] }
  0xe0   :  { %v1801_v4 = vmax.f32 %v1117_v56, 0.0  ;;  %v1814_v6 = vmax.f32 %v972_v57, 0.0  ;;  %v4951_v57 = vld [vmem:[#allocation5 + $0x128] sm:$0xf] }
  0xe1   :  { %v1815_v9 = vmax.f32 %v1021_v0, 0.0  ;;  %v5857_v0 = vld [vmem:[#allocation5 + $0x15c] sm:$0xf0] }
  0xe2   :  { %v2023_v10 = vpack.c.bf16 %v1801_v4, %v1800_v63  ;;  %v4943_v63 = vld [vmem:[#allocation5 + $0x120] sm:$0xf] }
  0xe3   :  { %v2030_v11 = vpack.c.bf16 %v1815_v9, %v1814_v6  ;;  %v4944_v7 = vor.u32 %v5857_v0, %v4943_v63  ;;  %v4953_v9 = vld [vmem:[#allocation5 + $0x168] sm:$0xf0]  ;;  %v4887_v63 = vld [vmem:[#allocation5 + $0xa8] sm:$0xf] }
  0xe4   :  { %2151 = vst [vmem:[#allocation11 + $0x108] sm:$0xff] %v2023_v10  ;;  %v1069_v12 = vpop.f32.mrf.mxu2  ;;  %v2696_v50 = vunpack.c.l.b16 %v2023_v10  ;;  %v2697_v18 = vunpack.c.h.b16 %v2023_v10  ;;  %v4956_v13 = vor.u32 %v5850_v1, %v4953_v9  ;;  %v5842_v0 = vld [vmem:[#allocation5 + $0xe4] sm:$0xf0]  ;;  %v4879_v9 = vld [vmem:[#allocation5 + $0xa0] sm:$0xf] }
  0xe5   :  { %2158 = vst [vmem:[#allocation11 + $0x140] sm:$0xff] %v2030_v11  ;;  %v1070_v17 = vadd.f32 %v1069_v12, %v6365_v47  ;;  %v1118_v20 = vpop.f32.mrf.mxu3  ;;  %v974_v21 = vpop.f32.mrf.mxu0  ;;  %v2710_v24 = vunpack.c.l.b16 %v2030_v11  ;;  %v2711_v25 = vunpack.c.h.b16 %v2030_v11  ;;  %1347 = vmatpush.bf16.msra.mxu0 %v4944_v7 }
  0xe6   :  { %v1119_v26 = vadd.f32 %v1118_v20, %v6369_v48  ;;  %v975_v27 = vadd.f32 %v974_v21, %v6354_v34  ;;  %v1023_v30 = vpop.f32.mrf.mxu1  ;;  %1494 = vmatpush.bf16.msra.mxu3 %v4956_v13  ;;  %v5849_v20 = vld [vmem:[#allocation5 + $0x124] sm:$0xf] }
  0xe7   :  { %v1816_v37 = vmax.f32 %v1070_v17, 0.0  ;;  %v1024_v38 = vadd.f32 %v1023_v30, %v6357_v36  ;;  %v6419_v39 = vpack.c.b16 %v2710_v24, %v2694_v15  ;;  %v6421_v40 = vpack.c.b16 %v2711_v25, %v2695_v16  ;;  %v4945_v21 = vld [vmem:[#allocation5 + $0x160] sm:$0xf0] }
  0xe8   :  { %v1817_v41 = vmax.f32 %v1119_v26, 0.0  ;;  %v1830_v42 = vmax.f32 %v975_v27, 0.0  ;;  %1169 = vmatmul.bf16.gmra.mxu0 %v6321_v31  ;;  %1218 = vmatmul.bf16.gmra.mxu1 %v6321_v31  ;;  %v4948_v30 = vor.u32 %v5849_v20, %v4945_v21  ;;  %v4889_v20 = vld [vmem:[#allocation5 + $0xe8] sm:$0xf0] }
  0xe9   :  { %v1831_v43 = vmax.f32 %v1024_v38, 0.0  ;;  %1267 = vmatmul.bf16.gmra.mxu2 %v6321_v31 }
  0xea   :  { %v2031_v44 = vpack.c.bf16 %v1817_v41, %v1816_v37  ;;  %1316 = vmatmul.bf16.gmra.mxu3 %v6321_v31  ;;  %v4952_v31 = vor.u32 %v5858_v59, %v4951_v57  ;;  %1396 = vmatpush.bf16.msra.mxu1 %v4948_v30 }
  0xeb   :  { %v2038_v46 = vpack.c.bf16 %v1831_v43, %v1830_v42 }
  0xec   :  { %2159 = vst [vmem:[#allocation11 + $0x148] sm:$0xff] %v2031_v44  ;;  %v1072_v49 = vpop.f32.mrf.mxu2  ;;  %v2712_v51 = vunpack.c.l.b16 %v2031_v44  ;;  %v2713_v52 = vunpack.c.h.b16 %v2031_v44  ;;  %1445 = vmatpush.bf16.msra.mxu2 %v4952_v31 }
  0xed   :  { %2166 = vst [vmem:[#allocation11 + $0x180] sm:$0xff] %v2038_v46  ;;  %v1073_v53 = vadd.f32 %v1072_v49, %v6365_v47  ;;  %v1121_v5 = vpop.f32.mrf.mxu3  ;;  %v976_v56 = vpop.f32.mrf.mxu0  ;;  %v2726_v22 = vunpack.c.l.b16 %v2038_v46  ;;  %v2727_v24 = vunpack.c.h.b16 %v2038_v46 }
  0xee   :  { %v1122_v60 = vadd.f32 %v1121_v5, %v6369_v48  ;;  %v977_v61 = vadd.f32 %v976_v56, %v6354_v34  ;;  %v1025_v35 = vpop.f32.mrf.mxu1  ;;  %v6430_v2 = vpack.c.b16 %v2712_v51, %v2696_v50  ;;  %v6433_v11 = vpack.c.b16 %v2713_v52, %v2697_v18 }
  0xef   :  { %v1832_v4 = vmax.f32 %v1073_v53, 0.0  ;;  %v1026_v6 = vadd.f32 %v1025_v35, %v6357_v36 }
  0xf0   :  { %v1833_v12 = vmax.f32 %v1122_v60, 0.0  ;;  %v1846_v10 = vmax.f32 %v977_v61, 0.0 }
  0xf1   :  { %v1847_v14 = vmax.f32 %v1026_v6, 0.0 }
  0xf2   :  { %v2039_v15 = vpack.c.bf16 %v1833_v12, %v1832_v4  ;;  %v5841_v12 = vld [vmem:[#allocation5 + $0xdc] sm:$0xf0] }
  0xf3   :  { %v2046_v16 = vpack.c.bf16 %v1847_v14, %v1846_v10  ;;  %v5834_v10 = vld [vmem:[#allocation5 + $0xac] sm:$0xf] }
  0xf4   :  { %2167 = vst [vmem:[#allocation11 + $0x188] sm:$0xff] %v2039_v15  ;;  %v1074_v17 = vpop.f32.mrf.mxu2  ;;  %v2728_v59 = vunpack.c.l.b16 %v2039_v15  ;;  %v2729_v1 = vunpack.c.h.b16 %v2039_v15 }
  0xf5   :  { %2174 = vst [vmem:[#allocation11 + $0x1c0] sm:$0xff] %v2046_v16  ;;  %v1075_v25 = vadd.f32 %v1074_v17, %v6365_v47  ;;  %v1123_v26 = vpop.f32.mrf.mxu3  ;;  %v979_v27 = vpop.f32.mrf.mxu0  ;;  %v2742_v37 = vunpack.c.l.b16 %v2046_v16  ;;  %v2743_v38 = vunpack.c.h.b16 %v2046_v16  ;;  %v4880_v17 = vor.u32 %v5841_v12, %v4879_v9 }
  0xf6   :  { %v1124_v41 = vadd.f32 %v1123_v26, %v6369_v48  ;;  %v980_v42 = vadd.f32 %v979_v27, %v6354_v34  ;;  %v1028_v43 = vpop.f32.mrf.mxu1 }
  0xf7   :  { %v1848_v44 = vmax.f32 %v1075_v25, 0.0  ;;  %v1029_v49 = vadd.f32 %v1028_v43, %v6357_v36  ;;  %v6439_v50 = vpack.c.b16 %v2742_v37, %v2726_v22  ;;  %v6441_v46 = vpack.c.b16 %v2743_v38, %v2727_v24  ;;  %1348 = vmatpush.bf16.msra.mxu0 %v4880_v17  ;;  %v5833_v37 = vld [vmem:[#allocation5 + $0xa4] sm:$0xf] }
  0xf8   :  { %v1849_v51 = vmax.f32 %v1124_v41, 0.0  ;;  %v1862_v52 = vmax.f32 %v980_v42, 0.0  ;;  %1174 = vmatmul.bf16.gmra.mxu0 %v6327_v45  ;;  %1223 = vmatmul.bf16.gmra.mxu1 %v6327_v45  ;;  %v4892_v24 = vor.u32 %v5834_v10, %v4889_v20  ;;  %v4881_v38 = vld [vmem:[#allocation5 + $0xe0] sm:$0xf0] }
  0xf9   :  { %v1863_v53 = vmax.f32 %v1029_v49, 0.0  ;;  %1272 = vmatmul.bf16.gmra.mxu2 %v6327_v45 }
  0xfa   :  { %v2047_v5 = vpack.c.bf16 %v1849_v51, %v1848_v44  ;;  %1321 = vmatmul.bf16.gmra.mxu3 %v6327_v45  ;;  %v4888_v45 = vor.u32 %v5842_v0, %v4887_v63  ;;  %v4884_v51 = vor.u32 %v5833_v37, %v4881_v38 }
  0xfb   :  { %v2054_v56 = vpack.c.bf16 %v1863_v53, %v1862_v52  ;;  %1495 = vmatpush.bf16.msra.mxu3 %v4892_v24  ;;  %v4815_v24 = vld [vmem:[#allocation5 + $0x20] sm:$0xf] }
  0xfc   :  { %2175 = vst [vmem:[#allocation11 + $0x1c8] sm:$0xff] %v2047_v5  ;;  %v1077_v57 = vpop.f32.mrf.mxu2  ;;  %v2744_v18 = vunpack.c.l.b16 %v2047_v5  ;;  %v2745_v60 = vunpack.c.h.b16 %v2047_v5  ;;  %1446 = vmatpush.bf16.msra.mxu2 %v4888_v45  ;;  %1397 = vmatpush.bf16.msra.mxu1 %v4884_v51 }
  0xfd   :  { %2182 = vst [vmem:[#allocation11 + $0x200] sm:$0xff] %v2054_v56  ;;  %v1078_v61 = vadd.f32 %v1077_v57, %v6365_v47  ;;  %v1126_v35 = vpop.f32.mrf.mxu3  ;;  %v981_v31 = vpop.f32.mrf.mxu0  ;;  %v2758_v41 = vunpack.c.l.b16 %v2054_v56  ;;  %v2759_v42 = vunpack.c.h.b16 %v2054_v56 }
  0xfe   :  { %v1127_v4 = vadd.f32 %v1126_v35, %v6369_v48  ;;  %v982_v6 = vadd.f32 %v981_v31, %v6354_v34  ;;  %v1030_v7 = vpop.f32.mrf.mxu1  ;;  %v6450_v13 = vpack.c.b16 %v2744_v18, %v2728_v59  ;;  %v6453_v21 = vpack.c.b16 %v2745_v60, %v2729_v1 }
  0xff   :  { %v1864_v14 = vmax.f32 %v1078_v61, 0.0  ;;  %v1031_v16 = vadd.f32 %v1030_v7, %v6357_v36 }
 0x100   :  { %v1865_v22 = vmax.f32 %v1127_v4, 0.0  ;;  %v1878_v15 = vmax.f32 %v982_v6, 0.0 }
 0x101   :  { %v1879_v25 = vmax.f32 %v1031_v16, 0.0  ;;  %v5826_v16 = vld [vmem:[#allocation5 + $0x64] sm:$0xf0] }
 0x102   :  { %v2055_v26 = vpack.c.bf16 %v1865_v22, %v1864_v14  ;;  %v4823_v14 = vld [vmem:[#allocation5 + $0x28] sm:$0xf] }
 0x103   :  { %v2062_v27 = vpack.c.bf16 %v1879_v25, %v1878_v15  ;;  %v5825_v25 = vld [vmem:[#allocation5 + $0x5c] sm:$0xf0] }
 0x104   :  { %2183 = vst [vmem:[#allocation11 + $0x208] sm:$0xff] %v2055_v26  ;;  %v1079_v30 = vpop.f32.mrf.mxu2  ;;  %v2760_v6 = vunpack.c.l.b16 %v2055_v26  ;;  %v2761_v17 = vunpack.c.h.b16 %v2055_v26 }
 0x105   :  { %2190 = vst [vmem:[#allocation11 + $0x240] sm:$0xff] %v2062_v27  ;;  %v1080_v43 = vadd.f32 %v1079_v30, %v6365_v47  ;;  %v1128_v44 = vpop.f32.mrf.mxu3  ;;  %v984_v49 = vpop.f32.mrf.mxu0  ;;  %v2774_v52 = vunpack.c.l.b16 %v2062_v27  ;;  %v2775_v53 = vunpack.c.h.b16 %v2062_v27  ;;  %v5818_v27 = vld [vmem:[#allocation5 + $0x2c] sm:$0xf] }
 0x106   :  { %v1129_v5 = vadd.f32 %v1128_v44, %v6369_v48  ;;  %v985_v57 = vadd.f32 %v984_v49, %v6354_v34  ;;  %v1033_v59 = vpop.f32.mrf.mxu1 }
 0x107   :  { %v1880_v18 = vmax.f32 %v1080_v43, 0.0  ;;  %v1034_v60 = vadd.f32 %v1033_v59, %v6357_v36  ;;  %v6459_v61 = vpack.c.b16 %v2774_v52, %v2758_v41  ;;  %v6461_v56 = vpack.c.b16 %v2775_v53, %v2759_v42  ;;  %v4825_v42 = vld [vmem:[#allocation5 + $0x68] sm:$0xf0]  ;;  %v4817_v59 = vld [vmem:[#allocation5 + $0x60] sm:$0xf0] }
 0x108   :  { %v1881_v35 = vmax.f32 %v1129_v5, 0.0  ;;  %v1894_v31 = vmax.f32 %v985_v57, 0.0  ;;  %1179 = vmatmul.bf16.gmra.mxu0 %v6333_v58  ;;  %1228 = vmatmul.bf16.gmra.mxu1 %v6333_v58  ;;  %v4816_v41 = vor.u32 %v5825_v25, %v4815_v24  ;;  %v4828_v49 = vor.u32 %v5818_v27, %v4825_v42  ;;  %v5817_v57 = vld [vmem:[#allocation5 + $0x24] sm:$0xf]  ;;  %v5287_v42 = vld [vmem:[#allocation5 + $0x3b8] sm:$0xf] }
 0x109   :  { %v1895_v63 = vmax.f32 %v1034_v60, 0.0  ;;  %1277 = vmatmul.bf16.gmra.mxu2 %v6333_v58 }
 0x10a   :  { %v2063_v0 = vpack.c.bf16 %v1881_v35, %v1880_v18  ;;  %1326 = vmatmul.bf16.gmra.mxu3 %v6333_v58  ;;  %v4824_v58 = vor.u32 %v5826_v16, %v4823_v14  ;;  %1349 = vmatpush.bf16.msra.mxu0 %v4816_v41 }
 0x10b   :  { %v2070_v1 = vpack.c.bf16 %v1895_v63, %v1894_v31  ;;  %1496 = vmatpush.bf16.msra.mxu3 %v4828_v49 }
 0x10c   :  { %2191 = vst [vmem:[#allocation11 + $0x248] sm:$0xff] %v2063_v0  ;;  %v1082_v4 = vpop.f32.mrf.mxu2  ;;  %v2776_v7 = vunpack.c.l.b16 %v2063_v0  ;;  %v2777_v45 = vunpack.c.h.b16 %v2063_v0  ;;  %1447 = vmatpush.bf16.msra.mxu2 %v4824_v58  ;;  %v4820_v0 = vor.u32 %v5817_v57, %v4817_v59  ;;  %v5939_v57 = vld [vmem:[#allocation5 + $0x3ec] sm:$0xf0]  ;;  %v5932_v59 = vld [vmem:[#allocation5 + $0x3bc] sm:$0xf] }
 0x10d   :  { %2198 = vst [vmem:[#allocation11 + $0x280] sm:$0xff] %v2070_v1  ;;  %v1083_v9 = vadd.f32 %v1082_v4, %v6365_v47  ;;  %v1131_v12 = vpop.f32.mrf.mxu3  ;;  %v986_v10 = vpop.f32.mrf.mxu0  ;;  %v2790_v18 = vunpack.c.l.b16 %v2070_v1  ;;  %v2791_v60 = vunpack.c.h.b16 %v2070_v1 }
 0x10e   :  { %v1132_v20 = vadd.f32 %v1131_v12, %v6369_v48  ;;  %v987_v22 = vadd.f32 %v986_v10, %v6354_v34  ;;  %v1035_v15 = vpop.f32.mrf.mxu1  ;;  %v6470_v30 = vpack.c.b16 %v2776_v7, %v2760_v6  ;;  %v6473_v43 = vpack.c.b16 %v2777_v45, %v2761_v17  ;;  %1398 = vmatpush.bf16.msra.mxu1 %v4820_v0 }
 0x10f   :  { %v1896_v37 = vmax.f32 %v1083_v9, 0.0  ;;  %v1036_v38 = vadd.f32 %v1035_v15, %v6357_v36 }
 0x110   :  { %v1897_v44 = vmax.f32 %v1132_v20, 0.0  ;;  %v1910_v26 = vmax.f32 %v987_v22, 0.0 }
 0x111   :  { %v1911_v51 = vmax.f32 %v1036_v38, 0.0 }
 0x112   :  { %v2071_v52 = vpack.c.bf16 %v1897_v44, %v1896_v37  ;;  %v5940_v44 = vld [vmem:[#allocation5 + $0x3f4] sm:$0xf0] }
 0x113   :  { %v2078_v53 = vpack.c.bf16 %v1911_v51, %v1910_v26 }
 0x114   :  { %2199 = vst [vmem:[#allocation11 + $0x288] sm:$0xff] %v2071_v52  ;;  %v1084_v5 = vpop.f32.mrf.mxu2  ;;  %v2792_v24 = vunpack.c.l.b16 %v2071_v52  ;;  %v2793_v26 = vunpack.c.h.b16 %v2071_v52 }
 0x115   :  { %2206 = vst [vmem:[#allocation11 + $0x2c0] sm:$0xff] %v2078_v53  ;;  %v1085_v35 = vadd.f32 %v1084_v5, %v6365_v47  ;;  %v1133_v31 = vpop.f32.mrf.mxu3  ;;  %v989_v63 = vpop.f32.mrf.mxu0  ;;  %v2806_v4 = vunpack.c.l.b16 %v2078_v53  ;;  %v2807_v6 = vunpack.c.h.b16 %v2078_v53  ;;  %v5279_v5 = vld [vmem:[#allocation5 + $0x3b0] sm:$0xf] }
 0x116   :  { %v1134_v7 = vadd.f32 %v1133_v31, %v6369_v48  ;;  %v990_v45 = vadd.f32 %v989_v63, %v6354_v34  ;;  %v1038_v9 = vpop.f32.mrf.mxu1  ;;  %v5280_v31 = vor.u32 %v5939_v57, %v5279_v5  ;;  %v5289_v63 = vld [vmem:[#allocation5 + $0x3f8] sm:$0xf0] }
 0x117   :  { %v1912_v12 = vmax.f32 %v1085_v35, 0.0  ;;  %v1039_v10 = vadd.f32 %v1038_v9, %v6357_v36  ;;  %v6479_v14 = vpack.c.b16 %v2806_v4, %v2790_v18  ;;  %v6481_v1 = vpack.c.b16 %v2807_v6, %v2791_v60 }
 0x118   :  { %v1913_v16 = vmax.f32 %v1134_v7, 0.0  ;;  %v1926_v17 = vmax.f32 %v990_v45, 0.0  ;;  %1184 = vmatmul.bf16.gmra.mxu0 %v6339_v8  ;;  %1233 = vmatmul.bf16.gmra.mxu1 %v6339_v8  ;;  %v5292_v6 = vor.u32 %v5932_v59, %v5289_v63 }
 0x119   :  { %v1927_v20 = vmax.f32 %v1039_v10, 0.0  ;;  %1282 = vmatmul.bf16.gmra.mxu2 %v6339_v8  ;;  %1538 = vmatpush.bf16.msrb.mxu0 %v5280_v31  ;;  %v5931_v10 = vld [vmem:[#allocation5 + $0x3b4] sm:$0xf] }
 0x11a   :  { %v2079_v22 = vpack.c.bf16 %v1913_v16, %v1912_v12  ;;  %1331 = vmatmul.bf16.gmra.mxu3 %v6339_v8  ;;  %v5288_v8 = vor.u32 %v5940_v44, %v5287_v42  ;;  %v5281_v16 = vld [vmem:[#allocation5 + $0x3f0] sm:$0xf0] }
 0x11b   :  { %v2086_v15 = vpack.c.bf16 %v1927_v20, %v1926_v17  ;;  %1685 = vmatpush.bf16.msrb.mxu3 %v5292_v6 }
 0x11c   :  { %2207 = vst [vmem:[#allocation11 + $0x2c8] sm:$0xff] %v2079_v22  ;;  %v1087_v58 = vpop.f32.mrf.mxu2  ;;  %v2808_v25 = vunpack.c.l.b16 %v2079_v22  ;;  %v2809_v27 = vunpack.c.h.b16 %v2079_v22  ;;  %1636 = vmatpush.bf16.msrb.mxu2 %v5288_v8 }
 0x11d   :  { %2214 = vst [vmem:[#allocation11 + $0x300] sm:$0xff] %v2086_v15  ;;  %v1088_v37 = vadd.f32 %v1087_v58, %v6365_v47  ;;  %v1136_v38 = vpop.f32.mrf.mxu3  ;;  %v991_v41 = vpop.f32.mrf.mxu0  ;;  %v2822_v17 = vunpack.c.l.b16 %v2086_v15  ;;  %v2823_v20 = vunpack.c.h.b16 %v2086_v15 }
 0x11e   :  { %v1137_v49 = vadd.f32 %v1136_v38, %v6369_v48  ;;  %v992_v51 = vadd.f32 %v991_v41, %v6354_v34  ;;  %v1040_v53 = vpop.f32.mrf.mxu1  ;;  %v6490_v18 = vpack.c.b16 %v2808_v25, %v2792_v24  ;;  %v6493_v0 = vpack.c.b16 %v2809_v27, %v2793_v26 }
 0x11f   :  { %v1928_v60 = vmax.f32 %v1088_v37, 0.0  ;;  %v1041_v35 = vadd.f32 %v1040_v53, %v6357_v36  ;;  %v5284_v25 = vor.u32 %v5931_v10, %v5281_v16  ;;  %v5223_v10 = vld [vmem:[#allocation5 + $0x338] sm:$0xf] }
 0x120   :  { %v1929_v4 = vmax.f32 %v1137_v49, 0.0  ;;  %v1942_v52 = vmax.f32 %v992_v51, 0.0  ;;  %v5924_v16 = vld [vmem:[#allocation5 + $0x374] sm:$0xf0] }
 0x121   :  { %v1943_v7 = vmax.f32 %v1041_v35, 0.0  ;;  %1587 = vmatpush.bf16.msrb.mxu1 %v5284_v25  ;;  %v5916_v25 = vld [vmem:[#allocation5 + $0x33c] sm:$0xf] }
 0x122   :  { %v2087_v45 = vpack.c.bf16 %v1929_v4, %v1928_v60 }
 0x123   :  { %v2094_v9 = vpack.c.bf16 %v1943_v7, %v1942_v52 }
 0x124   :  { %2215 = vst [vmem:[#allocation11 + $0x308] sm:$0xff] %v2087_v45  ;;  %v1089_v12 = vpop.f32.mrf.mxu2  ;;  %v2824_v60 = vunpack.c.l.b16 %v2087_v45  ;;  %v2825_v31 = vunpack.c.h.b16 %v2087_v45 }
 0x125   :  { %2222 = vst [vmem:[#allocation11 + $0x340] sm:$0xff] %v2094_v9  ;;  %v1090_v22 = vadd.f32 %v1089_v12, %v6365_v47  ;;  %v1138_v58 = vpop.f32.mrf.mxu3  ;;  %v994_v24 = vpop.f32.mrf.mxu0  ;;  %v2838_v27 = vunpack.c.l.b16 %v2094_v9  ;;  %v2839_v37 = vunpack.c.h.b16 %v2094_v9 }
 0x126   :  { %v1139_v38 = vadd.f32 %v1138_v58, %v6369_v48  ;;  %v995_v41 = vadd.f32 %v994_v24, %v6354_v34  ;;  %v1043_v42 = vpop.f32.mrf.mxu1  ;;  %v5224_v58 = vor.u32 %v5924_v16, %v5223_v10  ;;  %v5923_v24 = vld [vmem:[#allocation5 + $0x36c] sm:$0xf0] }
 0x127   :  { %v1944_v44 = vmax.f32 %v1090_v22, 0.0  ;;  %v1044_v26 = vadd.f32 %v1043_v42, %v6357_v36  ;;  %v6499_v49 = vpack.c.b16 %v2838_v27, %v2822_v17  ;;  %v6501_v15 = vpack.c.b16 %v2839_v37, %v2823_v20 }
 0x128   :  { %v1945_v51 = vmax.f32 %v1139_v38, 0.0  ;;  %v1958_v53 = vmax.f32 %v995_v41, 0.0  ;;  %1189 = vmatmul.bf16.gmra.mxu0 %v6345_v19  ;;  %1238 = vmatmul.bf16.gmra.mxu1 %v6345_v19  ;;  %v5225_v41 = vld [vmem:[#allocation5 + $0x378] sm:$0xf0] }
 0x129   :  { %v1959_v8 = vmax.f32 %v1044_v26, 0.0  ;;  %1287 = vmatmul.bf16.gmra.mxu2 %v6345_v19  ;;  %v6518_v26 = vperm.slane %v6351_v23, 4 }
 0x12a   :  { %v2095_v5 = vpack.c.bf16 %v1945_v51, %v1944_v44  ;;  %1336 = vmatmul.bf16.gmra.mxu3 %v6345_v19  ;;  %v5215_v19 = vld [vmem:[#allocation5 + $0x330] sm:$0xf]  ;;  %1637 = vmatpush.bf16.msrb.mxu2 %v5224_v58 }
 0x12b   :  { %v2102_v57 = vpack.c.bf16 %v1959_v8, %v1958_v53  ;;  %v5216_v38 = vor.u32 %v5923_v24, %v5215_v19  ;;  %v6521_v53 = vperm.slane %v6351_v23, 5  ;;  %v5915_v8 = vld [vmem:[#allocation5 + $0x334] sm:$0xf] }
 0x12c   :  { %2223 = vst [vmem:[#allocation11 + $0x348] sm:$0xff] %v2095_v5  ;;  %v1092_v59 = vpop.f32.mrf.mxu2  ;;  %v2840_v35 = vunpack.c.l.b16 %v2095_v5  ;;  %v2841_v63 = vunpack.c.h.b16 %v2095_v5  ;;  %v5217_v5 = vld [vmem:[#allocation5 + $0x370] sm:$0xf0] }
 0x12d   :  { %2230 = vst [vmem:[#allocation11 + $0x380] sm:$0xff] %v2102_v57  ;;  %v1093_v4 = vadd.f32 %v1092_v59, %v6365_v47  ;;  %v1141_v52 = vpop.f32.mrf.mxu3  ;;  %v996_v6 = vpop.f32.mrf.mxu0  ;;  %1539 = vmatpush.bf16.msrb.mxu0 %v5216_v38  ;;  %v2854_v59 = vunpack.c.l.b16 %v2102_v57 }
 0x12e   :  { %v1142_v7 = vadd.f32 %v1141_v52, %v6369_v48  ;;  %v997_v9 = vadd.f32 %v996_v6, %v6354_v34  ;;  %v1045_v12 = vpop.f32.mrf.mxu1  ;;  %v6510_v17 = vpack.c.b16 %v2840_v35, %v2824_v60  ;;  %v6512_v20 = vpack.c.b16 %v2841_v63, %v2825_v31 }
 0x12f   :  { %v1960_v22 = vmax.f32 %v1093_v4, 0.0  ;;  %v1046_v45 = vadd.f32 %v1045_v12, %v6357_v36  ;;  %v5228_v34 = vor.u32 %v5916_v25, %v5225_v41  ;;  %v2855_v60 = vunpack.c.h.b16 %v2102_v57 }
 0x130   :  { %7317 = vst [vmem:[#allocation18_spill] sm:$0xff] %v6512_v20  ;;  %v1961_v27 = vmax.f32 %v1142_v7, 0.0  ;;  %v1974_v37 = vmax.f32 %v997_v9, 0.0  ;;  %v5220_v4 = vor.u32 %v5915_v8, %v5217_v5  ;;  %v5159_v8 = vld [vmem:[#allocation5 + $0x2b8] sm:$0xf] }
 0x131   :  { %v1975_v42 = vmax.f32 %v1046_v45, 0.0  ;;  %1686 = vmatpush.bf16.msrb.mxu3 %v5228_v34  ;;  %v5908_v5 = vld [vmem:[#allocation5 + $0x2f4] sm:$0xf0] }
 0x132   :  { %v6515_v44 = vpack.c.bf16 %v1961_v27, %v1960_v22  ;;  %1588 = vmatpush.bf16.msrb.mxu1 %v5220_v4  ;;  %v6532_v22 = vld [vmem:[#allocation2] sm:$0xff]  ;;  %v5151_v4 = vld [vmem:[#allocation5 + $0x2b0] sm:$0xf] }
 0x133   :  { %v2110_v51 = vpack.c.bf16 %v1975_v42, %v1974_v37 }
 0x134   :  { %2231 = vst [vmem:[#allocation11 + $0x388] sm:$0xff] %v6515_v44  ;;  %v1094_v36 = vpop.f32.mrf.mxu2  ;;  %v2856_v38 = vunpack.c.l.b16 %v6515_v44 }
 0x135   :  { %2238 = vst [vmem:[#allocation11 + $0x3c0] sm:$0xff] %v2110_v51  ;;  %v1095_v35 = vadd.f32 %v1094_v36, %v6365_v47  ;;  %v1143_v31 = vpop.f32.mrf.mxu3  ;;  %v1155_v63 = vpop.f32.mrf.mxu0  ;;  %v2870_v52 = vunpack.c.l.b16 %v2110_v51  ;;  %v2871_v6 = vunpack.c.h.b16 %v2110_v51 }
 0x136   :  { %v1144_v7 = vadd.f32 %v1143_v31, %v6369_v48  ;;  %v1156_v23 = vadd.f32 %v1155_v63, %v6518_v26  ;;  %v1204_v9 = vpop.f32.mrf.mxu1  ;;  %v6081_v48 = vld [vmem:[#allocation7] sm:$0xff]  ;;  %v5160_v63 = vor.u32 %v5908_v5, %v5159_v8 }
 0x137   :  { %v1976_v12 = vmax.f32 %v1095_v35, 0.0  ;;  %v1205_v10 = vadd.f32 %v1204_v9, %v6521_v53  ;;  %v6528_v16 = vpack.c.b16 %v2870_v52, %v2854_v59  ;;  %v6530_v57 = vpack.c.b16 %v2871_v6, %v2855_v60  ;;  %v5907_v52 = vld [vmem:[#allocation5 + $0x2ec] sm:$0xf0]  ;;  %v5900_v6 = vld [vmem:[#allocation5 + $0x2bc] sm:$0xf] }
 0x138   :  { %v1977_v19 = vmax.f32 %v1144_v7, 0.0  ;;  %v1738_v47 = vmax.f32 %v1156_v23, 0.0  ;;  %1350 = vmatmul.bf16.vlgmr.msra.gmra.mxu0 %v6532_v22  ;;  %1399 = vmatmul.bf16.vlgmr.msra.gmra.mxu1 %v6532_v22  ;;  %v6537_v58 = vperm.slane %v6081_v48, 6  ;;  %v6540_v25 = vperm.slane %v6081_v48, 7 }
 0x139   :  { %7318 = vst [vmem:[#allocation19_spill] sm:$0xff] %v6528_v16  ;;  %v1739_v45 = vmax.f32 %v1205_v10, 0.0  ;;  %1448 = vmatmul.bf16.vlgmr.msra.gmra.mxu2 %v6532_v22  ;;  %v2857_v59 = vunpack.c.h.b16 %v6515_v44  ;;  %v5161_v10 = vld [vmem:[#allocation5 + $0x2f8] sm:$0xf0] }
 0x13a   :  { %7319 = vst [vmem:[#allocation20_spill] sm:$0xff] %v6530_v57  ;;  %v2111_v24 = vpack.c.bf16 %v1977_v19, %v1976_v12  ;;  %1497 = vmatmul.bf16.vlgmr.msra.gmra.mxu3 %v6532_v22  ;;  %v5152_v12 = vor.u32 %v5907_v52, %v5151_v4  ;;  %1638 = vmatpush.bf16.msrb.mxu2 %v5160_v63 }
 0x13b   :  { %v1992_v27 = vpack.c.bf16 %v1739_v45, %v1738_v47  ;;  %v5164_v45 = vor.u32 %v5900_v6, %v5161_v10  ;;  %v6560_v10 = vld [vmem:[#allocation2 + $0x8] sm:$0xff] }
 0x13c   :  { %2239 = vst [vmem:[#allocation11 + $0x3c8] sm:$0xff] %v2111_v24  ;;  %v1253_v37 = vpop.f32.mrf.mxu2  ;;  %v2872_v41 = vunpack.c.l.b16 %v2111_v24  ;;  %v2873_v42 = vunpack.c.h.b16 %v2111_v24  ;;  %1540 = vmatpush.bf16.msrb.mxu0 %v5152_v12 }
 0x13d   :  { %2120 = vst [vmem:[#allocation11 + $0x10] sm:$0xff] %v1992_v27  ;;  %v1254_v34 = vadd.f32 %v1253_v37, %v6537_v58  ;;  %v1302_v51 = vpop.f32.mrf.mxu3  ;;  %v1157_v36 = vpop.f32.mrf.mxu0  ;;  %1687 = vmatpush.bf16.msrb.mxu3 %v5164_v45 }
 0x13e   :  { %v1303_v60 = vadd.f32 %v1302_v51, %v6540_v25  ;;  %v1158_v35 = vadd.f32 %v1157_v36, %v6518_v26  ;;  %v1206_v31 = vpop.f32.mrf.mxu1  ;;  %v6547_v7 = vpack.c.b16 %v2872_v41, %v2856_v38  ;;  %v6550_v19 = vpack.c.b16 %v2873_v42, %v2857_v59  ;;  %v5899_v41 = vld [vmem:[#allocation5 + $0x2b4] sm:$0xf] }
 0x13f   :  { %v1740_v23 = vmax.f32 %v1254_v34, 0.0  ;;  %v1207_v9 = vadd.f32 %v1206_v31, %v6521_v53  ;;  %v2634_v51 = vunpack.c.l.b16 %v1992_v27  ;;  %v2635_v36 = vunpack.c.h.b16 %v1992_v27  ;;  %v5153_v34 = vld [vmem:[#allocation5 + $0x2f0] sm:$0xf0] }
 0x140   :  { %7320 = vst [vmem:[#allocation21_spill] sm:$0xff] %v6547_v7  ;;  %v1741_v47 = vmax.f32 %v1303_v60, 0.0  ;;  %v1754_v44 = vmax.f32 %v1158_v35, 0.0  ;;  %v5156_v35 = vor.u32 %v5899_v41, %v5153_v34 }
 0x141   :  { %7321 = vst [vmem:[#allocation22_spill] sm:$0xff] %v6550_v19  ;;  %v1755_v48 = vmax.f32 %v1207_v9, 0.0 }
 0x142   :  { %v1993_v24 = vpack.c.bf16 %v1741_v47, %v1740_v23  ;;  %1589 = vmatpush.bf16.msrb.mxu1 %v5156_v35 }
 0x143   :  { %v2000_v37 = vpack.c.bf16 %v1755_v48, %v1754_v44 }
 0x144   :  { %2121 = vst [vmem:[#allocation11 + $0x18] sm:$0xff] %v1993_v24  ;;  %v1255_v38 = vpop.f32.mrf.mxu2  ;;  %v2636_v48 = vunpack.c.l.b16 %v1993_v24 }
 0x145   :  { %2128 = vst [vmem:[#allocation11 + $0x50] sm:$0xff] %v2000_v37  ;;  %v2650_v8 = vunpack.c.l.b16 %v2000_v37  ;;  %v2651_v5 = vunpack.c.h.b16 %v2000_v37  ;;  %v1256_v42 = vadd.f32 %v1255_v38, %v6537_v58  ;;  %v1304_v59 = vpop.f32.mrf.mxu3  ;;  %v1160_v60 = vpop.f32.mrf.mxu0  ;;  %v2637_v37 = vunpack.c.h.b16 %v1993_v24 }
 0x146   :  { %v1305_v31 = vadd.f32 %v1304_v59, %v6540_v25  ;;  %v1161_v63 = vadd.f32 %v1160_v60, %v6518_v26  ;;  %v1209_v4 = vpop.f32.mrf.mxu1 }
 0x147   :  { %v6555_v52 = vpack.c.b16 %v2650_v8, %v2634_v51  ;;  %v6557_v27 = vpack.c.b16 %v2651_v5, %v2635_v36  ;;  %v1756_v6 = vmax.f32 %v1256_v42, 0.0  ;;  %v1210_v23 = vadd.f32 %v1209_v4, %v6521_v53  ;;  %v5095_v5 = vld [vmem:[#allocation5 + $0x238] sm:$0xf]  ;;  %v5891_v4 = vld [vmem:[#allocation5 + $0x26c] sm:$0xf0] }
 0x148   :  { %v1757_v9 = vmax.f32 %v1305_v31, 0.0  ;;  %v1770_v12 = vmax.f32 %v1161_v63, 0.0  ;;  %1355 = vmatmul.bf16.gmra.mxu0 %v6560_v10  ;;  %1404 = vmatmul.bf16.gmra.mxu1 %v6560_v10  ;;  %v5892_v42 = vld [vmem:[#allocation5 + $0x274] sm:$0xf0]  ;;  %v5087_v63 = vld [vmem:[#allocation5 + $0x230] sm:$0xf] }
 0x149   :  { %7322 = vst [vmem:[#allocation23_spill] sm:$0xff] %v6555_v52  ;;  %v1771_v47 = vmax.f32 %v1210_v23, 0.0  ;;  %1453 = vmatmul.bf16.gmra.mxu2 %v6560_v10 }
 0x14a   :  { %7323 = vst [vmem:[#allocation24_spill] sm:$0xff] %v6557_v27  ;;  %v2001_v44 = vpack.c.bf16 %v1757_v9, %v1756_v6  ;;  %1502 = vmatmul.bf16.gmra.mxu3 %v6560_v10  ;;  %v5884_v6 = vld [vmem:[#allocation5 + $0x23c] sm:$0xf] }
 0x14b   :  { %v2008_v45 = vpack.c.bf16 %v1771_v47, %v1770_v12  ;;  %v5096_v12 = vor.u32 %v5892_v42, %v5095_v5  ;;  %v5088_v47 = vor.u32 %v5891_v4, %v5087_v63 }
 0x14c   :  { %2129 = vst [vmem:[#allocation11 + $0x58] sm:$0xff] %v2001_v44  ;;  %v2652_v51 = vunpack.c.l.b16 %v2001_v44  ;;  %v2653_v36 = vunpack.c.h.b16 %v2001_v44  ;;  %v1258_v38 = vpop.f32.mrf.mxu2  ;;  %v5097_v44 = vld [vmem:[#allocation5 + $0x278] sm:$0xf0] }
 0x14d   :  { %2136 = vst [vmem:[#allocation11 + $0x90] sm:$0xff] %v2008_v45  ;;  %v1259_v41 = vadd.f32 %v1258_v38, %v6537_v58  ;;  %v1307_v34 = vpop.f32.mrf.mxu3  ;;  %v1162_v8 = vpop.f32.mrf.mxu0  ;;  %1639 = vmatpush.bf16.msrb.mxu2 %v5096_v12  ;;  %1541 = vmatpush.bf16.msrb.mxu0 %v5088_v47 }
 0x14e   :  { %v6567_v59 = vpack.c.b16 %v2652_v51, %v2636_v48  ;;  %v6569_v60 = vpack.c.b16 %v2653_v36, %v2637_v37  ;;  %v1308_v35 = vadd.f32 %v1307_v34, %v6540_v25  ;;  %v1163_v31 = vadd.f32 %v1162_v8, %v6518_v26  ;;  %v1211_v24 = vpop.f32.mrf.mxu1  ;;  %v5883_v8 = vld [vmem:[#allocation5 + $0x234] sm:$0xf] }
 0x14f   :  { %v1772_v23 = vmax.f32 %v1259_v41, 0.0  ;;  %v1212_v9 = vadd.f32 %v1211_v24, %v6521_v53  ;;  %v5100_v48 = vor.u32 %v5884_v6, %v5097_v44  ;;  %v2667_v41 = vunpack.c.h.b16 %v2008_v45 }
 0x150   :  { %7324 = vst [vmem:[#allocation25_spill] sm:$0xff] %v6567_v59  ;;  %v1773_v38 = vmax.f32 %v1308_v35, 0.0  ;;  %v1786_v27 = vmax.f32 %v1163_v31, 0.0  ;;  %v2666_v59 = vunpack.c.l.b16 %v2008_v45 }
 0x151   :  { %7325 = vst [vmem:[#allocation26_spill] sm:$0xff] %v6569_v60  ;;  %v1787_v51 = vmax.f32 %v1212_v9, 0.0  ;;  %1688 = vmatpush.bf16.msrb.mxu3 %v5100_v48  ;;  %v5089_v60 = vld [vmem:[#allocation5 + $0x270] sm:$0xf0] }
 0x152   :  { %v2009_v37 = vpack.c.bf16 %v1773_v38, %v1772_v23  ;;  %v5092_v35 = vor.u32 %v5883_v8, %v5089_v60  ;;  %v6582_v38 = vld [vmem:[#allocation2 + $0x10] sm:$0xff] }
 0x153   :  { %v2016_v36 = vpack.c.bf16 %v1787_v51, %v1786_v27 }
 0x154   :  { %2137 = vst [vmem:[#allocation11 + $0x98] sm:$0xff] %v2009_v37  ;;  %v1260_v34 = vpop.f32.mrf.mxu2  ;;  %1590 = vmatpush.bf16.msrb.mxu1 %v5092_v35  ;;  %v5876_v35 = vld [vmem:[#allocation5 + $0x1f4] sm:$0xf0] }
 0x155   :  { %2144 = vst [vmem:[#allocation11 + $0xd0] sm:$0xff] %v2016_v36  ;;  %v1261_v5 = vadd.f32 %v1260_v34, %v6537_v58  ;;  %v1309_v42 = vpop.f32.mrf.mxu3  ;;  %v1165_v24 = vpop.f32.mrf.mxu0  ;;  %v2682_v31 = vunpack.c.l.b16 %v2016_v36  ;;  %v2683_v63 = vunpack.c.h.b16 %v2016_v36  ;;  %v2668_v36 = vunpack.c.l.b16 %v2009_v37 }
 0x156   :  { %v1310_v4 = vadd.f32 %v1309_v42, %v6540_v25  ;;  %v1166_v6 = vadd.f32 %v1165_v24, %v6518_v26  ;;  %v1214_v23 = vpop.f32.mrf.mxu1  ;;  %v5031_v24 = vld [vmem:[#allocation5 + $0x1b8] sm:$0xf] }
 0x157   :  { %v1788_v27 = vmax.f32 %v1261_v5, 0.0  ;;  %v1215_v9 = vadd.f32 %v1214_v23, %v6521_v53  ;;  %v6578_v12 = vpack.c.b16 %v2682_v31, %v2666_v59  ;;  %v6580_v45 = vpack.c.b16 %v2683_v63, %v2667_v41 }
 0x158   :  { %v1789_v47 = vmax.f32 %v1310_v4, 0.0  ;;  %v1802_v44 = vmax.f32 %v1166_v6, 0.0  ;;  %1360 = vmatmul.bf16.gmra.mxu0 %v6582_v38  ;;  %1409 = vmatmul.bf16.gmra.mxu1 %v6582_v38  ;;  %v2669_v31 = vunpack.c.h.b16 %v2009_v37  ;;  %v5032_v23 = vor.u32 %v5876_v35, %v5031_v24 }
 0x159   :  { %7326 = vst [vmem:[#allocation27_spill] sm:$0xff] %v6578_v12  ;;  %v1803_v60 = vmax.f32 %v1215_v9, 0.0  ;;  %1458 = vmatmul.bf16.gmra.mxu2 %v6582_v38  ;;  %v5875_v9 = vld [vmem:[#allocation5 + $0x1ec] sm:$0xf0] }
 0x15a   :  { %7327 = vst [vmem:[#allocation28_spill] sm:$0xff] %v6580_v45  ;;  %v2017_v48 = vpack.c.bf16 %v1789_v47, %v1788_v27  ;;  %1507 = vmatmul.bf16.gmra.mxu3 %v6582_v38  ;;  %v5023_v27 = vld [vmem:[#allocation5 + $0x1b0] sm:$0xf]  ;;  %v5868_v47 = vld [vmem:[#allocation5 + $0x1bc] sm:$0xf]  ;;  %1640 = vmatpush.bf16.msrb.mxu2 %v5032_v23 }
 0x15b   :  { %v2024_v51 = vpack.c.bf16 %v1803_v60, %v1802_v44  ;;  %v5033_v45 = vld [vmem:[#allocation5 + $0x1f8] sm:$0xf0] }
 0x15c   :  { %2145 = vst [vmem:[#allocation11 + $0xd8] sm:$0xff] %v2017_v48  ;;  %v1263_v59 = vpop.f32.mrf.mxu2  ;;  %v2684_v34 = vunpack.c.l.b16 %v2017_v48  ;;  %v2685_v8 = vunpack.c.h.b16 %v2017_v48 }
 0x15d   :  { %2152 = vst [vmem:[#allocation11 + $0x110] sm:$0xff] %v2024_v51  ;;  %v1264_v41 = vadd.f32 %v1263_v59, %v6537_v58  ;;  %v1312_v5 = vpop.f32.mrf.mxu3  ;;  %v1167_v42 = vpop.f32.mrf.mxu0  ;;  %v5024_v59 = vor.u32 %v5875_v9, %v5023_v27 }
 0x15e   :  { %v1313_v63 = vadd.f32 %v1312_v5, %v6540_v25  ;;  %v1168_v4 = vadd.f32 %v1167_v42, %v6518_v26  ;;  %v1216_v6 = vpop.f32.mrf.mxu1  ;;  %v6591_v44 = vpack.c.b16 %v2684_v34, %v2668_v36  ;;  %v6594_v12 = vpack.c.b16 %v2685_v8, %v2669_v31  ;;  %v5867_v36 = vld [vmem:[#allocation5 + $0x1b4] sm:$0xf] }
 0x15f   :  { %v1804_v60 = vmax.f32 %v1264_v41, 0.0  ;;  %v1217_v48 = vadd.f32 %v1216_v6, %v6521_v53  ;;  %v5036_v5 = vor.u32 %v5868_v47, %v5033_v45  ;;  %1542 = vmatpush.bf16.msrb.mxu0 %v5024_v59  ;;  %v5025_v34 = vld [vmem:[#allocation5 + $0x1f0] sm:$0xf0]  ;;  %v2698_v41 = vunpack.c.l.b16 %v2024_v51  ;;  %v6604_v59 = vld [vmem:[#allocation2 + $0x18] sm:$0xff] }
 0x160   :  { %7328 = vst [vmem:[#allocation29_spill] sm:$0xff] %v6591_v44  ;;  %v1805_v52 = vmax.f32 %v1313_v63, 0.0  ;;  %v1818_v37 = vmax.f32 %v1168_v4, 0.0  ;;  %v2699_v44 = vunpack.c.h.b16 %v2024_v51  ;;  %v5028_v63 = vor.u32 %v5867_v36, %v5025_v34 }
 0x161   :  { %7329 = vst [vmem:[#allocation30_spill] sm:$0xff] %v6594_v12  ;;  %v1819_v19 = vmax.f32 %v1217_v48, 0.0  ;;  %1689 = vmatpush.bf16.msrb.mxu3 %v5036_v5 }
 0x162   :  { %v2025_v42 = vpack.c.bf16 %v1805_v52, %v1804_v60  ;;  %1591 = vmatpush.bf16.msrb.mxu1 %v5028_v63  ;;  %v5860_v63 = vld [vmem:[#allocation5 + $0x174] sm:$0xf0] }
 0x163   :  { %v2032_v24 = vpack.c.bf16 %v1819_v19, %v1818_v37 }
 0x164   :  { %2153 = vst [vmem:[#allocation11 + $0x118] sm:$0xff] %v2025_v42  ;;  %v1265_v35 = vpop.f32.mrf.mxu2  ;;  %v2700_v36 = vunpack.c.l.b16 %v2025_v42 }
 0x165   :  { %2160 = vst [vmem:[#allocation11 + $0x150] sm:$0xff] %v2032_v24  ;;  %v1266_v6 = vadd.f32 %v1265_v35, %v6537_v58  ;;  %v1314_v8 = vpop.f32.mrf.mxu3  ;;  %v1170_v31 = vpop.f32.mrf.mxu0  ;;  %v2714_v4 = vunpack.c.l.b16 %v2032_v24  ;;  %v2715_v23 = vunpack.c.h.b16 %v2032_v24 }
 0x166   :  { %v1315_v45 = vadd.f32 %v1314_v8, %v6540_v25  ;;  %v1171_v52 = vadd.f32 %v1170_v31, %v6518_v26  ;;  %v1219_v27 = vpop.f32.mrf.mxu1  ;;  %v4967_v31 = vld [vmem:[#allocation5 + $0x138] sm:$0xf] }
 0x167   :  { %v1820_v19 = vmax.f32 %v1266_v6, 0.0  ;;  %v1220_v9 = vadd.f32 %v1219_v27, %v6521_v53  ;;  %v6600_v47 = vpack.c.b16 %v2714_v4, %v2698_v41  ;;  %v6602_v51 = vpack.c.b16 %v2715_v23, %v2699_v44 }
 0x168   :  { %v1821_v60 = vmax.f32 %v1315_v45, 0.0  ;;  %v1834_v48 = vmax.f32 %v1171_v52, 0.0  ;;  %1365 = vmatmul.bf16.gmra.mxu0 %v6604_v59  ;;  %1414 = vmatmul.bf16.gmra.mxu1 %v6604_v59  ;;  %v2701_v4 = vunpack.c.h.b16 %v2025_v42  ;;  %v4968_v27 = vor.u32 %v5860_v63, %v4967_v31 }
 0x169   :  { %7330 = vst [vmem:[#allocation31_spill] sm:$0xff] %v6600_v47  ;;  %v1835_v37 = vmax.f32 %v1220_v9, 0.0  ;;  %1463 = vmatmul.bf16.gmra.mxu2 %v6604_v59  ;;  %v5859_v9 = vld [vmem:[#allocation5 + $0x16c] sm:$0xf0] }
 0x16a   :  { %7331 = vst [vmem:[#allocation32_spill] sm:$0xff] %v6602_v51  ;;  %v2033_v5 = vpack.c.bf16 %v1821_v60, %v1820_v19  ;;  %1512 = vmatmul.bf16.gmra.mxu3 %v6604_v59  ;;  %v4959_v19 = vld [vmem:[#allocation5 + $0x130] sm:$0xf]  ;;  %v5852_v60 = vld [vmem:[#allocation5 + $0x13c] sm:$0xf]  ;;  %1641 = vmatpush.bf16.msrb.mxu2 %v4968_v27 }
 0x16b   :  { %v2040_v24 = vpack.c.bf16 %v1835_v37, %v1834_v48  ;;  %v4969_v51 = vld [vmem:[#allocation5 + $0x178] sm:$0xf0] }
 0x16c   :  { %2161 = vst [vmem:[#allocation11 + $0x158] sm:$0xff] %v2033_v5  ;;  %v1268_v35 = vpop.f32.mrf.mxu2  ;;  %v2716_v44 = vunpack.c.l.b16 %v2033_v5  ;;  %v2717_v34 = vunpack.c.h.b16 %v2033_v5 }
 0x16d   :  { %2168 = vst [vmem:[#allocation11 + $0x190] sm:$0xff] %v2040_v24  ;;  %v1269_v41 = vadd.f32 %v1268_v35, %v6537_v58  ;;  %v1317_v6 = vpop.f32.mrf.mxu3  ;;  %v1172_v8 = vpop.f32.mrf.mxu0  ;;  %v4960_v35 = vor.u32 %v5859_v9, %v4959_v19 }
 0x16e   :  { %v1318_v23 = vadd.f32 %v1317_v6, %v6540_v25  ;;  %v1173_v45 = vadd.f32 %v1172_v8, %v6518_v26  ;;  %v1221_v52 = vpop.f32.mrf.mxu1  ;;  %v6613_v48 = vpack.c.b16 %v2716_v44, %v2700_v36  ;;  %v6616_v47 = vpack.c.b16 %v2717_v34, %v2701_v4  ;;  %v5851_v36 = vld [vmem:[#allocation5 + $0x134] sm:$0xf] }
 0x16f   :  { %v1836_v37 = vmax.f32 %v1269_v41, 0.0  ;;  %v1222_v5 = vadd.f32 %v1221_v52, %v6521_v53  ;;  %v4972_v6 = vor.u32 %v5852_v60, %v4969_v51  ;;  %1543 = vmatpush.bf16.msrb.mxu0 %v4960_v35  ;;  %v4961_v44 = vld [vmem:[#allocation5 + $0x170] sm:$0xf0]  ;;  %v2730_v41 = vunpack.c.l.b16 %v2040_v24  ;;  %v6626_v35 = vld [vmem:[#allocation2 + $0x20] sm:$0xff] }
 0x170   :  { %7332 = vst [vmem:[#allocation33_spill] sm:$0xff] %v6613_v48  ;;  %v1837_v12 = vmax.f32 %v1318_v23, 0.0  ;;  %v1850_v42 = vmax.f32 %v1173_v45, 0.0  ;;  %v2731_v48 = vunpack.c.h.b16 %v2040_v24  ;;  %v4964_v23 = vor.u32 %v5851_v36, %v4961_v44 }
 0x171   :  { %7333 = vst [vmem:[#allocation34_spill] sm:$0xff] %v6616_v47  ;;  %v1851_v7 = vmax.f32 %v1222_v5, 0.0  ;;  %1690 = vmatpush.bf16.msrb.mxu3 %v4972_v6 }
 0x172   :  { %v2041_v8 = vpack.c.bf16 %v1837_v12, %v1836_v37  ;;  %1592 = vmatpush.bf16.msrb.mxu1 %v4964_v23  ;;  %v5844_v23 = vld [vmem:[#allocation5 + $0xf4] sm:$0xf0] }
 0x173   :  { %v2048_v31 = vpack.c.bf16 %v1851_v7, %v1850_v42 }
 0x174   :  { %2169 = vst [vmem:[#allocation11 + $0x198] sm:$0xff] %v2041_v8  ;;  %v1270_v63 = vpop.f32.mrf.mxu2  ;;  %v2732_v36 = vunpack.c.l.b16 %v2041_v8 }
 0x175   :  { %2176 = vst [vmem:[#allocation11 + $0x1d0] sm:$0xff] %v2048_v31  ;;  %v1271_v52 = vadd.f32 %v1270_v63, %v6537_v58  ;;  %v1319_v34 = vpop.f32.mrf.mxu3  ;;  %v1175_v4 = vpop.f32.mrf.mxu0  ;;  %v2746_v45 = vunpack.c.l.b16 %v2048_v31  ;;  %v2747_v27 = vunpack.c.h.b16 %v2048_v31 }
 0x176   :  { %v1320_v51 = vadd.f32 %v1319_v34, %v6540_v25  ;;  %v1176_v12 = vadd.f32 %v1175_v4, %v6518_v26  ;;  %v1224_v19 = vpop.f32.mrf.mxu1  ;;  %v4903_v4 = vld [vmem:[#allocation5 + $0xb8] sm:$0xf] }
 0x177   :  { %v1852_v7 = vmax.f32 %v1271_v52, 0.0  ;;  %v1225_v9 = vadd.f32 %v1224_v19, %v6521_v53  ;;  %v6622_v60 = vpack.c.b16 %v2746_v45, %v2730_v41  ;;  %v6624_v24 = vpack.c.b16 %v2747_v27, %v2731_v48 }
 0x178   :  { %v1853_v37 = vmax.f32 %v1320_v51, 0.0  ;;  %v1866_v5 = vmax.f32 %v1176_v12, 0.0  ;;  %1370 = vmatmul.bf16.gmra.mxu0 %v6626_v35  ;;  %1419 = vmatmul.bf16.gmra.mxu1 %v6626_v35  ;;  %v2733_v45 = vunpack.c.h.b16 %v2041_v8  ;;  %v4904_v19 = vor.u32 %v5844_v23, %v4903_v4 }
 0x179   :  { %7334 = vst [vmem:[#allocation35_spill] sm:$0xff] %v6622_v60  ;;  %v1867_v42 = vmax.f32 %v1225_v9, 0.0  ;;  %1468 = vmatmul.bf16.gmra.mxu2 %v6626_v35  ;;  %v5843_v9 = vld [vmem:[#allocation5 + $0xec] sm:$0xf0] }
 0x17a   :  { %7335 = vst [vmem:[#allocation36_spill] sm:$0xff] %v6624_v24  ;;  %v2049_v6 = vpack.c.bf16 %v1853_v37, %v1852_v7  ;;  %1517 = vmatmul.bf16.gmra.mxu3 %v6626_v35  ;;  %v4895_v7 = vld [vmem:[#allocation5 + $0xb0] sm:$0xf]  ;;  %v5836_v37 = vld [vmem:[#allocation5 + $0xbc] sm:$0xf]  ;;  %1642 = vmatpush.bf16.msrb.mxu2 %v4904_v19 }
 0x17b   :  { %v2056_v31 = vpack.c.bf16 %v1867_v42, %v1866_v5  ;;  %v4905_v24 = vld [vmem:[#allocation5 + $0xf8] sm:$0xf0] }
 0x17c   :  { %2177 = vst [vmem:[#allocation11 + $0x1d8] sm:$0xff] %v2049_v6  ;;  %v1273_v63 = vpop.f32.mrf.mxu2  ;;  %v2748_v48 = vunpack.c.l.b16 %v2049_v6  ;;  %v2749_v44 = vunpack.c.h.b16 %v2049_v6 }
 0x17d   :  { %2184 = vst [vmem:[#allocation11 + $0x210] sm:$0xff] %v2056_v31  ;;  %v1274_v41 = vadd.f32 %v1273_v63, %v6537_v58  ;;  %v1322_v52 = vpop.f32.mrf.mxu3  ;;  %v1177_v34 = vpop.f32.mrf.mxu0  ;;  %v4896_v63 = vor.u32 %v5843_v9, %v4895_v7 }
 0x17e   :  { %v1323_v27 = vadd.f32 %v1322_v52, %v6540_v25  ;;  %v1178_v51 = vadd.f32 %v1177_v34, %v6518_v26  ;;  %v1226_v12 = vpop.f32.mrf.mxu1  ;;  %v6635_v5 = vpack.c.b16 %v2748_v48, %v2732_v36  ;;  %v6638_v60 = vpack.c.b16 %v2749_v44, %v2733_v45  ;;  %v5835_v36 = vld [vmem:[#allocation5 + $0xb4] sm:$0xf] }
 0x17f   :  { %v1868_v42 = vmax.f32 %v1274_v41, 0.0  ;;  %v1227_v6 = vadd.f32 %v1226_v12, %v6521_v53  ;;  %v4908_v52 = vor.u32 %v5836_v37, %v4905_v24  ;;  %1544 = vmatpush.bf16.msrb.mxu0 %v4896_v63  ;;  %v4897_v48 = vld [vmem:[#allocation5 + $0xf0] sm:$0xf0]  ;;  %v2762_v41 = vunpack.c.l.b16 %v2056_v31  ;;  %v6648_v63 = vld [vmem:[#allocation2 + $0x28] sm:$0xff] }
 0x180   :  { %7336 = vst [vmem:[#allocation37_spill] sm:$0xff] %v6635_v5  ;;  %v1869_v47 = vmax.f32 %v1323_v27, 0.0  ;;  %v1882_v8 = vmax.f32 %v1178_v51, 0.0  ;;  %v2763_v5 = vunpack.c.h.b16 %v2056_v31  ;;  %v4900_v27 = vor.u32 %v5835_v36, %v4897_v48 }
 0x181   :  { %7337 = vst [vmem:[#allocation38_spill] sm:$0xff] %v6638_v60  ;;  %v1883_v57 = vmax.f32 %v1227_v6, 0.0  ;;  %1691 = vmatpush.bf16.msrb.mxu3 %v4908_v52 }
 0x182   :  { %v2057_v34 = vpack.c.bf16 %v1869_v47, %v1868_v42  ;;  %1593 = vmatpush.bf16.msrb.mxu1 %v4900_v27  ;;  %v5828_v27 = vld [vmem:[#allocation5 + $0x74] sm:$0xf0] }
 0x183   :  { %v2064_v4 = vpack.c.bf16 %v1883_v57, %v1882_v8 }
 0x184   :  { %2185 = vst [vmem:[#allocation11 + $0x218] sm:$0xff] %v2057_v34  ;;  %v1275_v23 = vpop.f32.mrf.mxu2  ;;  %v2764_v36 = vunpack.c.l.b16 %v2057_v34 }
 0x185   :  { %2192 = vst [vmem:[#allocation11 + $0x250] sm:$0xff] %v2064_v4  ;;  %v1276_v12 = vadd.f32 %v1275_v23, %v6537_v58  ;;  %v1324_v44 = vpop.f32.mrf.mxu3  ;;  %v1180_v45 = vpop.f32.mrf.mxu0  ;;  %v2778_v51 = vunpack.c.l.b16 %v2064_v4  ;;  %v2779_v19 = vunpack.c.h.b16 %v2064_v4 }
 0x186   :  { %v1325_v24 = vadd.f32 %v1324_v44, %v6540_v25  ;;  %v1181_v47 = vadd.f32 %v1180_v45, %v6518_v26  ;;  %v1229_v7 = vpop.f32.mrf.mxu1  ;;  %v4839_v45 = vld [vmem:[#allocation5 + $0x38] sm:$0xf] }
 0x187   :  { %v1884_v57 = vmax.f32 %v1276_v12, 0.0  ;;  %v1230_v9 = vadd.f32 %v1229_v7, %v6521_v53  ;;  %v6644_v37 = vpack.c.b16 %v2778_v51, %v2762_v41  ;;  %v6646_v31 = vpack.c.b16 %v2779_v19, %v2763_v5 }
 0x188   :  { %v1885_v42 = vmax.f32 %v1325_v24, 0.0  ;;  %v1898_v6 = vmax.f32 %v1181_v47, 0.0  ;;  %1375 = vmatmul.bf16.gmra.mxu0 %v6648_v63  ;;  %1424 = vmatmul.bf16.gmra.mxu1 %v6648_v63  ;;  %v2765_v51 = vunpack.c.h.b16 %v2057_v34  ;;  %v4840_v7 = vor.u32 %v5828_v27, %v4839_v45 }
 0x189   :  { %7338 = vst [vmem:[#allocation39_spill] sm:$0xff] %v6644_v37  ;;  %v1899_v8 = vmax.f32 %v1230_v9, 0.0  ;;  %1473 = vmatmul.bf16.gmra.mxu2 %v6648_v63  ;;  %v5827_v9 = vld [vmem:[#allocation5 + $0x6c] sm:$0xf0] }
 0x18a   :  { %7339 = vst [vmem:[#allocation40_spill] sm:$0xff] %v6646_v31  ;;  %v2065_v52 = vpack.c.bf16 %v1885_v42, %v1884_v57  ;;  %1522 = vmatmul.bf16.gmra.mxu3 %v6648_v63  ;;  %v4831_v57 = vld [vmem:[#allocation5 + $0x30] sm:$0xf]  ;;  %v5820_v42 = vld [vmem:[#allocation5 + $0x3c] sm:$0xf]  ;;  %1643 = vmatpush.bf16.msrb.mxu2 %v4840_v7 }
 0x18b   :  { %v2072_v4 = vpack.c.bf16 %v1899_v8, %v1898_v6  ;;  %v4841_v31 = vld [vmem:[#allocation5 + $0x78] sm:$0xf0] }
 0x18c   :  { %2193 = vst [vmem:[#allocation11 + $0x258] sm:$0xff] %v2065_v52  ;;  %v1278_v23 = vpop.f32.mrf.mxu2  ;;  %v2780_v5 = vunpack.c.l.b16 %v2065_v52  ;;  %v2781_v48 = vunpack.c.h.b16 %v2065_v52 }
 0x18d   :  { %2200 = vst [vmem:[#allocation11 + $0x290] sm:$0xff] %v2072_v4  ;;  %v1279_v41 = vadd.f32 %v1278_v23, %v6537_v58  ;;  %v1327_v12 = vpop.f32.mrf.mxu3  ;;  %v1182_v44 = vpop.f32.mrf.mxu0  ;;  %v4832_v23 = vor.u32 %v5827_v9, %v4831_v57 }
 0x18e   :  { %v1328_v19 = vadd.f32 %v1327_v12, %v6540_v25  ;;  %v1183_v24 = vadd.f32 %v1182_v44, %v6518_v26  ;;  %v1231_v47 = vpop.f32.mrf.mxu1  ;;  %v6657_v6 = vpack.c.b16 %v2780_v5, %v2764_v36  ;;  %v6660_v37 = vpack.c.b16 %v2781_v48, %v2765_v51  ;;  %v5819_v36 = vld [vmem:[#allocation5 + $0x34] sm:$0xf] }
 0x18f   :  { %v1900_v8 = vmax.f32 %v1279_v41, 0.0  ;;  %v1232_v52 = vadd.f32 %v1231_v47, %v6521_v53  ;;  %v4844_v12 = vor.u32 %v5820_v42, %v4841_v31  ;;  %1545 = vmatpush.bf16.msrb.mxu0 %v4832_v23  ;;  %v4833_v5 = vld [vmem:[#allocation5 + $0x70] sm:$0xf0]  ;;  %v2794_v41 = vunpack.c.l.b16 %v2072_v4 }
 0x190   :  { %7340 = vst [vmem:[#allocation41_spill] sm:$0xff] %v6657_v6  ;;  %v1901_v60 = vmax.f32 %v1328_v19, 0.0  ;;  %v1914_v34 = vmax.f32 %v1183_v24, 0.0  ;;  %v2795_v6 = vunpack.c.h.b16 %v2072_v4  ;;  %v4836_v19 = vor.u32 %v5819_v36, %v4833_v5  ;;  %v6670_v23 = vld [vmem:[#allocation2 + $0x30] sm:$0xff] }
 0x191   :  { %7341 = vst [vmem:[#allocation42_spill] sm:$0xff] %v6660_v37  ;;  %v1915_v16 = vmax.f32 %v1232_v52, 0.0  ;;  %1692 = vmatpush.bf16.msrb.mxu3 %v4844_v12 }
 0x192   :  { %v2073_v44 = vpack.c.bf16 %v1901_v60, %v1900_v8  ;;  %1594 = vmatpush.bf16.msrb.mxu1 %v4836_v19  ;;  %v5964_v19 = vld [vmem:[#allocation8 + $0xb8] sm:$0xff] }
 0x193   :  { %v2080_v45 = vpack.c.bf16 %v1915_v16, %v1914_v34  ;;  %4008 = vmatpush.bf16.msra.mxu2 %v5964_v19 }
 0x194   :  { %2201 = vst [vmem:[#allocation11 + $0x298] sm:$0xff] %v2073_v44  ;;  %v1280_v27 = vpop.f32.mrf.mxu2  ;;  %v2796_v36 = vunpack.c.l.b16 %v2073_v44  ;;  %v2797_v5 = vunpack.c.h.b16 %v2073_v44 }
 0x195   :  { %2208 = vst [vmem:[#allocation11 + $0x2d0] sm:$0xff] %v2080_v45  ;;  %v1281_v47 = vadd.f32 %v1280_v27, %v6537_v58  ;;  %v1329_v48 = vpop.f32.mrf.mxu3  ;;  %v1185_v51 = vpop.f32.mrf.mxu0  ;;  %v2810_v24 = vunpack.c.l.b16 %v2080_v45  ;;  %v2811_v7 = vunpack.c.h.b16 %v2080_v45 }
 0x196   :  { %v1330_v31 = vadd.f32 %v1329_v48, %v6540_v25  ;;  %v1186_v60 = vadd.f32 %v1185_v51, %v6518_v26  ;;  %v1234_v57 = vpop.f32.mrf.mxu1 }
 0x197   :  { %v1916_v16 = vmax.f32 %v1281_v47, 0.0  ;;  %v1235_v9 = vadd.f32 %v1234_v57, %v6521_v53  ;;  %v6666_v42 = vpack.c.b16 %v2810_v24, %v2794_v41  ;;  %v6668_v4 = vpack.c.b16 %v2811_v7, %v2795_v6  ;;  %v5948_v24 = vld [vmem:[#allocation8 + $0x38] sm:$0xff] }
 0x198   :  { %v1917_v8 = vmax.f32 %v1330_v31, 0.0  ;;  %v1930_v52 = vmax.f32 %v1186_v60, 0.0  ;;  %1380 = vmatmul.bf16.gmra.mxu0 %v6670_v23  ;;  %1429 = vmatmul.bf16.gmra.mxu1 %v6670_v23  ;;  %v5972_v7 = vld [vmem:[#allocation8 + $0xf8] sm:$0xff] }
 0x199   :  { %7342 = vst [vmem:[#allocation43_spill] sm:$0xff] %v6666_v42  ;;  %v1931_v34 = vmax.f32 %v1235_v9, 0.0  ;;  %1478 = vmatmul.bf16.gmra.mxu2 %v6670_v23  ;;  %3910 = vmatpush.bf16.msra.mxu0 %v5948_v24  ;;  %v5956_v42 = vld [vmem:[#allocation8 + $0x78] sm:$0xff] }
 0x19a   :  { %7343 = vst [vmem:[#allocation44_spill] sm:$0xff] %v6668_v4  ;;  %v2081_v12 = vpack.c.bf16 %v1917_v8, %v1916_v16  ;;  %1527 = vmatmul.bf16.gmra.mxu3 %v6670_v23  ;;  %3959 = vmatpush.bf16.msra.mxu1 %v5956_v42 }
 0x19b   :  { %v2088_v45 = vpack.c.bf16 %v1931_v34, %v1930_v52  ;;  %4057 = vmatpush.bf16.msra.mxu3 %v5972_v7 }
 0x19c   :  { %2209 = vst [vmem:[#allocation11 + $0x2d8] sm:$0xff] %v2081_v12  ;;  %v1283_v27 = vpop.f32.mrf.mxu2  ;;  %v2812_v6 = vunpack.c.l.b16 %v2081_v12  ;;  %v2813_v41 = vunpack.c.h.b16 %v2081_v12 }
 0x19d   :  { %2216 = vst [vmem:[#allocation11 + $0x310] sm:$0xff] %v2088_v45  ;;  %v1284_v47 = vadd.f32 %v1283_v27, %v6537_v58  ;;  %v1332_v48 = vpop.f32.mrf.mxu3  ;;  %v1187_v51 = vpop.f32.mrf.mxu0 }
 0x19e   :  { %v1333_v31 = vadd.f32 %v1332_v48, %v6540_v25  ;;  %v1188_v60 = vadd.f32 %v1187_v51, %v6518_v26  ;;  %v1236_v57 = vpop.f32.mrf.mxu1  ;;  %v6679_v16 = vpack.c.b16 %v2812_v6, %v2796_v36  ;;  %v6681_v9 = vpack.c.b16 %v2813_v41, %v2797_v5 }
 0x19f   :  { %v1932_v8 = vmax.f32 %v1284_v47, 0.0  ;;  %v1237_v44 = vadd.f32 %v1236_v57, %v6521_v53  ;;  %v2826_v51 = vunpack.c.l.b16 %v2088_v45  ;;  %v2827_v47 = vunpack.c.h.b16 %v2088_v45 }
 0x1a0   :  { %7344 = vst [vmem:[#allocation45_spill] sm:$0xff] %v6679_v16  ;;  %v1933_v52 = vmax.f32 %v1333_v31, 0.0  ;;  %v1946_v34 = vmax.f32 %v1188_v60, 0.0 }
 0x1a1   :  { %7345 = vst [vmem:[#allocation46_spill] sm:$0xff] %v6681_v9  ;;  %v1947_v12 = vmax.f32 %v1237_v44, 0.0 }
 0x1a2   :  { %v2089_v27 = vpack.c.bf16 %v1933_v52, %v1932_v8 }
 0x1a3   :  { %v2096_v4 = vpack.c.bf16 %v1947_v12, %v1946_v34  ;;  %v6692_v12 = vld [vmem:[#allocation2 + $0x38] sm:$0xff] }
 0x1a4   :  { %2217 = vst [vmem:[#allocation11 + $0x318] sm:$0xff] %v2089_v27  ;;  %v1285_v48 = vpop.f32.mrf.mxu2 }
 0x1a5   :  { %2224 = vst [vmem:[#allocation11 + $0x350] sm:$0xff] %v2096_v4  ;;  %v1286_v36 = vadd.f32 %v1285_v48, %v6537_v58  ;;  %v1334_v6 = vpop.f32.mrf.mxu3  ;;  %v1190_v5 = vpop.f32.mrf.mxu0  ;;  %v2842_v41 = vunpack.c.l.b16 %v2096_v4  ;;  %v2843_v57 = vunpack.c.h.b16 %v2096_v4 }
 0x1a6   :  { %v1335_v19 = vadd.f32 %v1334_v6, %v6540_v25  ;;  %v1191_v24 = vadd.f32 %v1190_v5, %v6518_v26  ;;  %v1239_v7 = vpop.f32.mrf.mxu1  ;;  %v2829_v6 = vunpack.c.h.b16 %v2089_v27 }
 0x1a7   :  { %v1948_v31 = vmax.f32 %v1286_v36, 0.0  ;;  %v1240_v60 = vadd.f32 %v1239_v7, %v6521_v53  ;;  %v6688_v8 = vpack.c.b16 %v2842_v41, %v2826_v51  ;;  %v6690_v44 = vpack.c.b16 %v2843_v57, %v2827_v47 }
 0x1a8   :  { %v1949_v52 = vmax.f32 %v1335_v19, 0.0  ;;  %v1962_v34 = vmax.f32 %v1191_v24, 0.0  ;;  %1385 = vmatmul.bf16.gmra.mxu0 %v6692_v12  ;;  %1434 = vmatmul.bf16.gmra.mxu1 %v6692_v12  ;;  %v2828_v51 = vunpack.c.l.b16 %v2089_v27 }
 0x1a9   :  { %7346 = vst [vmem:[#allocation47_spill] sm:$0xff] %v6688_v8  ;;  %v1963_v4 = vmax.f32 %v1240_v60, 0.0  ;;  %1483 = vmatmul.bf16.gmra.mxu2 %v6692_v12  ;;  %v5947_v60 = vld [vmem:[#allocation8 + $0x30] sm:$0xff] }
 0x1aa   :  { %7347 = vst [vmem:[#allocation48_spill] sm:$0xff] %v6690_v44  ;;  %v2097_v45 = vpack.c.bf16 %v1949_v52, %v1948_v31  ;;  %1532 = vmatmul.bf16.gmra.mxu3 %v6692_v12  ;;  %v5963_v31 = vld [vmem:[#allocation8 + $0xb0] sm:$0xff]  ;;  %3911 = vmatpush.bf16.msra.mxu0 %v5947_v60 }
 0x1ab   :  { %v2104_v42 = vpack.c.bf16 %v1963_v4, %v1962_v34  ;;  %v5971_v52 = vld [vmem:[#allocation8 + $0xf0] sm:$0xff]  ;;  %4009 = vmatpush.bf16.msra.mxu2 %v5963_v31 }
 0x1ac   :  { %2225 = vst [vmem:[#allocation11 + $0x358] sm:$0xff] %v2097_v45  ;;  %v1288_v48 = vpop.f32.mrf.mxu2  ;;  %v2844_v36 = vunpack.c.l.b16 %v2097_v45  ;;  %v2845_v5 = vunpack.c.h.b16 %v2097_v45  ;;  %v6706_v45 = vld [vmem:[#allocation7 + $0x8] sm:$0xff]  ;;  %4058 = vmatpush.bf16.msra.mxu3 %v5971_v52 }
 0x1ad   :  { %2232 = vst [vmem:[#allocation11 + $0x390] sm:$0xff] %v2104_v42  ;;  %v1289_v41 = vadd.f32 %v1288_v48, %v6537_v58  ;;  %v1337_v47 = vpop.f32.mrf.mxu3  ;;  %v1192_v57 = vpop.f32.mrf.mxu0 }
 0x1ae   :  { %v1338_v19 = vadd.f32 %v1337_v47, %v6540_v25  ;;  %v1193_v24 = vadd.f32 %v1192_v57, %v6518_v26  ;;  %v1241_v7 = vpop.f32.mrf.mxu1  ;;  %v6701_v34 = vpack.c.b16 %v2844_v36, %v2828_v51  ;;  %v6703_v4 = vpack.c.b16 %v2845_v5, %v2829_v6  ;;  %v5955_v6 = vld [vmem:[#allocation8 + $0x70] sm:$0xff] }
 0x1af   :  { %v1964_v44 = vmax.f32 %v1289_v41, 0.0  ;;  %v1242_v27 = vadd.f32 %v1241_v7, %v6521_v53  ;;  %v6709_v57 = vperm.slane %v6706_v45, 0  ;;  %v6712_v51 = vperm.slane %v6706_v45, 1  ;;  %3960 = vmatpush.bf16.msra.mxu1 %v5955_v6 }
 0x1b0   :  { %7348 = vst [vmem:[#allocation49_spill] sm:$0xff] %v6701_v34  ;;  %v1965_v48 = vmax.f32 %v1338_v19, 0.0  ;;  %v1978_v8 = vmax.f32 %v1193_v24, 0.0  ;;  %v2858_v53 = vunpack.c.l.b16 %v2104_v42  ;;  %v2859_v7 = vunpack.c.h.b16 %v2104_v42 }
 0x1b1   :  { %7349 = vst [vmem:[#allocation50_spill] sm:$0xff] %v6703_v4  ;;  %v1979_v47 = vmax.f32 %v1242_v27, 0.0  ;;  %v6730_v42 = vperm.slane %v6706_v45, 3 }
 0x1b2   :  { %v2105_v26 = vpack.c.bf16 %v1965_v48, %v1964_v44 }
 0x1b3   :  { %v2112_v9 = vpack.c.bf16 %v1979_v47, %v1978_v8 }
 0x1b4   :  { %2233 = vst [vmem:[#allocation11 + $0x398] sm:$0xff] %v2105_v26  ;;  %v1290_v36 = vpop.f32.mrf.mxu2 }
 0x1b5   :  { %2240 = vst [vmem:[#allocation11 + $0x3d0] sm:$0xff] %v2112_v9  ;;  %v1291_v5 = vadd.f32 %v1290_v36, %v6537_v58  ;;  %v1339_v41 = vpop.f32.mrf.mxu3  ;;  %v1351_v19 = vpop.f32.mrf.mxu0  ;;  %v2874_v24 = vunpack.c.l.b16 %v2112_v9  ;;  %v2875_v31 = vunpack.c.h.b16 %v2112_v9 }
 0x1b6   :  { %v1340_v44 = vadd.f32 %v1339_v41, %v6540_v25  ;;  %v1352_v60 = vadd.f32 %v1351_v19, %v6709_v57  ;;  %v1400_v8 = vpop.f32.mrf.mxu1  ;;  %v6726_v25 = vperm.slane %v6706_v45, 2  ;;  %v2861_v19 = vunpack.c.h.b16 %v2105_v26 }
 0x1b7   :  { %v1980_v52 = vmax.f32 %v1291_v5, 0.0  ;;  %v1401_v27 = vadd.f32 %v1400_v8, %v6712_v51  ;;  %v6718_v48 = vpack.c.b16 %v2874_v24, %v2858_v53  ;;  %v6720_v47 = vpack.c.b16 %v2875_v31, %v2859_v7  ;;  %v5946_v8 = vld [vmem:[#allocation8 + $0x28] sm:$0xff] }
 0x1b8   :  { %v1981_v4 = vmax.f32 %v1340_v44, 0.0  ;;  %v1742_v58 = vmax.f32 %v1352_v60, 0.0  ;;  %1546 = vmatmul.bf16.vlgmr.msrb.gmra.mxu0 %v6532_v22  ;;  %1595 = vmatmul.bf16.vlgmr.msrb.gmra.mxu1 %v6532_v22  ;;  %v2860_v5 = vunpack.c.l.b16 %v2105_v26  ;;  %v5962_v60 = vld [vmem:[#allocation8 + $0xa8] sm:$0xff] }
 0x1b9   :  { %7350 = vst [vmem:[#allocation51_spill] sm:$0xff] %v6718_v48  ;;  %v1743_v36 = vmax.f32 %v1401_v27, 0.0  ;;  %1644 = vmatmul.bf16.vlgmr.msrb.gmra.mxu2 %v6532_v22  ;;  %3912 = vmatpush.bf16.msra.mxu0 %v5946_v8 }
 0x1ba   :  { %7351 = vst [vmem:[#allocation52_spill] sm:$0xff] %v6720_v47  ;;  %v2113_v9 = vpack.c.bf16 %v1981_v4, %v1980_v52  ;;  %1693 = vmatmul.bf16.vlgmr.msrb.gmra.mxu3 %v6532_v22  ;;  %v5970_v4 = vld [vmem:[#allocation8 + $0xe8] sm:$0xff]  ;;  %4010 = vmatpush.bf16.msra.mxu2 %v5962_v60 }
 0x1bb   :  { %v1994_v6 = vpack.c.bf16 %v1743_v36, %v1742_v58  ;;  %4059 = vmatpush.bf16.msra.mxu3 %v5970_v4 }
 0x1bc   :  { %2241 = vst [vmem:[#allocation11 + $0x3d8] sm:$0xff] %v2113_v9  ;;  %v1449_v53 = vpop.f32.mrf.mxu2  ;;  %v2876_v41 = vunpack.c.l.b16 %v2113_v9  ;;  %v2877_v24 = vunpack.c.h.b16 %v2113_v9 }
 0x1bd   :  { %2122 = vst [vmem:[#allocation11 + $0x20] sm:$0xff] %v1994_v6  ;;  %v1450_v7 = vadd.f32 %v1449_v53, %v6726_v25  ;;  %v1498_v31 = vpop.f32.mrf.mxu3  ;;  %v1353_v44 = vpop.f32.mrf.mxu0  ;;  %v2638_v37 = vunpack.c.l.b16 %v1994_v6  ;;  %v2639_v20 = vunpack.c.h.b16 %v1994_v6 }
 0x1be   :  { %v1499_v22 = vadd.f32 %v1498_v31, %v6730_v42  ;;  %v1354_v52 = vadd.f32 %v1353_v44, %v6709_v57  ;;  %v1402_v27 = vpop.f32.mrf.mxu1  ;;  %v6735_v58 = vpack.c.b16 %v2876_v41, %v2860_v5  ;;  %v6737_v36 = vpack.c.b16 %v2877_v24, %v2861_v19  ;;  %v5954_v44 = vld [vmem:[#allocation8 + $0x68] sm:$0xff] }
 0x1bf   :  { %v1744_v47 = vmax.f32 %v1450_v7, 0.0  ;;  %v1403_v26 = vadd.f32 %v1402_v27, %v6712_v51  ;;  %3961 = vmatpush.bf16.msra.mxu1 %v5954_v44 }
 0x1c0   :  { %v1745_v9 = vmax.f32 %v1499_v22, 0.0  ;;  %v1758_v53 = vmax.f32 %v1354_v52, 0.0 }
 0x1c1   :  { %v1759_v48 = vmax.f32 %v1403_v26, 0.0 }
 0x1c2   :  { %v1995_v34 = vpack.c.bf16 %v1745_v9, %v1744_v47 }
 0x1c3   :  { %v2002_v16 = vpack.c.bf16 %v1759_v48, %v1758_v53 }
 0x1c4   :  { %2123 = vst [vmem:[#allocation11 + $0x28] sm:$0xff] %v1995_v34  ;;  %v1451_v31 = vpop.f32.mrf.mxu2  ;;  %v2641_v53 = vunpack.c.h.b16 %v1995_v34 }
 0x1c5   :  { %2130 = vst [vmem:[#allocation11 + $0x60] sm:$0xff] %v2002_v16  ;;  %v2654_v5 = vunpack.c.l.b16 %v2002_v16  ;;  %v2655_v41 = vunpack.c.h.b16 %v2002_v16  ;;  %v1452_v19 = vadd.f32 %v1451_v31, %v6726_v25  ;;  %v1500_v24 = vpop.f32.mrf.mxu3  ;;  %v1356_v7 = vpop.f32.mrf.mxu0 }
 0x1c6   :  { %v1501_v60 = vadd.f32 %v1500_v24, %v6730_v42  ;;  %v1357_v8 = vadd.f32 %v1356_v7, %v6709_v57  ;;  %v1405_v4 = vpop.f32.mrf.mxu1  ;;  %v5961_v24 = vld [vmem:[#allocation8 + $0xa0] sm:$0xff] }
 0x1c7   :  { %v6743_v47 = vpack.c.b16 %v2654_v5, %v2638_v37  ;;  %v6745_v48 = vpack.c.b16 %v2655_v41, %v2639_v20  ;;  %v1760_v22 = vmax.f32 %v1452_v19, 0.0  ;;  %v1406_v6 = vadd.f32 %v1405_v4, %v6712_v51  ;;  %v5945_v7 = vld [vmem:[#allocation8 + $0x20] sm:$0xff]  ;;  %4011 = vmatpush.bf16.msra.mxu2 %v5961_v24 }
 0x1c8   :  { %v1761_v52 = vmax.f32 %v1501_v60, 0.0  ;;  %v1774_v27 = vmax.f32 %v1357_v8, 0.0  ;;  %1551 = vmatmul.bf16.gmra.mxu0 %v6560_v10  ;;  %1600 = vmatmul.bf16.gmra.mxu1 %v6560_v10  ;;  %v2640_v37 = vunpack.c.l.b16 %v1995_v34  ;;  %v5969_v60 = vld [vmem:[#allocation8 + $0xe0] sm:$0xff] }
 0x1c9   :  { %7352 = vst [vmem:[#allocation53_spill] sm:$0xff] %v6745_v48  ;;  %v1775_v16 = vmax.f32 %v1406_v6, 0.0  ;;  %1649 = vmatmul.bf16.gmra.mxu2 %v6560_v10  ;;  %3913 = vmatpush.bf16.msra.mxu0 %v5945_v7 }
 0x1ca   :  { %v2003_v26 = vpack.c.bf16 %v1761_v52, %v1760_v22  ;;  %1698 = vmatmul.bf16.gmra.mxu3 %v6560_v10 }
 0x1cb   :  { %v2010_v9 = vpack.c.bf16 %v1775_v16, %v1774_v27  ;;  %4060 = vmatpush.bf16.msra.mxu3 %v5969_v60 }
 0x1cc   :  { %2131 = vst [vmem:[#allocation11 + $0x68] sm:$0xff] %v2003_v26  ;;  %v2656_v20 = vunpack.c.l.b16 %v2003_v26  ;;  %v2657_v31 = vunpack.c.h.b16 %v2003_v26  ;;  %v1454_v44 = vpop.f32.mrf.mxu2 }
 0x1cd   :  { %2138 = vst [vmem:[#allocation11 + $0xa0] sm:$0xff] %v2010_v9  ;;  %v1455_v5 = vadd.f32 %v1454_v44, %v6726_v25  ;;  %v1503_v41 = vpop.f32.mrf.mxu3  ;;  %v1358_v19 = vpop.f32.mrf.mxu0 }
 0x1ce   :  { %v6753_v8 = vpack.c.b16 %v2656_v20, %v2640_v37  ;;  %v6755_v4 = vpack.c.b16 %v2657_v31, %v2641_v53  ;;  %v1504_v10 = vadd.f32 %v1503_v41, %v6730_v42  ;;  %v1359_v34 = vadd.f32 %v1358_v19, %v6709_v57  ;;  %v1407_v22 = vpop.f32.mrf.mxu1  ;;  %v5953_v53 = vld [vmem:[#allocation8 + $0x60] sm:$0xff] }
 0x1cf   :  { %v1776_v6 = vmax.f32 %v1455_v5, 0.0  ;;  %v1408_v52 = vadd.f32 %v1407_v22, %v6712_v51  ;;  %v2670_v20 = vunpack.c.l.b16 %v2010_v9  ;;  %3962 = vmatpush.bf16.msra.mxu1 %v5953_v53 }
 0x1d0   :  { %7353 = vst [vmem:[#allocation54_spill] sm:$0xff] %v6753_v8  ;;  %v1777_v27 = vmax.f32 %v1504_v10, 0.0  ;;  %v1790_v16 = vmax.f32 %v1359_v34, 0.0  ;;  %v5952_v8 = vld [vmem:[#allocation8 + $0x58] sm:$0xff] }
 0x1d1   :  { %7354 = vst [vmem:[#allocation55_spill] sm:$0xff] %v6755_v4  ;;  %v1791_v26 = vmax.f32 %v1408_v52, 0.0  ;;  %v2671_v4 = vunpack.c.h.b16 %v2010_v9 }
 0x1d2   :  { %v2011_v44 = vpack.c.bf16 %v1777_v27, %v1776_v6 }
 0x1d3   :  { %v2018_v48 = vpack.c.bf16 %v1791_v26, %v1790_v16  ;;  %3963 = vmatpush.bf16.msra.mxu1 %v5952_v8 }
 0x1d4   :  { %2139 = vst [vmem:[#allocation11 + $0xa8] sm:$0xff] %v2011_v44  ;;  %v1456_v37 = vpop.f32.mrf.mxu2  ;;  %v2672_v53 = vunpack.c.l.b16 %v2011_v44 }
 0x1d5   :  { %2146 = vst [vmem:[#allocation11 + $0xe0] sm:$0xff] %v2018_v48  ;;  %v1457_v31 = vadd.f32 %v1456_v37, %v6726_v25  ;;  %v1505_v41 = vpop.f32.mrf.mxu3  ;;  %v1361_v19 = vpop.f32.mrf.mxu0  ;;  %v2686_v5 = vunpack.c.l.b16 %v2018_v48  ;;  %v2687_v22 = vunpack.c.h.b16 %v2018_v48 }
 0x1d6   :  { %v1506_v24 = vadd.f32 %v1505_v41, %v6730_v42  ;;  %v1362_v7 = vadd.f32 %v1361_v19, %v6709_v57  ;;  %v1410_v60 = vpop.f32.mrf.mxu1 }
 0x1d7   :  { %v1792_v10 = vmax.f32 %v1457_v31, 0.0  ;;  %v1411_v34 = vadd.f32 %v1410_v60, %v6712_v51  ;;  %v6764_v6 = vpack.c.b16 %v2686_v5, %v2670_v20  ;;  %v6766_v52 = vpack.c.b16 %v2687_v22, %v2671_v4  ;;  %v5960_v22 = vld [vmem:[#allocation8 + $0x98] sm:$0xff] }
 0x1d8   :  { %v1793_v27 = vmax.f32 %v1506_v24, 0.0  ;;  %v1806_v16 = vmax.f32 %v1362_v7, 0.0  ;;  %1556 = vmatmul.bf16.gmra.mxu0 %v6582_v38  ;;  %1605 = vmatmul.bf16.gmra.mxu1 %v6582_v38  ;;  %v2673_v31 = vunpack.c.h.b16 %v2011_v44  ;;  %v5944_v24 = vld [vmem:[#allocation8 + $0x18] sm:$0xff] }
 0x1d9   :  { %7355 = vst [vmem:[#allocation56_spill] sm:$0xff] %v6764_v6  ;;  %v1807_v26 = vmax.f32 %v1411_v34, 0.0  ;;  %1654 = vmatmul.bf16.gmra.mxu2 %v6582_v38  ;;  %v5968_v7 = vld [vmem:[#allocation8 + $0xd8] sm:$0xff]  ;;  %3914 = vmatpush.bf16.msra.mxu0 %v5944_v24 }
 0x1da   :  { %7356 = vst [vmem:[#allocation57_spill] sm:$0xff] %v6766_v52  ;;  %v2019_v48 = vpack.c.bf16 %v1793_v27, %v1792_v10  ;;  %1703 = vmatmul.bf16.gmra.mxu3 %v6582_v38  ;;  %4012 = vmatpush.bf16.msra.mxu2 %v5960_v22 }
 0x1db   :  { %v2026_v9 = vpack.c.bf16 %v1807_v26, %v1806_v16  ;;  %4061 = vmatpush.bf16.msra.mxu3 %v5968_v7 }
 0x1dc   :  { %2147 = vst [vmem:[#allocation11 + $0xe8] sm:$0xff] %v2019_v48  ;;  %v1459_v37 = vpop.f32.mrf.mxu2  ;;  %v2688_v20 = vunpack.c.l.b16 %v2019_v48  ;;  %v2689_v4 = vunpack.c.h.b16 %v2019_v48 }
 0x1dd   :  { %2154 = vst [vmem:[#allocation11 + $0x120] sm:$0xff] %v2026_v9  ;;  %v1460_v41 = vadd.f32 %v1459_v37, %v6726_v25  ;;  %v1508_v19 = vpop.f32.mrf.mxu3  ;;  %v1363_v5 = vpop.f32.mrf.mxu0 }
 0x1de   :  { %v1509_v60 = vadd.f32 %v1508_v19, %v6730_v42  ;;  %v1364_v10 = vadd.f32 %v1363_v5, %v6709_v57  ;;  %v1412_v38 = vpop.f32.mrf.mxu1  ;;  %v6775_v34 = vpack.c.b16 %v2688_v20, %v2672_v53  ;;  %v6777_v27 = vpack.c.b16 %v2689_v4, %v2673_v31 }
 0x1df   :  { %v1808_v16 = vmax.f32 %v1460_v41, 0.0  ;;  %v1413_v44 = vadd.f32 %v1412_v38, %v6712_v51  ;;  %v2702_v5 = vunpack.c.l.b16 %v2026_v9  ;;  %v2703_v41 = vunpack.c.h.b16 %v2026_v9 }
 0x1e0   :  { %7357 = vst [vmem:[#allocation58_spill] sm:$0xff] %v6777_v27  ;;  %v1809_v26 = vmax.f32 %v1509_v60, 0.0  ;;  %v1822_v48 = vmax.f32 %v1364_v10, 0.0  ;;  %v5951_v27 = vld [vmem:[#allocation8 + $0x50] sm:$0xff] }
 0x1e1   :  { %v1823_v37 = vmax.f32 %v1413_v44, 0.0  ;;  %3964 = vmatpush.bf16.msra.mxu1 %v5951_v27 }
 0x1e2   :  { %v2027_v52 = vpack.c.bf16 %v1809_v26, %v1808_v16 }
 0x1e3   :  { %v2034_v6 = vpack.c.bf16 %v1823_v37, %v1822_v48 }
 0x1e4   :  { %2155 = vst [vmem:[#allocation11 + $0x128] sm:$0xff] %v2027_v52  ;;  %v1461_v19 = vpop.f32.mrf.mxu2 }
 0x1e5   :  { %2162 = vst [vmem:[#allocation11 + $0x160] sm:$0xff] %v2034_v6  ;;  %v1462_v53 = vadd.f32 %v1461_v19, %v6726_v25  ;;  %v1510_v20 = vpop.f32.mrf.mxu3  ;;  %v1366_v31 = vpop.f32.mrf.mxu0  ;;  %v2718_v4 = vunpack.c.l.b16 %v2034_v6  ;;  %v2719_v38 = vunpack.c.h.b16 %v2034_v6  ;;  %v2704_v19 = vunpack.c.l.b16 %v2027_v52 }
 0x1e6   :  { %v1511_v22 = vadd.f32 %v1510_v20, %v6730_v42  ;;  %v1367_v24 = vadd.f32 %v1366_v31, %v6709_v57  ;;  %v1415_v7 = vpop.f32.mrf.mxu1 }
 0x1e7   :  { %v1824_v60 = vmax.f32 %v1462_v53, 0.0  ;;  %v1416_v10 = vadd.f32 %v1415_v7, %v6712_v51  ;;  %v6784_v16 = vpack.c.b16 %v2718_v4, %v2702_v5  ;;  %v6786_v44 = vpack.c.b16 %v2719_v38, %v2703_v41  ;;  %v5959_v38 = vld [vmem:[#allocation8 + $0x90] sm:$0xff] }
 0x1e8   :  { %v1825_v26 = vmax.f32 %v1511_v22, 0.0  ;;  %v1838_v48 = vmax.f32 %v1367_v24, 0.0  ;;  %1561 = vmatmul.bf16.gmra.mxu0 %v6604_v59  ;;  %1610 = vmatmul.bf16.gmra.mxu1 %v6604_v59  ;;  %v2705_v53 = vunpack.c.h.b16 %v2027_v52  ;;  %v5943_v22 = vld [vmem:[#allocation8 + $0x10] sm:$0xff] }
 0x1e9   :  { %7358 = vst [vmem:[#allocation59_spill] sm:$0xff] %v6784_v16  ;;  %v1839_v37 = vmax.f32 %v1416_v10, 0.0  ;;  %1659 = vmatmul.bf16.gmra.mxu2 %v6604_v59  ;;  %v5967_v24 = vld [vmem:[#allocation8 + $0xd0] sm:$0xff]  ;;  %3915 = vmatpush.bf16.msra.mxu0 %v5943_v22 }
 0x1ea   :  { %7359 = vst [vmem:[#allocation60_spill] sm:$0xff] %v6786_v44  ;;  %v2035_v6 = vpack.c.bf16 %v1825_v26, %v1824_v60  ;;  %1708 = vmatmul.bf16.gmra.mxu3 %v6604_v59  ;;  %4013 = vmatpush.bf16.msra.mxu2 %v5959_v38 }
 0x1eb   :  { %v2042_v8 = vpack.c.bf16 %v1839_v37, %v1838_v48  ;;  %4062 = vmatpush.bf16.msra.mxu3 %v5967_v24 }
 0x1ec   :  { %2163 = vst [vmem:[#allocation11 + $0x168] sm:$0xff] %v2035_v6  ;;  %v1464_v9 = vpop.f32.mrf.mxu2  ;;  %v2720_v5 = vunpack.c.l.b16 %v2035_v6  ;;  %v2721_v20 = vunpack.c.h.b16 %v2035_v6 }
 0x1ed   :  { %2170 = vst [vmem:[#allocation11 + $0x1a0] sm:$0xff] %v2042_v8  ;;  %v1465_v31 = vadd.f32 %v1464_v9, %v6726_v25  ;;  %v1513_v4 = vpop.f32.mrf.mxu3  ;;  %v1368_v41 = vpop.f32.mrf.mxu0 }
 0x1ee   :  { %v1514_v7 = vadd.f32 %v1513_v4, %v6730_v42  ;;  %v1369_v60 = vadd.f32 %v1368_v41, %v6709_v57  ;;  %v1417_v59 = vpop.f32.mrf.mxu1  ;;  %v6795_v10 = vpack.c.b16 %v2720_v5, %v2704_v19  ;;  %v6797_v26 = vpack.c.b16 %v2721_v20, %v2705_v53 }
 0x1ef   :  { %v1840_v48 = vmax.f32 %v1465_v31, 0.0  ;;  %v1418_v52 = vadd.f32 %v1417_v59, %v6712_v51  ;;  %v2734_v41 = vunpack.c.l.b16 %v2042_v8  ;;  %v2735_v31 = vunpack.c.h.b16 %v2042_v8 }
 0x1f0   :  { %7360 = vst [vmem:[#allocation61_spill] sm:$0xff] %v6797_v26  ;;  %v1841_v37 = vmax.f32 %v1514_v7, 0.0  ;;  %v1854_v6 = vmax.f32 %v1369_v60, 0.0  ;;  %v5950_v26 = vld [vmem:[#allocation8 + $0x48] sm:$0xff] }
 0x1f1   :  { %v1855_v9 = vmax.f32 %v1418_v52, 0.0  ;;  %3965 = vmatpush.bf16.msra.mxu1 %v5950_v26 }
 0x1f2   :  { %v2043_v44 = vpack.c.bf16 %v1841_v37, %v1840_v48 }
 0x1f3   :  { %v2050_v16 = vpack.c.bf16 %v1855_v9, %v1854_v6 }
 0x1f4   :  { %2171 = vst [vmem:[#allocation11 + $0x1a8] sm:$0xff] %v2043_v44  ;;  %v1466_v4 = vpop.f32.mrf.mxu2 }
 0x1f5   :  { %2178 = vst [vmem:[#allocation11 + $0x1e0] sm:$0xff] %v2050_v16  ;;  %v1467_v19 = vadd.f32 %v1466_v4, %v6726_v25  ;;  %v1515_v5 = vpop.f32.mrf.mxu3  ;;  %v1371_v53 = vpop.f32.mrf.mxu0  ;;  %v2750_v20 = vunpack.c.l.b16 %v2050_v16  ;;  %v2751_v59 = vunpack.c.h.b16 %v2050_v16  ;;  %v2736_v4 = vunpack.c.l.b16 %v2043_v44 }
 0x1f6   :  { %v1516_v38 = vadd.f32 %v1515_v5, %v6730_v42  ;;  %v1372_v22 = vadd.f32 %v1371_v53, %v6709_v57  ;;  %v1420_v24 = vpop.f32.mrf.mxu1 }
 0x1f7   :  { %v1856_v7 = vmax.f32 %v1467_v19, 0.0  ;;  %v1421_v60 = vadd.f32 %v1420_v24, %v6712_v51  ;;  %v6804_v48 = vpack.c.b16 %v2750_v20, %v2734_v41  ;;  %v6806_v52 = vpack.c.b16 %v2751_v59, %v2735_v31  ;;  %v5958_v59 = vld [vmem:[#allocation8 + $0x88] sm:$0xff] }
 0x1f8   :  { %v1857_v37 = vmax.f32 %v1516_v38, 0.0  ;;  %v1870_v6 = vmax.f32 %v1372_v22, 0.0  ;;  %1566 = vmatmul.bf16.gmra.mxu0 %v6626_v35  ;;  %1615 = vmatmul.bf16.gmra.mxu1 %v6626_v35  ;;  %v2737_v19 = vunpack.c.h.b16 %v2043_v44  ;;  %v5942_v38 = vld [vmem:[#allocation8 + $0x8] sm:$0xff] }
 0x1f9   :  { %7361 = vst [vmem:[#allocation62_spill] sm:$0xff] %v6804_v48  ;;  %v1871_v9 = vmax.f32 %v1421_v60, 0.0  ;;  %1664 = vmatmul.bf16.gmra.mxu2 %v6626_v35  ;;  %v5966_v22 = vld [vmem:[#allocation8 + $0xc8] sm:$0xff]  ;;  %3916 = vmatpush.bf16.msra.mxu0 %v5942_v38 }
 0x1fa   :  { %7362 = vst [vmem:[#allocation63_spill] sm:$0xff] %v6806_v52  ;;  %v2051_v16 = vpack.c.bf16 %v1857_v37, %v1856_v7  ;;  %1713 = vmatmul.bf16.gmra.mxu3 %v6626_v35  ;;  %4014 = vmatpush.bf16.msra.mxu2 %v5958_v59 }
 0x1fb   :  { %v2058_v27 = vpack.c.bf16 %v1871_v9, %v1870_v6  ;;  %4063 = vmatpush.bf16.msra.mxu3 %v5966_v22 }
 0x1fc   :  { %2179 = vst [vmem:[#allocation11 + $0x1e8] sm:$0xff] %v2051_v16  ;;  %v1469_v8 = vpop.f32.mrf.mxu2  ;;  %v2752_v41 = vunpack.c.l.b16 %v2051_v16  ;;  %v2753_v5 = vunpack.c.h.b16 %v2051_v16 }
 0x1fd   :  { %2186 = vst [vmem:[#allocation11 + $0x220] sm:$0xff] %v2058_v27  ;;  %v1470_v53 = vadd.f32 %v1469_v8, %v6726_v25  ;;  %v1518_v20 = vpop.f32.mrf.mxu3  ;;  %v1373_v31 = vpop.f32.mrf.mxu0 }
 0x1fe   :  { %v1519_v24 = vadd.f32 %v1518_v20, %v6730_v42  ;;  %v1374_v7 = vadd.f32 %v1373_v31, %v6709_v57  ;;  %v1422_v35 = vpop.f32.mrf.mxu1  ;;  %v6815_v60 = vpack.c.b16 %v2752_v41, %v2736_v4  ;;  %v6817_v37 = vpack.c.b16 %v2753_v5, %v2737_v19 }
 0x1ff   :  { %v1872_v6 = vmax.f32 %v1470_v53, 0.0  ;;  %v1423_v44 = vadd.f32 %v1422_v35, %v6712_v51  ;;  %v2766_v31 = vunpack.c.l.b16 %v2058_v27  ;;  %v2767_v53 = vunpack.c.h.b16 %v2058_v27 }
 0x200   :  { %7363 = vst [vmem:[#allocation64_spill] sm:$0xff] %v6817_v37  ;;  %v1873_v9 = vmax.f32 %v1519_v24, 0.0  ;;  %v1886_v16 = vmax.f32 %v1374_v7, 0.0  ;;  %v5949_v37 = vld [vmem:[#allocation8 + $0x40] sm:$0xff] }
 0x201   :  { %v1887_v8 = vmax.f32 %v1423_v44, 0.0  ;;  %3966 = vmatpush.bf16.msra.mxu1 %v5949_v37 }
 0x202   :  { %v2059_v52 = vpack.c.bf16 %v1873_v9, %v1872_v6 }
 0x203   :  { %v2066_v48 = vpack.c.bf16 %v1887_v8, %v1886_v16 }
 0x204   :  { %2187 = vst [vmem:[#allocation11 + $0x228] sm:$0xff] %v2059_v52  ;;  %v1471_v20 = vpop.f32.mrf.mxu2 }
 0x205   :  { %2194 = vst [vmem:[#allocation11 + $0x260] sm:$0xff] %v2066_v48  ;;  %v1472_v4 = vadd.f32 %v1471_v20, %v6726_v25  ;;  %v1520_v41 = vpop.f32.mrf.mxu3  ;;  %v1376_v19 = vpop.f32.mrf.mxu0  ;;  %v2782_v5 = vunpack.c.l.b16 %v2066_v48  ;;  %v2783_v35 = vunpack.c.h.b16 %v2066_v48  ;;  %v2768_v20 = vunpack.c.l.b16 %v2059_v52 }
 0x206   :  { %v1521_v59 = vadd.f32 %v1520_v41, %v6730_v42  ;;  %v1377_v38 = vadd.f32 %v1376_v19, %v6709_v57  ;;  %v1425_v22 = vpop.f32.mrf.mxu1 }
 0x207   :  { %v1888_v24 = vmax.f32 %v1472_v4, 0.0  ;;  %v1426_v7 = vadd.f32 %v1425_v22, %v6712_v51  ;;  %v6824_v6 = vpack.c.b16 %v2782_v5, %v2766_v31  ;;  %v6826_v44 = vpack.c.b16 %v2783_v35, %v2767_v53  ;;  %v5957_v35 = vld [vmem:[#allocation8 + $0x80] sm:$0xff] }
 0x208   :  { %v1889_v9 = vmax.f32 %v1521_v59, 0.0  ;;  %v1902_v16 = vmax.f32 %v1377_v38, 0.0  ;;  %1571 = vmatmul.bf16.gmra.mxu0 %v6648_v63  ;;  %1620 = vmatmul.bf16.gmra.mxu1 %v6648_v63  ;;  %v2769_v4 = vunpack.c.h.b16 %v2059_v52  ;;  %v5941_v59 = vld [vmem:[#allocation8] sm:$0xff] }
 0x209   :  { %7364 = vst [vmem:[#allocation65_spill] sm:$0xff] %v6824_v6  ;;  %v1903_v8 = vmax.f32 %v1426_v7, 0.0  ;;  %1669 = vmatmul.bf16.gmra.mxu2 %v6648_v63  ;;  %v5965_v38 = vld [vmem:[#allocation8 + $0xc0] sm:$0xff]  ;;  %3917 = vmatpush.bf16.msra.mxu0 %v5941_v59 }
 0x20a   :  { %7365 = vst [vmem:[#allocation66_spill] sm:$0xff] %v6826_v44  ;;  %v2067_v48 = vpack.c.bf16 %v1889_v9, %v1888_v24  ;;  %1718 = vmatmul.bf16.gmra.mxu3 %v6648_v63  ;;  %4015 = vmatpush.bf16.msra.mxu2 %v5957_v35 }
 0x20b   :  { %v2074_v26 = vpack.c.bf16 %v1903_v8, %v1902_v16  ;;  %4064 = vmatpush.bf16.msra.mxu3 %v5965_v38 }
 0x20c   :  { %2195 = vst [vmem:[#allocation11 + $0x268] sm:$0xff] %v2067_v48  ;;  %v1474_v27 = vpop.f32.mrf.mxu2  ;;  %v2784_v31 = vunpack.c.l.b16 %v2067_v48  ;;  %v2785_v41 = vunpack.c.h.b16 %v2067_v48 }
 0x20d   :  { %2202 = vst [vmem:[#allocation11 + $0x2a0] sm:$0xff] %v2074_v26  ;;  %v1475_v19 = vadd.f32 %v1474_v27, %v6726_v25  ;;  %v1523_v5 = vpop.f32.mrf.mxu3  ;;  %v1378_v53 = vpop.f32.mrf.mxu0 }
 0x20e   :  { %v1524_v22 = vadd.f32 %v1523_v5, %v6730_v42  ;;  %v1379_v24 = vadd.f32 %v1378_v53, %v6709_v57  ;;  %v1427_v63 = vpop.f32.mrf.mxu1  ;;  %v6835_v7 = vpack.c.b16 %v2784_v31, %v2768_v20  ;;  %v6837_v9 = vpack.c.b16 %v2785_v41, %v2769_v4 }
 0x20f   :  { %v1904_v16 = vmax.f32 %v1475_v19, 0.0  ;;  %v1428_v52 = vadd.f32 %v1427_v63, %v6712_v51  ;;  %v2798_v53 = vunpack.c.l.b16 %v2074_v26  ;;  %v2799_v19 = vunpack.c.h.b16 %v2074_v26 }
 0x210   :  { %7366 = vst [vmem:[#allocation67_spill] sm:$0xff] %v6837_v9  ;;  %v1905_v8 = vmax.f32 %v1524_v22, 0.0  ;;  %v1918_v48 = vmax.f32 %v1379_v24, 0.0  ;;  %v5988_v9 = vld [vmem:[#allocation8 + $0x178] sm:$0xff] }
 0x211   :  { %v1919_v27 = vmax.f32 %v1428_v52, 0.0  ;;  %4155 = vmatpush.bf16.msrb.mxu1 %v5988_v9 }
 0x212   :  { %v2075_v44 = vpack.c.bf16 %v1905_v8, %v1904_v16 }
 0x213   :  { %v2082_v6 = vpack.c.bf16 %v1919_v27, %v1918_v48 }
 0x214   :  { %2203 = vst [vmem:[#allocation11 + $0x2a8] sm:$0xff] %v2075_v44  ;;  %v1476_v5 = vpop.f32.mrf.mxu2 }
 0x215   :  { %2210 = vst [vmem:[#allocation11 + $0x2e0] sm:$0xff] %v2082_v6  ;;  %v1477_v20 = vadd.f32 %v1476_v5, %v6726_v25  ;;  %v1525_v31 = vpop.f32.mrf.mxu3  ;;  %v1381_v4 = vpop.f32.mrf.mxu0  ;;  %v2814_v41 = vunpack.c.l.b16 %v2082_v6  ;;  %v2815_v63 = vunpack.c.h.b16 %v2082_v6  ;;  %v2800_v5 = vunpack.c.l.b16 %v2075_v44 }
 0x216   :  { %v1526_v35 = vadd.f32 %v1525_v31, %v6730_v42  ;;  %v1382_v59 = vadd.f32 %v1381_v4, %v6709_v57  ;;  %v1430_v38 = vpop.f32.mrf.mxu1 }
 0x217   :  { %v1920_v22 = vmax.f32 %v1477_v20, 0.0  ;;  %v1431_v24 = vadd.f32 %v1430_v38, %v6712_v51  ;;  %v6844_v16 = vpack.c.b16 %v2814_v41, %v2798_v53  ;;  %v6846_v52 = vpack.c.b16 %v2815_v63, %v2799_v19  ;;  %v5996_v63 = vld [vmem:[#allocation8 + $0x1b8] sm:$0xff] }
 0x218   :  { %v1921_v8 = vmax.f32 %v1526_v35, 0.0  ;;  %v1934_v48 = vmax.f32 %v1382_v59, 0.0  ;;  %1576 = vmatmul.bf16.gmra.mxu0 %v6670_v23  ;;  %1625 = vmatmul.bf16.gmra.mxu1 %v6670_v23  ;;  %v2801_v20 = vunpack.c.h.b16 %v2075_v44  ;;  %v5980_v35 = vld [vmem:[#allocation8 + $0x138] sm:$0xff] }
 0x219   :  { %7367 = vst [vmem:[#allocation68_spill] sm:$0xff] %v6844_v16  ;;  %v1935_v27 = vmax.f32 %v1431_v24, 0.0  ;;  %1674 = vmatmul.bf16.gmra.mxu2 %v6670_v23  ;;  %v6004_v59 = vld [vmem:[#allocation8 + $0x1f8] sm:$0xff]  ;;  %4106 = vmatpush.bf16.msrb.mxu0 %v5980_v35 }
 0x21a   :  { %7368 = vst [vmem:[#allocation69_spill] sm:$0xff] %v6846_v52  ;;  %v2083_v6 = vpack.c.bf16 %v1921_v8, %v1920_v22  ;;  %1723 = vmatmul.bf16.gmra.mxu3 %v6670_v23  ;;  %4204 = vmatpush.bf16.msrb.mxu2 %v5996_v63 }
 0x21b   :  { %v2090_v37 = vpack.c.bf16 %v1935_v27, %v1934_v48  ;;  %4253 = vmatpush.bf16.msrb.mxu3 %v6004_v59 }
 0x21c   :  { %2211 = vst [vmem:[#allocation11 + $0x2e8] sm:$0xff] %v2083_v6  ;;  %v1479_v26 = vpop.f32.mrf.mxu2  ;;  %v2816_v53 = vunpack.c.l.b16 %v2083_v6  ;;  %v2817_v31 = vunpack.c.h.b16 %v2083_v6 }
 0x21d   :  { %2218 = vst [vmem:[#allocation11 + $0x320] sm:$0xff] %v2090_v37  ;;  %v1480_v4 = vadd.f32 %v1479_v26, %v6726_v25  ;;  %v1528_v41 = vpop.f32.mrf.mxu3  ;;  %v1383_v19 = vpop.f32.mrf.mxu0 }
 0x21e   :  { %v1529_v38 = vadd.f32 %v1528_v41, %v6730_v42  ;;  %v1384_v22 = vadd.f32 %v1383_v19, %v6709_v57  ;;  %v1432_v23 = vpop.f32.mrf.mxu1  ;;  %v6855_v24 = vpack.c.b16 %v2816_v53, %v2800_v5  ;;  %v6857_v8 = vpack.c.b16 %v2817_v31, %v2801_v20 }
 0x21f   :  { %v1936_v48 = vmax.f32 %v1480_v4, 0.0  ;;  %v1433_v44 = vadd.f32 %v1432_v23, %v6712_v51  ;;  %v2830_v19 = vunpack.c.l.b16 %v2090_v37  ;;  %v2831_v4 = vunpack.c.h.b16 %v2090_v37 }
 0x220   :  { %v1937_v27 = vmax.f32 %v1529_v38, 0.0  ;;  %v1950_v6 = vmax.f32 %v1384_v22, 0.0 }
 0x221   :  { %v1951_v26 = vmax.f32 %v1433_v44, 0.0 }
 0x222   :  { %v2091_v52 = vpack.c.bf16 %v1937_v27, %v1936_v48 }
 0x223   :  { %v2098_v16 = vpack.c.bf16 %v1951_v26, %v1950_v6 }
 0x224   :  { %2219 = vst [vmem:[#allocation11 + $0x328] sm:$0xff] %v2091_v52  ;;  %v1481_v41 = vpop.f32.mrf.mxu2 }
 0x225   :  { %2226 = vst [vmem:[#allocation11 + $0x360] sm:$0xff] %v2098_v16  ;;  %v1482_v5 = vadd.f32 %v1481_v41, %v6726_v25  ;;  %v1530_v53 = vpop.f32.mrf.mxu3  ;;  %v1386_v20 = vpop.f32.mrf.mxu0  ;;  %v2846_v31 = vunpack.c.l.b16 %v2098_v16  ;;  %v2847_v23 = vunpack.c.h.b16 %v2098_v16  ;;  %v2832_v41 = vunpack.c.l.b16 %v2091_v52 }
 0x226   :  { %v1531_v63 = vadd.f32 %v1530_v53, %v6730_v42  ;;  %v1387_v35 = vadd.f32 %v1386_v20, %v6709_v57  ;;  %v1435_v59 = vpop.f32.mrf.mxu1 }
 0x227   :  { %v1952_v38 = vmax.f32 %v1482_v5, 0.0  ;;  %v1436_v22 = vadd.f32 %v1435_v59, %v6712_v51  ;;  %v6864_v48 = vpack.c.b16 %v2846_v31, %v2830_v19  ;;  %v6866_v44 = vpack.c.b16 %v2847_v23, %v2831_v4  ;;  %v5995_v59 = vld [vmem:[#allocation8 + $0x1b0] sm:$0xff] }
 0x228   :  { %v1953_v27 = vmax.f32 %v1531_v63, 0.0  ;;  %v1966_v6 = vmax.f32 %v1387_v35, 0.0  ;;  %1581 = vmatmul.bf16.gmra.mxu0 %v6692_v12  ;;  %1630 = vmatmul.bf16.gmra.mxu1 %v6692_v12  ;;  %v2833_v5 = vunpack.c.h.b16 %v2091_v52 }
 0x229   :  { %7369 = vst [vmem:[#allocation70_spill] sm:$0xff] %v6866_v44  ;;  %v1967_v26 = vmax.f32 %v1436_v22, 0.0  ;;  %1679 = vmatmul.bf16.gmra.mxu2 %v6692_v12  ;;  %v6884_v44 = vperm.slane %v6706_v45, 5 }
 0x22a   :  { %v2099_v16 = vpack.c.bf16 %v1953_v27, %v1952_v38  ;;  %1728 = vmatmul.bf16.gmra.mxu3 %v6692_v12  ;;  %v5979_v38 = vld [vmem:[#allocation8 + $0x130] sm:$0xff]  ;;  %4205 = vmatpush.bf16.msrb.mxu2 %v5995_v59 }
 0x22b   :  { %v2106_v9 = vpack.c.bf16 %v1967_v26, %v1966_v6  ;;  %v6003_v12 = vld [vmem:[#allocation8 + $0x1f0] sm:$0xff]  ;;  %4107 = vmatpush.bf16.msrb.mxu0 %v5979_v38 }
 0x22c   :  { %2227 = vst [vmem:[#allocation11 + $0x368] sm:$0xff] %v2099_v16  ;;  %v1484_v37 = vpop.f32.mrf.mxu2  ;;  %v2848_v19 = vunpack.c.l.b16 %v2099_v16  ;;  %v2849_v53 = vunpack.c.h.b16 %v2099_v16  ;;  %4254 = vmatpush.bf16.msrb.mxu3 %v6003_v12 }
 0x22d   :  { %2234 = vst [vmem:[#allocation11 + $0x3a0] sm:$0xff] %v2106_v9  ;;  %v1485_v20 = vadd.f32 %v1484_v37, %v6726_v25  ;;  %v1533_v31 = vpop.f32.mrf.mxu3  ;;  %v1388_v4 = vpop.f32.mrf.mxu0 }
 0x22e   :  { %v1534_v23 = vadd.f32 %v1533_v31, %v6730_v42  ;;  %v1389_v63 = vadd.f32 %v1388_v4, %v6709_v57  ;;  %v1437_v35 = vpop.f32.mrf.mxu1  ;;  %v6875_v22 = vpack.c.b16 %v2848_v19, %v2832_v41  ;;  %v6877_v27 = vpack.c.b16 %v2849_v53, %v2833_v5  ;;  %v5987_v19 = vld [vmem:[#allocation8 + $0x170] sm:$0xff] }
 0x22f   :  { %v1968_v6 = vmax.f32 %v1485_v20, 0.0  ;;  %v1438_v52 = vadd.f32 %v1437_v35, %v6712_v51  ;;  %v6881_v57 = vperm.slane %v6706_v45, 4  ;;  %v2862_v5 = vunpack.c.l.b16 %v2106_v9  ;;  %4156 = vmatpush.bf16.msrb.mxu1 %v5987_v19 }
 0x230   :  { %v1969_v26 = vmax.f32 %v1534_v23, 0.0  ;;  %v1982_v16 = vmax.f32 %v1389_v63, 0.0  ;;  %v2863_v63 = vunpack.c.h.b16 %v2106_v9 }
 0x231   :  { %v1983_v37 = vmax.f32 %v1438_v52, 0.0 }
 0x232   :  { %v2107_v31 = vpack.c.bf16 %v1969_v26, %v1968_v6 }
 0x233   :  { %v2114_v4 = vpack.c.bf16 %v1983_v37, %v1982_v16 }
 0x234   :  { %2235 = vst [vmem:[#allocation11 + $0x3a8] sm:$0xff] %v2107_v31  ;;  %v1486_v41 = vpop.f32.mrf.mxu2 }
 0x235   :  { %2242 = vst [vmem:[#allocation11 + $0x3e0] sm:$0xff] %v2114_v4  ;;  %v1487_v51 = vadd.f32 %v1486_v41, %v6726_v25  ;;  %v1535_v53 = vpop.f32.mrf.mxu3  ;;  %v1547_v20 = vpop.f32.mrf.mxu0  ;;  %v2878_v23 = vunpack.c.l.b16 %v2114_v4  ;;  %v2879_v35 = vunpack.c.h.b16 %v2114_v4  ;;  %v6902_v4 = vperm.slane %v6706_v45, 7 }
 0x236   :  { %v1536_v59 = vadd.f32 %v1535_v53, %v6730_v42  ;;  %v1548_v38 = vadd.f32 %v1547_v20, %v6881_v57  ;;  %v1596_v12 = vpop.f32.mrf.mxu1  ;;  %v6898_v42 = vperm.slane %v6706_v45, 6 }
 0x237   :  { %v1984_v6 = vmax.f32 %v1487_v51, 0.0  ;;  %v1597_v52 = vadd.f32 %v1596_v12, %v6884_v44  ;;  %v6890_v26 = vpack.c.b16 %v2878_v23, %v2862_v5  ;;  %v6892_v16 = vpack.c.b16 %v2879_v35, %v2863_v63  ;;  %v5994_v63 = vld [vmem:[#allocation8 + $0x1a8] sm:$0xff] }
 0x238   :  { %v1985_v37 = vmax.f32 %v1536_v59, 0.0  ;;  %v1746_v25 = vmax.f32 %v1548_v38, 0.0  ;;  %3918 = vmatmul.bf16.vlgmr.msra.gmra.mxu0 %v6378_v28  ;;  %3967 = vmatmul.bf16.vlgmr.msra.gmra.mxu1 %v6380_v29  ;;  %v2864_v51 = vunpack.c.l.b16 %v2107_v31  ;;  %v2865_v28 = vunpack.c.h.b16 %v2107_v31  ;;  %v5978_v35 = vld [vmem:[#allocation8 + $0x128] sm:$0xff] }
 0x239   :  { %7370 = vst [vmem:[#allocation71_spill] sm:$0xff] %v6890_v26  ;;  %v1747_v41 = vmax.f32 %v1597_v52, 0.0  ;;  %4016 = vmatmul.bf16.vlgmr.msra.gmra.mxu2 %v6388_v54  ;;  %v6002_v59 = vld [vmem:[#allocation8 + $0x1e8] sm:$0xff]  ;;  %4108 = vmatpush.bf16.msrb.mxu0 %v5978_v35 }
 0x23a   :  { %7371 = vst [vmem:[#allocation72_spill] sm:$0xff] %v6892_v16  ;;  %v2115_v9 = vpack.c.bf16 %v1985_v37, %v1984_v6  ;;  %4065 = vmatmul.bf16.vlgmr.msra.gmra.mxu3 %v6390_v55  ;;  %4206 = vmatpush.bf16.msrb.mxu2 %v5994_v63 }
 0x23b   :  { %v1996_v19 = vpack.c.bf16 %v1747_v41, %v1746_v25  ;;  %4255 = vmatpush.bf16.msrb.mxu3 %v6002_v59 }
 0x23c   :  { %2243 = vst [vmem:[#allocation11 + $0x3e8] sm:$0xff] %v2115_v9  ;;  %v1645_v5 = vpop.f32.mrf.mxu2  ;;  %v2880_v53 = vunpack.c.l.b16 %v2115_v9  ;;  %v2881_v20 = vunpack.c.h.b16 %v2115_v9 }
 0x23d   :  { %2124 = vst [vmem:[#allocation11 + $0x30] sm:$0xff] %v1996_v19  ;;  %v1646_v29 = vadd.f32 %v1645_v5, %v6898_v42  ;;  %v1694_v54 = vpop.f32.mrf.mxu3  ;;  %v1549_v23 = vpop.f32.mrf.mxu0  ;;  %v2642_v16 = vunpack.c.l.b16 %v1996_v19  ;;  %v2643_v26 = vunpack.c.h.b16 %v1996_v19 }
 0x23e   :  { %v1695_v55 = vadd.f32 %v1694_v54, %v6902_v4  ;;  %v1550_v45 = vadd.f32 %v1549_v23, %v6881_v57  ;;  %v1598_v38 = vpop.f32.mrf.mxu1  ;;  %v6907_v12 = vpack.c.b16 %v2880_v53, %v2864_v51  ;;  %v6909_v6 = vpack.c.b16 %v2881_v20, %v2865_v28  ;;  %v5986_v23 = vld [vmem:[#allocation8 + $0x168] sm:$0xff] }
 0x23f   :  { %v1748_v52 = vmax.f32 %v1646_v29, 0.0  ;;  %v1599_v31 = vadd.f32 %v1598_v38, %v6884_v44  ;;  %4157 = vmatpush.bf16.msrb.mxu1 %v5986_v23 }
 0x240   :  { %v1749_v37 = vmax.f32 %v1695_v55, 0.0  ;;  %v1762_v25 = vmax.f32 %v1550_v45, 0.0 }
 0x241   :  { %v1763_v41 = vmax.f32 %v1599_v31, 0.0 }
 0x242   :  { %v1997_v9 = vpack.c.bf16 %v1749_v37, %v1748_v52 }
 0x243   :  { %v2004_v5 = vpack.c.bf16 %v1763_v41, %v1762_v25 }
 0x244   :  { %2125 = vst [vmem:[#allocation11 + $0x38] sm:$0xff] %v1997_v9  ;;  %v1647_v54 = vpop.f32.mrf.mxu2 }
 0x245   :  { %2132 = vst [vmem:[#allocation11 + $0x70] sm:$0xff] %v2004_v5  ;;  %v2658_v51 = vunpack.c.l.b16 %v2004_v5  ;;  %v2659_v53 = vunpack.c.h.b16 %v2004_v5  ;;  %v1648_v28 = vadd.f32 %v1647_v54, %v6898_v42  ;;  %v1696_v20 = vpop.f32.mrf.mxu3  ;;  %v1552_v29 = vpop.f32.mrf.mxu0  ;;  %v2645_v5 = vunpack.c.h.b16 %v1997_v9 }
 0x246   :  { %v1697_v63 = vadd.f32 %v1696_v20, %v6902_v4  ;;  %v1553_v35 = vadd.f32 %v1552_v29, %v6881_v57  ;;  %v1601_v59 = vpop.f32.mrf.mxu1  ;;  %v5977_v20 = vld [vmem:[#allocation8 + $0x120] sm:$0xff] }
 0x247   :  { %v6915_v55 = vpack.c.b16 %v2658_v51, %v2642_v16  ;;  %v6917_v45 = vpack.c.b16 %v2659_v53, %v2643_v26  ;;  %v1764_v38 = vmax.f32 %v1648_v28, 0.0  ;;  %v1602_v19 = vadd.f32 %v1601_v59, %v6884_v44  ;;  %v5993_v28 = vld [vmem:[#allocation8 + $0x1a0] sm:$0xff]  ;;  %4109 = vmatpush.bf16.msrb.mxu0 %v5977_v20 }
 0x248   :  { %v1765_v52 = vmax.f32 %v1697_v63, 0.0  ;;  %v1778_v31 = vmax.f32 %v1553_v35, 0.0  ;;  %3923 = vmatmul.bf16.gmra.mxu0 %v6399_v32  ;;  %3972 = vmatmul.bf16.gmra.mxu1 %v6401_v33  ;;  %v2644_v16 = vunpack.c.l.b16 %v1997_v9  ;;  %v6001_v33 = vld [vmem:[#allocation8 + $0x1e0] sm:$0xff] }
 0x249   :  { %v1779_v37 = vmax.f32 %v1602_v19, 0.0  ;;  %4021 = vmatmul.bf16.gmra.mxu2 %v6410_v62  ;;  %4256 = vmatpush.bf16.msrb.mxu3 %v6001_v33 }
 0x24a   :  { %v2005_v25 = vpack.c.bf16 %v1765_v52, %v1764_v38  ;;  %4070 = vmatmul.bf16.gmra.mxu3 %v6413_v3  ;;  %4207 = vmatpush.bf16.msrb.mxu2 %v5993_v28 }
 0x24b   :  { %v2012_v41 = vpack.c.bf16 %v1779_v37, %v1778_v31 }
 0x24c   :  { %2133 = vst [vmem:[#allocation11 + $0x78] sm:$0xff] %v2005_v25  ;;  %v2660_v26 = vunpack.c.l.b16 %v2005_v25  ;;  %v2661_v54 = vunpack.c.h.b16 %v2005_v25  ;;  %v1650_v23 = vpop.f32.mrf.mxu2 }
 0x24d   :  { %2140 = vst [vmem:[#allocation11 + $0xb0] sm:$0xff] %v2012_v41  ;;  %v1651_v51 = vadd.f32 %v1650_v23, %v6898_v42  ;;  %v1699_v53 = vpop.f32.mrf.mxu3  ;;  %v1554_v32 = vpop.f32.mrf.mxu0 }
 0x24e   :  { %v6925_v29 = vpack.c.b16 %v2660_v26, %v2644_v16  ;;  %v6927_v62 = vpack.c.b16 %v2661_v54, %v2645_v5  ;;  %v1700_v3 = vadd.f32 %v1699_v53, %v6902_v4  ;;  %v1555_v9 = vadd.f32 %v1554_v32, %v6881_v57  ;;  %v1603_v63 = vpop.f32.mrf.mxu1  ;;  %v5985_v16 = vld [vmem:[#allocation8 + $0x160] sm:$0xff] }
 0x24f   :  { %v1780_v35 = vmax.f32 %v1651_v51, 0.0  ;;  %v1604_v59 = vadd.f32 %v1603_v63, %v6884_v44  ;;  %v2674_v5 = vunpack.c.l.b16 %v2012_v41  ;;  %v2675_v53 = vunpack.c.h.b16 %v2012_v41  ;;  %4158 = vmatpush.bf16.msrb.mxu1 %v5985_v16 }
 0x250   :  { %v1781_v38 = vmax.f32 %v1700_v3, 0.0  ;;  %v1794_v19 = vmax.f32 %v1555_v9, 0.0 }
 0x251   :  { %v1795_v52 = vmax.f32 %v1604_v59, 0.0 }
 0x252   :  { %v2013_v31 = vpack.c.bf16 %v1781_v38, %v1780_v35 }
 0x253   :  { %v2020_v37 = vpack.c.bf16 %v1795_v52, %v1794_v19 }
 0x254   :  { %2141 = vst [vmem:[#allocation11 + $0xb8] sm:$0xff] %v2013_v31  ;;  %v1652_v25 = vpop.f32.mrf.mxu2 }
 0x255   :  { %2148 = vst [vmem:[#allocation11 + $0xf0] sm:$0xff] %v2020_v37  ;;  %v1653_v26 = vadd.f32 %v1652_v25, %v6898_v42  ;;  %v1701_v54 = vpop.f32.mrf.mxu3  ;;  %v1557_v23 = vpop.f32.mrf.mxu0  ;;  %v2690_v51 = vunpack.c.l.b16 %v2020_v37  ;;  %v2691_v32 = vunpack.c.h.b16 %v2020_v37  ;;  %v2676_v25 = vunpack.c.l.b16 %v2013_v31 }
 0x256   :  { %v1702_v28 = vadd.f32 %v1701_v54, %v6902_v4  ;;  %v1558_v20 = vadd.f32 %v1557_v23, %v6881_v57  ;;  %v1606_v33 = vpop.f32.mrf.mxu1 }
 0x257   :  { %v1796_v3 = vmax.f32 %v1653_v26, 0.0  ;;  %v1607_v9 = vadd.f32 %v1606_v33, %v6884_v44  ;;  %v6936_v63 = vpack.c.b16 %v2690_v51, %v2674_v5  ;;  %v6938_v35 = vpack.c.b16 %v2691_v32, %v2675_v53  ;;  %v5992_v51 = vld [vmem:[#allocation8 + $0x198] sm:$0xff] }
 0x258   :  { %v1797_v59 = vmax.f32 %v1702_v28, 0.0  ;;  %v1810_v38 = vmax.f32 %v1558_v20, 0.0  ;;  %3928 = vmatmul.bf16.gmra.mxu0 %v6419_v39  ;;  %3977 = vmatmul.bf16.gmra.mxu1 %v6421_v40  ;;  %v2677_v5 = vunpack.c.h.b16 %v2013_v31  ;;  %v5976_v53 = vld [vmem:[#allocation8 + $0x118] sm:$0xff] }
 0x259   :  { %v1811_v19 = vmax.f32 %v1607_v9, 0.0  ;;  %4026 = vmatmul.bf16.gmra.mxu2 %v6430_v2  ;;  %v6000_v40 = vld [vmem:[#allocation8 + $0x1d8] sm:$0xff]  ;;  %4110 = vmatpush.bf16.msrb.mxu0 %v5976_v53 }
 0x25a   :  { %v2021_v41 = vpack.c.bf16 %v1797_v59, %v1796_v3  ;;  %4075 = vmatmul.bf16.gmra.mxu3 %v6433_v11  ;;  %4208 = vmatpush.bf16.msrb.mxu2 %v5992_v51 }
 0x25b   :  { %v2028_v52 = vpack.c.bf16 %v1811_v19, %v1810_v38  ;;  %4257 = vmatpush.bf16.msrb.mxu3 %v6000_v40 }
 0x25c   :  { %2149 = vst [vmem:[#allocation11 + $0xf8] sm:$0xff] %v2021_v41  ;;  %v1655_v37 = vpop.f32.mrf.mxu2  ;;  %v2692_v16 = vunpack.c.l.b16 %v2021_v41  ;;  %v2693_v26 = vunpack.c.h.b16 %v2021_v41 }
 0x25d   :  { %2156 = vst [vmem:[#allocation11 + $0x130] sm:$0xff] %v2028_v52  ;;  %v1656_v54 = vadd.f32 %v1655_v37, %v6898_v42  ;;  %v1704_v23 = vpop.f32.mrf.mxu3  ;;  %v1559_v39 = vpop.f32.mrf.mxu0  ;;  %v5984_v37 = vld [vmem:[#allocation8 + $0x158] sm:$0xff] }
 0x25e   :  { %v1705_v2 = vadd.f32 %v1704_v23, %v6902_v4  ;;  %v1560_v32 = vadd.f32 %v1559_v39, %v6881_v57  ;;  %v1608_v11 = vpop.f32.mrf.mxu1  ;;  %v6947_v28 = vpack.c.b16 %v2692_v16, %v2676_v25  ;;  %v6949_v20 = vpack.c.b16 %v2693_v26, %v2677_v5  ;;  %4159 = vmatpush.bf16.msrb.mxu1 %v5984_v37 }
 0x25f   :  { %v1812_v33 = vmax.f32 %v1656_v54, 0.0  ;;  %v1609_v31 = vadd.f32 %v1608_v11, %v6884_v44  ;;  %v2706_v23 = vunpack.c.l.b16 %v2028_v52  ;;  %v2707_v54 = vunpack.c.h.b16 %v2028_v52 }
 0x260   :  { %v1813_v3 = vmax.f32 %v1705_v2, 0.0  ;;  %v1826_v9 = vmax.f32 %v1560_v32, 0.0 }
 0x261   :  { %v1827_v59 = vmax.f32 %v1609_v31, 0.0 }
 0x262   :  { %v2029_v38 = vpack.c.bf16 %v1813_v3, %v1812_v33 }
 0x263   :  { %v2036_v19 = vpack.c.bf16 %v1827_v59, %v1826_v9 }
 0x264   :  { %2157 = vst [vmem:[#allocation11 + $0x138] sm:$0xff] %v2029_v38  ;;  %v1657_v41 = vpop.f32.mrf.mxu2 }
 0x265   :  { %2164 = vst [vmem:[#allocation11 + $0x170] sm:$0xff] %v2036_v19  ;;  %v1658_v25 = vadd.f32 %v1657_v41, %v6898_v42  ;;  %v1706_v16 = vpop.f32.mrf.mxu3  ;;  %v1562_v5 = vpop.f32.mrf.mxu0  ;;  %v2722_v26 = vunpack.c.l.b16 %v2036_v19  ;;  %v2723_v39 = vunpack.c.h.b16 %v2036_v19  ;;  %v2708_v41 = vunpack.c.l.b16 %v2029_v38 }
 0x266   :  { %v1707_v51 = vadd.f32 %v1706_v16, %v6902_v4  ;;  %v1563_v53 = vadd.f32 %v1562_v5, %v6881_v57  ;;  %v1611_v40 = vpop.f32.mrf.mxu1 }
 0x267   :  { %v1828_v2 = vmax.f32 %v1658_v25, 0.0  ;;  %v1612_v32 = vadd.f32 %v1611_v40, %v6884_v44  ;;  %v6956_v11 = vpack.c.b16 %v2722_v26, %v2706_v23  ;;  %v6958_v33 = vpack.c.b16 %v2723_v39, %v2707_v54  ;;  %v5991_v26 = vld [vmem:[#allocation8 + $0x190] sm:$0xff] }
 0x268   :  { %v1829_v31 = vmax.f32 %v1707_v51, 0.0  ;;  %v1842_v3 = vmax.f32 %v1563_v53, 0.0  ;;  %3933 = vmatmul.bf16.gmra.mxu0 %v6439_v50  ;;  %3982 = vmatmul.bf16.gmra.mxu1 %v6441_v46  ;;  %v2709_v23 = vunpack.c.h.b16 %v2029_v38  ;;  %v5975_v54 = vld [vmem:[#allocation8 + $0x110] sm:$0xff] }
 0x269   :  { %v1843_v9 = vmax.f32 %v1612_v32, 0.0  ;;  %4031 = vmatmul.bf16.gmra.mxu2 %v6450_v13  ;;  %v5999_v46 = vld [vmem:[#allocation8 + $0x1d0] sm:$0xff]  ;;  %4111 = vmatpush.bf16.msrb.mxu0 %v5975_v54 }
 0x26a   :  { %v2037_v52 = vpack.c.bf16 %v1829_v31, %v1828_v2  ;;  %4080 = vmatmul.bf16.gmra.mxu3 %v6453_v21  ;;  %4209 = vmatpush.bf16.msrb.mxu2 %v5991_v26 }
 0x26b   :  { %v2044_v59 = vpack.c.bf16 %v1843_v9, %v1842_v3  ;;  %4258 = vmatpush.bf16.msrb.mxu3 %v5999_v46 }
 0x26c   :  { %2165 = vst [vmem:[#allocation11 + $0x178] sm:$0xff] %v2037_v52  ;;  %v1660_v19 = vpop.f32.mrf.mxu2  ;;  %v2724_v37 = vunpack.c.l.b16 %v2037_v52  ;;  %v2725_v25 = vunpack.c.h.b16 %v2037_v52 }
 0x26d   :  { %2172 = vst [vmem:[#allocation11 + $0x1b0] sm:$0xff] %v2044_v59  ;;  %v1661_v16 = vadd.f32 %v1660_v19, %v6898_v42  ;;  %v1709_v5 = vpop.f32.mrf.mxu3  ;;  %v1564_v50 = vpop.f32.mrf.mxu0  ;;  %v5983_v19 = vld [vmem:[#allocation8 + $0x150] sm:$0xff] }
 0x26e   :  { %v1710_v13 = vadd.f32 %v1709_v5, %v6902_v4  ;;  %v1565_v39 = vadd.f32 %v1564_v50, %v6881_v57  ;;  %v1613_v21 = vpop.f32.mrf.mxu1  ;;  %v6967_v51 = vpack.c.b16 %v2724_v37, %v2708_v41  ;;  %v6969_v53 = vpack.c.b16 %v2725_v25, %v2709_v23  ;;  %4160 = vmatpush.bf16.msrb.mxu1 %v5983_v19 }
 0x26f   :  { %v1844_v40 = vmax.f32 %v1661_v16, 0.0  ;;  %v1614_v38 = vadd.f32 %v1613_v21, %v6884_v44  ;;  %v2738_v5 = vunpack.c.l.b16 %v2044_v59  ;;  %v2739_v16 = vunpack.c.h.b16 %v2044_v59 }
 0x270   :  { %v1845_v2 = vmax.f32 %v1710_v13, 0.0  ;;  %v1858_v32 = vmax.f32 %v1565_v39, 0.0 }
 0x271   :  { %v1859_v31 = vmax.f32 %v1614_v38, 0.0 }
 0x272   :  { %v2045_v3 = vpack.c.bf16 %v1845_v2, %v1844_v40 }
 0x273   :  { %v2052_v9 = vpack.c.bf16 %v1859_v31, %v1858_v32 }
 0x274   :  { %2173 = vst [vmem:[#allocation11 + $0x1b8] sm:$0xff] %v2045_v3  ;;  %v1662_v52 = vpop.f32.mrf.mxu2 }
 0x275   :  { %2180 = vst [vmem:[#allocation11 + $0x1f0] sm:$0xff] %v2052_v9  ;;  %v1663_v41 = vadd.f32 %v1662_v52, %v6898_v42  ;;  %v1711_v37 = vpop.f32.mrf.mxu3  ;;  %v1567_v23 = vpop.f32.mrf.mxu0  ;;  %v2754_v25 = vunpack.c.l.b16 %v2052_v9  ;;  %v2755_v50 = vunpack.c.h.b16 %v2052_v9  ;;  %v2740_v52 = vunpack.c.l.b16 %v2045_v3 }
 0x276   :  { %v1712_v26 = vadd.f32 %v1711_v37, %v6902_v4  ;;  %v1568_v54 = vadd.f32 %v1567_v23, %v6881_v57  ;;  %v1616_v46 = vpop.f32.mrf.mxu1 }
 0x277   :  { %v1860_v13 = vmax.f32 %v1663_v41, 0.0  ;;  %v1617_v39 = vadd.f32 %v1616_v46, %v6884_v44  ;;  %v6976_v21 = vpack.c.b16 %v2754_v25, %v2738_v5  ;;  %v6978_v40 = vpack.c.b16 %v2755_v50, %v2739_v16  ;;  %v5990_v25 = vld [vmem:[#allocation8 + $0x188] sm:$0xff] }
 0x278   :  { %v1861_v38 = vmax.f32 %v1712_v26, 0.0  ;;  %v1874_v2 = vmax.f32 %v1568_v54, 0.0  ;;  %3938 = vmatmul.bf16.gmra.mxu0 %v6459_v61  ;;  %3987 = vmatmul.bf16.gmra.mxu1 %v6461_v56  ;;  %v2741_v5 = vunpack.c.h.b16 %v2045_v3  ;;  %v5974_v16 = vld [vmem:[#allocation8 + $0x108] sm:$0xff] }
 0x279   :  { %v1875_v32 = vmax.f32 %v1617_v39, 0.0  ;;  %4036 = vmatmul.bf16.gmra.mxu2 %v6470_v30  ;;  %v5998_v56 = vld [vmem:[#allocation8 + $0x1c8] sm:$0xff]  ;;  %4112 = vmatpush.bf16.msrb.mxu0 %v5974_v16 }
 0x27a   :  { %v2053_v59 = vpack.c.bf16 %v1861_v38, %v1860_v13  ;;  %4085 = vmatmul.bf16.gmra.mxu3 %v6473_v43  ;;  %4210 = vmatpush.bf16.msrb.mxu2 %v5990_v25 }
 0x27b   :  { %v2060_v31 = vpack.c.bf16 %v1875_v32, %v1874_v2  ;;  %4259 = vmatpush.bf16.msrb.mxu3 %v5998_v56 }
 0x27c   :  { %2181 = vst [vmem:[#allocation11 + $0x1f8] sm:$0xff] %v2053_v59  ;;  %v1665_v9 = vpop.f32.mrf.mxu2  ;;  %v2756_v19 = vunpack.c.l.b16 %v2053_v59  ;;  %v2757_v41 = vunpack.c.h.b16 %v2053_v59 }
 0x27d   :  { %2188 = vst [vmem:[#allocation11 + $0x230] sm:$0xff] %v2060_v31  ;;  %v1666_v37 = vadd.f32 %v1665_v9, %v6898_v42  ;;  %v1714_v23 = vpop.f32.mrf.mxu3  ;;  %v1569_v61 = vpop.f32.mrf.mxu0  ;;  %v5982_v9 = vld [vmem:[#allocation8 + $0x148] sm:$0xff] }
 0x27e   :  { %v1715_v30 = vadd.f32 %v1714_v23, %v6902_v4  ;;  %v1570_v50 = vadd.f32 %v1569_v61, %v6881_v57  ;;  %v1618_v43 = vpop.f32.mrf.mxu1  ;;  %v6987_v26 = vpack.c.b16 %v2756_v19, %v2740_v52  ;;  %v6989_v54 = vpack.c.b16 %v2757_v41, %v2741_v5  ;;  %4161 = vmatpush.bf16.msrb.mxu1 %v5982_v9 }
 0x27f   :  { %v1876_v46 = vmax.f32 %v1666_v37, 0.0  ;;  %v1619_v3 = vadd.f32 %v1618_v43, %v6884_v44  ;;  %v2770_v23 = vunpack.c.l.b16 %v2060_v31  ;;  %v2771_v37 = vunpack.c.h.b16 %v2060_v31 }
 0x280   :  { %v1877_v13 = vmax.f32 %v1715_v30, 0.0  ;;  %v1890_v39 = vmax.f32 %v1570_v50, 0.0 }
 0x281   :  { %v1891_v38 = vmax.f32 %v1619_v3, 0.0 }
 0x282   :  { %v2061_v2 = vpack.c.bf16 %v1877_v13, %v1876_v46 }
 0x283   :  { %v2068_v32 = vpack.c.bf16 %v1891_v38, %v1890_v39 }
 0x284   :  { %2189 = vst [vmem:[#allocation11 + $0x238] sm:$0xff] %v2061_v2  ;;  %v1667_v59 = vpop.f32.mrf.mxu2 }
 0x285   :  { %2196 = vst [vmem:[#allocation11 + $0x270] sm:$0xff] %v2068_v32  ;;  %v1668_v52 = vadd.f32 %v1667_v59, %v6898_v42  ;;  %v1716_v19 = vpop.f32.mrf.mxu3  ;;  %v1572_v5 = vpop.f32.mrf.mxu0  ;;  %v2786_v41 = vunpack.c.l.b16 %v2068_v32  ;;  %v2787_v61 = vunpack.c.h.b16 %v2068_v32  ;;  %v2772_v59 = vunpack.c.l.b16 %v2061_v2 }
 0x286   :  { %v1717_v25 = vadd.f32 %v1716_v19, %v6902_v4  ;;  %v1573_v16 = vadd.f32 %v1572_v5, %v6881_v57  ;;  %v1621_v56 = vpop.f32.mrf.mxu1 }
 0x287   :  { %v1892_v30 = vmax.f32 %v1668_v52, 0.0  ;;  %v1622_v50 = vadd.f32 %v1621_v56, %v6884_v44  ;;  %v6996_v43 = vpack.c.b16 %v2786_v41, %v2770_v23  ;;  %v6998_v46 = vpack.c.b16 %v2787_v61, %v2771_v37  ;;  %v5989_v41 = vld [vmem:[#allocation8 + $0x180] sm:$0xff] }
 0x288   :  { %v1893_v3 = vmax.f32 %v1717_v25, 0.0  ;;  %v1906_v13 = vmax.f32 %v1573_v16, 0.0  ;;  %3943 = vmatmul.bf16.gmra.mxu0 %v6479_v14  ;;  %3992 = vmatmul.bf16.gmra.mxu1 %v6481_v1  ;;  %v2773_v23 = vunpack.c.h.b16 %v2061_v2  ;;  %v5973_v37 = vld [vmem:[#allocation8 + $0x100] sm:$0xff] }
 0x289   :  { %v1907_v39 = vmax.f32 %v1622_v50, 0.0  ;;  %4041 = vmatmul.bf16.gmra.mxu2 %v6490_v18  ;;  %v5997_v1 = vld [vmem:[#allocation8 + $0x1c0] sm:$0xff]  ;;  %4113 = vmatpush.bf16.msrb.mxu0 %v5973_v37 }
 0x28a   :  { %v2069_v31 = vpack.c.bf16 %v1893_v3, %v1892_v30  ;;  %4090 = vmatmul.bf16.gmra.mxu3 %v6493_v0  ;;  %4211 = vmatpush.bf16.msrb.mxu2 %v5989_v41 }
 0x28b   :  { %v2076_v38 = vpack.c.bf16 %v1907_v39, %v1906_v13  ;;  %4260 = vmatpush.bf16.msrb.mxu3 %v5997_v1 }
 0x28c   :  { %2197 = vst [vmem:[#allocation11 + $0x278] sm:$0xff] %v2069_v31  ;;  %v1670_v32 = vpop.f32.mrf.mxu2  ;;  %v2788_v9 = vunpack.c.l.b16 %v2069_v31  ;;  %v2789_v52 = vunpack.c.h.b16 %v2069_v31 }
 0x28d   :  { %2204 = vst [vmem:[#allocation11 + $0x2b0] sm:$0xff] %v2076_v38  ;;  %v1671_v19 = vadd.f32 %v1670_v32, %v6898_v42  ;;  %v1719_v5 = vpop.f32.mrf.mxu3  ;;  %v1574_v14 = vpop.f32.mrf.mxu0  ;;  %v5981_v32 = vld [vmem:[#allocation8 + $0x140] sm:$0xff] }
 0x28e   :  { %v1720_v18 = vadd.f32 %v1719_v5, %v6902_v4  ;;  %v1575_v61 = vadd.f32 %v1574_v14, %v6881_v57  ;;  %v1623_v0 = vpop.f32.mrf.mxu1  ;;  %v7007_v25 = vpack.c.b16 %v2788_v9, %v2772_v59  ;;  %v7009_v16 = vpack.c.b16 %v2789_v52, %v2773_v23  ;;  %4162 = vmatpush.bf16.msrb.mxu1 %v5981_v32  ;;  %v6028_v32 = vld [vmem:[#allocation8 + $0x2b8] sm:$0xff] }
 0x28f   :  { %v1908_v56 = vmax.f32 %v1671_v19, 0.0  ;;  %v1624_v2 = vadd.f32 %v1623_v0, %v6884_v44  ;;  %v2802_v5 = vunpack.c.l.b16 %v2076_v38  ;;  %v2803_v19 = vunpack.c.h.b16 %v2076_v38  ;;  %4400 = vmatpush.bf16.msra.mxu2 %v6028_v32 }
 0x290   :  { %7372 = vst [vmem:[#allocation73_spill] sm:$0xff] %v7009_v16  ;;  %v1909_v30 = vmax.f32 %v1720_v18, 0.0  ;;  %v1922_v50 = vmax.f32 %v1575_v61, 0.0 }
 0x291   :  { %v1923_v3 = vmax.f32 %v1624_v2, 0.0 }
 0x292   :  { %v2077_v13 = vpack.c.bf16 %v1909_v30, %v1908_v56 }
 0x293   :  { %v2084_v39 = vpack.c.bf16 %v1923_v3, %v1922_v50  ;;  %v7375_v3 = vld [vmem:[#allocation18_spill] sm:$0xff] }
 0x294   :  { %2205 = vst [vmem:[#allocation11 + $0x2b8] sm:$0xff] %v2077_v13  ;;  %v1672_v31 = vpop.f32.mrf.mxu2 }
 0x295   :  { %2212 = vst [vmem:[#allocation11 + $0x2f0] sm:$0xff] %v2084_v39  ;;  %v1673_v59 = vadd.f32 %v1672_v31, %v6898_v42  ;;  %v1721_v9 = vpop.f32.mrf.mxu3  ;;  %v1577_v23 = vpop.f32.mrf.mxu0  ;;  %v2818_v52 = vunpack.c.l.b16 %v2084_v39  ;;  %v2819_v14 = vunpack.c.h.b16 %v2084_v39 }
 0x296   :  { %v1722_v41 = vadd.f32 %v1721_v9, %v6902_v4  ;;  %v1578_v37 = vadd.f32 %v1577_v23, %v6881_v57  ;;  %v1626_v1 = vpop.f32.mrf.mxu1  ;;  %v2804_v9 = vunpack.c.l.b16 %v2077_v13 }
 0x297   :  { %v1924_v18 = vmax.f32 %v1673_v59, 0.0  ;;  %v1627_v61 = vadd.f32 %v1626_v1, %v6884_v44  ;;  %v7016_v0 = vpack.c.b16 %v2818_v52, %v2802_v5  ;;  %v7018_v56 = vpack.c.b16 %v2819_v14, %v2803_v19  ;;  %v6012_v5 = vld [vmem:[#allocation8 + $0x238] sm:$0xff] }
 0x298   :  { %v1925_v2 = vmax.f32 %v1722_v41, 0.0  ;;  %v1938_v30 = vmax.f32 %v1578_v37, 0.0  ;;  %3948 = vmatmul.bf16.gmra.mxu0 %v6499_v49  ;;  %3997 = vmatmul.bf16.gmra.mxu1 %v6501_v15  ;;  %v6036_v59 = vld [vmem:[#allocation8 + $0x2f8] sm:$0xff]  ;;  %v2805_v15 = vunpack.c.h.b16 %v2077_v13 }
 0x299   :  { %7373 = vst [vmem:[#allocation74_spill] sm:$0xff] %v7016_v0  ;;  %v1939_v50 = vmax.f32 %v1627_v61, 0.0  ;;  %4046 = vmatmul.bf16.gmra.mxu2 %v6510_v17  ;;  %4302 = vmatpush.bf16.msra.mxu0 %v6012_v5 }
 0x29a   :  { %7374 = vst [vmem:[#allocation75_spill] sm:$0xff] %v7018_v56  ;;  %v2085_v38 = vpack.c.bf16 %v1925_v2, %v1924_v18  ;;  %4095 = vmatmul.bf16.gmra.mxu3 %v7375_v3  ;;  %v6020_v2 = vld [vmem:[#allocation8 + $0x278] sm:$0xff] }
 0x29b   :  { %v2092_v39 = vpack.c.bf16 %v1939_v50, %v1938_v30  ;;  %4449 = vmatpush.bf16.msra.mxu3 %v6036_v59  ;;  %4351 = vmatpush.bf16.msra.mxu1 %v6020_v2 }
 0x29c   :  { %2213 = vst [vmem:[#allocation11 + $0x2f8] sm:$0xff] %v2085_v38  ;;  %v1675_v31 = vpop.f32.mrf.mxu2  ;;  %v2820_v23 = vunpack.c.l.b16 %v2085_v38  ;;  %v2821_v52 = vunpack.c.h.b16 %v2085_v38 }
 0x29d   :  { %2220 = vst [vmem:[#allocation11 + $0x330] sm:$0xff] %v2092_v39  ;;  %v1676_v49 = vadd.f32 %v1675_v31, %v6898_v42  ;;  %v1724_v19 = vpop.f32.mrf.mxu3  ;;  %v1579_v14 = vpop.f32.mrf.mxu0 }
 0x29e   :  { %v1725_v17 = vadd.f32 %v1724_v19, %v6902_v4  ;;  %v1580_v41 = vadd.f32 %v1579_v14, %v6881_v57  ;;  %v1628_v37 = vpop.f32.mrf.mxu1  ;;  %v7027_v1 = vpack.c.b16 %v2820_v23, %v2804_v9  ;;  %v7030_v30 = vpack.c.b16 %v2821_v52, %v2805_v15 }
 0x29f   :  { %v1940_v18 = vmax.f32 %v1676_v49, 0.0  ;;  %v1629_v61 = vadd.f32 %v1628_v37, %v6884_v44  ;;  %v2834_v14 = vunpack.c.l.b16 %v2092_v39  ;;  %v2835_v49 = vunpack.c.h.b16 %v2092_v39  ;;  %v7382_v39 = vld [vmem:[#allocation21_spill] sm:$0xff] }
 0x2a0   :  { %7376 = vst [vmem:[#allocation18_spill] sm:$0xff] %v7027_v1  ;;  %v1941_v50 = vmax.f32 %v1725_v17, 0.0  ;;  %v1954_v38 = vmax.f32 %v1580_v41, 0.0 }
 0x2a1   :  { %7377 = vst [vmem:[#allocation76_spill] sm:$0xff] %v7030_v30  ;;  %v1955_v3 = vmax.f32 %v1629_v61, 0.0  ;;  %v6035_v30 = vld [vmem:[#allocation8 + $0x2f0] sm:$0xff] }
 0x2a2   :  { %v2093_v13 = vpack.c.bf16 %v1941_v50, %v1940_v18  ;;  %4450 = vmatpush.bf16.msra.mxu3 %v6035_v30 }
 0x2a3   :  { %v2100_v31 = vpack.c.bf16 %v1955_v3, %v1954_v38  ;;  %v7380_v38 = vld [vmem:[#allocation19_spill] sm:$0xff] }
 0x2a4   :  { %2221 = vst [vmem:[#allocation11 + $0x338] sm:$0xff] %v2093_v13  ;;  %v1677_v19 = vpop.f32.mrf.mxu2 }
 0x2a5   :  { %2228 = vst [vmem:[#allocation11 + $0x370] sm:$0xff] %v2100_v31  ;;  %v1678_v32 = vadd.f32 %v1677_v19, %v6898_v42  ;;  %v1726_v5 = vpop.f32.mrf.mxu3  ;;  %v1582_v9 = vpop.f32.mrf.mxu0  ;;  %v2850_v23 = vunpack.c.l.b16 %v2100_v31  ;;  %v2851_v59 = vunpack.c.h.b16 %v2100_v31  ;;  %v7381_v19 = vld [vmem:[#allocation20_spill] sm:$0xff] }
 0x2a6   :  { %v1727_v52 = vadd.f32 %v1726_v5, %v6902_v4  ;;  %v1583_v15 = vadd.f32 %v1582_v9, %v6881_v57  ;;  %v1631_v17 = vpop.f32.mrf.mxu1  ;;  %v7383_v5 = vld [vmem:[#allocation22_spill] sm:$0xff]  ;;  %v6027_v9 = vld [vmem:[#allocation8 + $0x2b0] sm:$0xff] }
 0x2a7   :  { %v1956_v41 = vmax.f32 %v1678_v32, 0.0  ;;  %v1632_v37 = vadd.f32 %v1631_v17, %v6884_v44  ;;  %v7036_v18 = vpack.c.b16 %v2850_v23, %v2834_v14  ;;  %v7038_v61 = vpack.c.b16 %v2851_v59, %v2835_v49  ;;  %v6011_v32 = vld [vmem:[#allocation8 + $0x230] sm:$0xff]  ;;  %4401 = vmatpush.bf16.msra.mxu2 %v6027_v9 }
 0x2a8   :  { %v1957_v2 = vmax.f32 %v1727_v52, 0.0  ;;  %v1970_v50 = vmax.f32 %v1583_v15, 0.0  ;;  %3953 = vmatmul.bf16.gmra.mxu0 %v7380_v38  ;;  %4002 = vmatmul.bf16.gmra.mxu1 %v7381_v19  ;;  %v2836_v23 = vunpack.c.l.b16 %v2093_v13  ;;  %v2837_v59 = vunpack.c.h.b16 %v2093_v13  ;;  %v6019_v13 = vld [vmem:[#allocation8 + $0x270] sm:$0xff] }
 0x2a9   :  { %7378 = vst [vmem:[#allocation77_spill] sm:$0xff] %v7036_v18  ;;  %v1971_v3 = vmax.f32 %v1632_v37, 0.0  ;;  %4051 = vmatmul.bf16.gmra.mxu2 %v7382_v39  ;;  %4303 = vmatpush.bf16.msra.mxu0 %v6011_v32 }
 0x2aa   :  { %7379 = vst [vmem:[#allocation78_spill] sm:$0xff] %v7038_v61  ;;  %v2101_v31 = vpack.c.bf16 %v1957_v2, %v1956_v41  ;;  %4100 = vmatmul.bf16.gmra.mxu3 %v7383_v5  ;;  %4352 = vmatpush.bf16.msra.mxu1 %v6019_v13  ;;  %v7388_v13 = vld [vmem:[#allocation23_spill] sm:$0xff] }
 0x2ab   :  { %v2108_v17 = vpack.c.bf16 %v1971_v3, %v1970_v50 }
 0x2ac   :  { %2229 = vst [vmem:[#allocation11 + $0x378] sm:$0xff] %v2101_v31  ;;  %v1680_v14 = vpop.f32.mrf.mxu2  ;;  %v2852_v49 = vunpack.c.l.b16 %v2101_v31  ;;  %v2853_v52 = vunpack.c.h.b16 %v2101_v31 }
 0x2ad   :  { %2236 = vst [vmem:[#allocation11 + $0x3b0] sm:$0xff] %v2108_v17  ;;  %v1681_v15 = vadd.f32 %v1680_v14, %v6898_v42  ;;  %v1729_v37 = vpop.f32.mrf.mxu3  ;;  %v1584_v38 = vpop.f32.mrf.mxu0 }
 0x2ae   :  { %v1730_v41 = vadd.f32 %v1729_v37, %v6902_v4  ;;  %v1585_v2 = vadd.f32 %v1584_v38, %v6881_v57  ;;  %v1633_v19 = vpop.f32.mrf.mxu1  ;;  %v7047_v50 = vpack.c.b16 %v2852_v49, %v2836_v23  ;;  %v7049_v3 = vpack.c.b16 %v2853_v52, %v2837_v59 }
 0x2af   :  { %v1972_v39 = vmax.f32 %v1681_v15, 0.0  ;;  %v1634_v5 = vadd.f32 %v1633_v19, %v6884_v44  ;;  %v2866_v37 = vunpack.c.l.b16 %v2108_v17  ;;  %v2867_v52 = vunpack.c.h.b16 %v2108_v17  ;;  %v6010_v17 = vld [vmem:[#allocation8 + $0x228] sm:$0xff] }
 0x2b0   :  { %7384 = vst [vmem:[#allocation19_spill] sm:$0xff] %v7047_v50  ;;  %v1973_v31 = vmax.f32 %v1730_v41, 0.0  ;;  %v1986_v9 = vmax.f32 %v1585_v2, 0.0  ;;  %4304 = vmatpush.bf16.msra.mxu0 %v6010_v17 }
 0x2b1   :  { %7385 = vst [vmem:[#allocation20_spill] sm:$0xff] %v7049_v3  ;;  %v1987_v32 = vmax.f32 %v1634_v5, 0.0 }
 0x2b2   :  { %v2109_v14 = vpack.c.bf16 %v1973_v31, %v1972_v39  ;;  %v7389_v31 = vld [vmem:[#allocation24_spill] sm:$0xff] }
 0x2b3   :  { %v2116_v61 = vpack.c.bf16 %v1987_v32, %v1986_v9  ;;  %v7391_v32 = vld [vmem:[#allocation26_spill] sm:$0xff] }
 0x2b4   :  { %2237 = vst [vmem:[#allocation11 + $0x3b8] sm:$0xff] %v2109_v14  ;;  %v1682_v30 = vpop.f32.mrf.mxu2 }
 0x2b5   :  { %2244 = vst [vmem:[#allocation11 + $0x3f0] sm:$0xff] %v2116_v61  ;;  %v1683_v57 = vadd.f32 %v1682_v30, %v6898_v42  ;;  %v1731_v23 = vpop.f32.mrf.mxu3  ;;  %v3919_v49 = vpop.f32.mrf.mxu0  ;;  %v2882_v59 = vunpack.c.l.b16 %v2116_v61  ;;  %v2883_v15 = vunpack.c.h.b16 %v2116_v61  ;;  %v7390_v42 = vld [vmem:[#allocation25_spill] sm:$0xff]  ;;  %v6026_v61 = vld [vmem:[#allocation8 + $0x2a8] sm:$0xff] }
 0x2b6   :  { %v1732_v44 = vadd.f32 %v1731_v23, %v6902_v4  ;;  %v3968_v38 = vpop.f32.mrf.mxu1  ;;  %v6034_v4 = vld [vmem:[#allocation8 + $0x2e8] sm:$0xff]  ;;  %4402 = vmatpush.bf16.msra.mxu2 %v6026_v61  ;;  %v2869_v23 = vunpack.c.h.b16 %v2109_v14 }
 0x2b7   :  { %v1988_v41 = vmax.f32 %v1683_v57, 0.0  ;;  %v3969_v2 = vadd.f32 %v3968_v38, %v3919_v49  ;;  %v7054_v19 = vpack.c.b16 %v2882_v59, %v2866_v37  ;;  %v7056_v39 = vpack.c.b16 %v2883_v15, %v2867_v52  ;;  %4451 = vmatpush.bf16.msra.mxu3 %v6034_v4  ;;  %v7395_v4 = vld [vmem:[#allocation28_spill] sm:$0xff] }
 0x2b8   :  { %v1989_v5 = vmax.f32 %v1732_v44, 0.0  ;;  %4114 = vmatmul.bf16.vlgmr.msrb.gmra.mxu0 %v7388_v13  ;;  %4163 = vmatmul.bf16.vlgmr.msrb.gmra.mxu1 %v7389_v31  ;;  %v2868_v37 = vunpack.c.l.b16 %v2109_v14  ;;  %v6018_v31 = vld [vmem:[#allocation8 + $0x268] sm:$0xff] }
 0x2b9   :  { %7386 = vst [vmem:[#allocation21_spill] sm:$0xff] %v7054_v19  ;;  %4212 = vmatmul.bf16.vlgmr.msrb.gmra.mxu2 %v7390_v42  ;;  %4353 = vmatpush.bf16.msra.mxu1 %v6018_v31 }
 0x2ba   :  { %7387 = vst [vmem:[#allocation22_spill] sm:$0xff] %v7056_v39  ;;  %v2117_v9 = vpack.c.bf16 %v1989_v5, %v1988_v41  ;;  %4261 = vmatmul.bf16.vlgmr.msrb.gmra.mxu3 %v7391_v32 }
 0x2bc   :  { %2245 = vst [vmem:[#allocation11 + $0x3f8] sm:$0xff] %v2117_v9  ;;  %v4017_v30 = vpop.f32.mrf.mxu2  ;;  %v2884_v57 = vunpack.c.l.b16 %v2117_v9  ;;  %v2885_v49 = vunpack.c.h.b16 %v2117_v9 }
 0x2bd   :  { %v4018_v59 = vadd.f32 %v4017_v30, %v3969_v2  ;;  %v4066_v52 = vpop.f32.mrf.mxu3  ;;  %v3921_v15 = vpop.f32.mrf.mxu0  ;;  %v7394_v30 = vld [vmem:[#allocation27_spill] sm:$0xff]  ;;  %4735 = dma.vmem_to_hbm [thread:$0]  %s4728_s3, 16384, %s4730_s16, [#allocation12], %s6244_s26, %s6244_s26, %s6245_s27  }
 0x2be   :  { %v3970_v44 = vpop.f32.mrf.mxu1  ;;  %v7062_v38 = vpack.c.b16 %v2884_v57, %v2868_v37  ;;  %v7064_v41 = vpack.c.b16 %v2885_v49, %v2869_v23  ;;  %v7396_v37 = vld [vmem:[#allocation29_spill] sm:$0xff]  ;;  %v7397_v57 = vld [vmem:[#allocation30_spill] sm:$0xff] }
 0x2bf   :  { %v7066_v5 = vadd.f32 %v4066_v52, %v4018_v59  ;;  %v3971_v13 = vadd.f32 %v3970_v44, %v3921_v15  ;;  %v6025_v23 = vld [vmem:[#allocation8 + $0x2a0] sm:$0xff] }
 0x2c0   :  { %7392 = vst [vmem:[#allocation23_spill] sm:$0xff] %v7062_v38  ;;  %v6009_v49 = vld [vmem:[#allocation8 + $0x220] sm:$0xff]  ;;  %4403 = vmatpush.bf16.msra.mxu2 %v6025_v23  ;;  %v7398_v23 = vld [vmem:[#allocation31_spill] sm:$0xff] }
 0x2c1   :  { %7393 = vst [vmem:[#allocation24_spill] sm:$0xff] %v7064_v41  ;;  %v6033_v59 = vld [vmem:[#allocation8 + $0x2e0] sm:$0xff]  ;;  %4305 = vmatpush.bf16.msra.mxu0 %v6009_v49  ;;  %v7400_v49 = vld [vmem:[#allocation33_spill] sm:$0xff] }
 0x2c2   :  { %4452 = vmatpush.bf16.msra.mxu3 %v6033_v59  ;;  %v7401_v59 = vld [vmem:[#allocation34_spill] sm:$0xff] }
 0x2c4   :  { %v4019_v42 = vpop.f32.mrf.mxu2 }
 0x2c5   :  { %v4020_v32 = vadd.f32 %v4019_v42, %v3971_v13  ;;  %v4068_v61 = vpop.f32.mrf.mxu3  ;;  %v3924_v17 = vpop.f32.mrf.mxu0 }
 0x2c6   :  { %v3973_v14 = vpop.f32.mrf.mxu1 }
 0x2c7   :  { %v7068_v9 = vadd.f32 %v4068_v61, %v4020_v32  ;;  %v3974_v2 = vadd.f32 %v3973_v14, %v3924_v17  ;;  %v6017_v61 = vld [vmem:[#allocation8 + $0x260] sm:$0xff] }
 0x2c8   :  { %4119 = vmatmul.bf16.gmra.mxu0 %v7394_v30  ;;  %4168 = vmatmul.bf16.gmra.mxu1 %v7395_v4 }
 0x2c9   :  { %4217 = vmatmul.bf16.gmra.mxu2 %v7396_v37  ;;  %4354 = vmatpush.bf16.msra.mxu1 %v6017_v61 }
 0x2ca   :  { %4266 = vmatmul.bf16.gmra.mxu3 %v7397_v57 }
 0x2cc   :  { %v4022_v52 = vpop.f32.mrf.mxu2 }
 0x2cd   :  { %v4023_v15 = vadd.f32 %v4022_v52, %v3974_v2  ;;  %v4071_v44 = vpop.f32.mrf.mxu3  ;;  %v3926_v13 = vpop.f32.mrf.mxu0  ;;  %v7399_v2 = vld [vmem:[#allocation32_spill] sm:$0xff]  ;;  %v6024_v52 = vld [vmem:[#allocation8 + $0x298] sm:$0xff] }
 0x2ce   :  { %v3975_v31 = vpop.f32.mrf.mxu1  ;;  %4404 = vmatpush.bf16.msra.mxu2 %v6024_v52  ;;  %v7402_v52 = vld [vmem:[#allocation35_spill] sm:$0xff] }
 0x2cf   :  { %v7074_v42 = vadd.f32 %v4071_v44, %v4023_v15  ;;  %v3976_v32 = vadd.f32 %v3975_v31, %v3926_v13  ;;  %v6008_v15 = vld [vmem:[#allocation8 + $0x218] sm:$0xff] }
 0x2d0   :  { %v6032_v44 = vld [vmem:[#allocation8 + $0x2d8] sm:$0xff]  ;;  %4306 = vmatpush.bf16.msra.mxu0 %v6008_v15 }
 0x2d1   :  { %4453 = vmatpush.bf16.msra.mxu3 %v6032_v44  ;;  %v7404_v15 = vld [vmem:[#allocation37_spill] sm:$0xff]  ;;  %v7405_v44 = vld [vmem:[#allocation38_spill] sm:$0xff] }
 0x2d4   :  { %v4024_v17 = vpop.f32.mrf.mxu2 }
 0x2d5   :  { %v4025_v14 = vadd.f32 %v4024_v17, %v3976_v32  ;;  %v4073_v30 = vpop.f32.mrf.mxu3  ;;  %v3929_v4 = vpop.f32.mrf.mxu0 }
 0x2d6   :  { %v3978_v37 = vpop.f32.mrf.mxu1 }
 0x2d7   :  { %v7076_v57 = vadd.f32 %v4073_v30, %v4025_v14  ;;  %v3979_v41 = vadd.f32 %v3978_v37, %v3929_v4  ;;  %v6016_v4 = vld [vmem:[#allocation8 + $0x258] sm:$0xff] }
 0x2d8   :  { %4124 = vmatmul.bf16.gmra.mxu0 %v7398_v23  ;;  %4173 = vmatmul.bf16.gmra.mxu1 %v7399_v2 }
 0x2d9   :  { %4222 = vmatmul.bf16.gmra.mxu2 %v7400_v49  ;;  %4355 = vmatpush.bf16.msra.mxu1 %v6016_v4 }
 0x2da   :  { %4271 = vmatmul.bf16.gmra.mxu3 %v7401_v59 }
 0x2dc   :  { %v4027_v13 = vpop.f32.mrf.mxu2 }
 0x2dd   :  { %v4028_v31 = vadd.f32 %v4027_v13, %v3979_v41  ;;  %v4076_v32 = vpop.f32.mrf.mxu3  ;;  %v3931_v61 = vpop.f32.mrf.mxu0  ;;  %v7403_v41 = vld [vmem:[#allocation36_spill] sm:$0xff] }
 0x2de   :  { %v3980_v17 = vpop.f32.mrf.mxu1  ;;  %v6023_v13 = vld [vmem:[#allocation8 + $0x290] sm:$0xff] }
 0x2df   :  { %v7082_v14 = vadd.f32 %v4076_v32, %v4028_v31  ;;  %v3981_v30 = vadd.f32 %v3980_v17, %v3931_v61  ;;  %v6007_v31 = vld [vmem:[#allocation8 + $0x210] sm:$0xff]  ;;  %4405 = vmatpush.bf16.msra.mxu2 %v6023_v13  ;;  %v7406_v13 = vld [vmem:[#allocation39_spill] sm:$0xff] }
 0x2e0   :  { %v6031_v32 = vld [vmem:[#allocation8 + $0x2d0] sm:$0xff]  ;;  %4307 = vmatpush.bf16.msra.mxu0 %v6007_v31  ;;  %v7408_v31 = vld [vmem:[#allocation41_spill] sm:$0xff] }
 0x2e1   :  { %4454 = vmatpush.bf16.msra.mxu3 %v6031_v32  ;;  %v7409_v32 = vld [vmem:[#allocation42_spill] sm:$0xff] }
 0x2e4   :  { %v4029_v37 = vpop.f32.mrf.mxu2 }
 0x2e5   :  { %v4030_v23 = vadd.f32 %v4029_v37, %v3981_v30  ;;  %v4078_v2 = vpop.f32.mrf.mxu3  ;;  %v3934_v49 = vpop.f32.mrf.mxu0 }
 0x2e6   :  { %v3983_v59 = vpop.f32.mrf.mxu1 }
 0x2e7   :  { %v7084_v38 = vadd.f32 %v4078_v2, %v4030_v23  ;;  %v3984_v39 = vadd.f32 %v3983_v59, %v3934_v49  ;;  %v6015_v49 = vld [vmem:[#allocation8 + $0x250] sm:$0xff] }
 0x2e8   :  { %4129 = vmatmul.bf16.gmra.mxu0 %v7402_v52  ;;  %4178 = vmatmul.bf16.gmra.mxu1 %v7403_v41 }
 0x2e9   :  { %4227 = vmatmul.bf16.gmra.mxu2 %v7404_v15  ;;  %4356 = vmatpush.bf16.msra.mxu1 %v6015_v49 }
 0x2ea   :  { %4276 = vmatmul.bf16.gmra.mxu3 %v7405_v44 }
 0x2ec   :  { %v4032_v61 = vpop.f32.mrf.mxu2 }
 0x2ed   :  { %v4033_v17 = vadd.f32 %v4032_v61, %v3984_v39  ;;  %v4081_v30 = vpop.f32.mrf.mxu3  ;;  %v3936_v4 = vpop.f32.mrf.mxu0  ;;  %v7407_v39 = vld [vmem:[#allocation40_spill] sm:$0xff]  ;;  %v6022_v61 = vld [vmem:[#allocation8 + $0x288] sm:$0xff] }
 0x2ee   :  { %v3985_v37 = vpop.f32.mrf.mxu1  ;;  %4406 = vmatpush.bf16.msra.mxu2 %v6022_v61  ;;  %v7410_v61 = vld [vmem:[#allocation43_spill] sm:$0xff] }
 0x2ef   :  { %v7090_v23 = vadd.f32 %v4081_v30, %v4033_v17  ;;  %v3986_v2 = vadd.f32 %v3985_v37, %v3936_v4  ;;  %v6006_v17 = vld [vmem:[#allocation8 + $0x208] sm:$0xff] }
 0x2f0   :  { %v6030_v30 = vld [vmem:[#allocation8 + $0x2c8] sm:$0xff]  ;;  %4308 = vmatpush.bf16.msra.mxu0 %v6006_v17  ;;  %v7412_v17 = vld [vmem:[#allocation45_spill] sm:$0xff] }
 0x2f1   :  { %4455 = vmatpush.bf16.msra.mxu3 %v6030_v30  ;;  %v7413_v30 = vld [vmem:[#allocation46_spill] sm:$0xff] }
 0x2f4   :  { %v4034_v59 = vpop.f32.mrf.mxu2 }
 0x2f5   :  { %v4035_v52 = vadd.f32 %v4034_v59, %v3986_v2  ;;  %v4083_v41 = vpop.f32.mrf.mxu3  ;;  %v3939_v15 = vpop.f32.mrf.mxu0 }
 0x2f6   :  { %v3988_v44 = vpop.f32.mrf.mxu1 }
 0x2f7   :  { %v7092_v19 = vadd.f32 %v4083_v41, %v4035_v52  ;;  %v3989_v3 = vadd.f32 %v3988_v44, %v3939_v15  ;;  %v6014_v15 = vld [vmem:[#allocation8 + $0x248] sm:$0xff] }
 0x2f8   :  { %4134 = vmatmul.bf16.gmra.mxu0 %v7406_v13  ;;  %4183 = vmatmul.bf16.gmra.mxu1 %v7407_v39 }
 0x2f9   :  { %4232 = vmatmul.bf16.gmra.mxu2 %v7408_v31  ;;  %4357 = vmatpush.bf16.msra.mxu1 %v6014_v15 }
 0x2fa   :  { %4281 = vmatmul.bf16.gmra.mxu3 %v7409_v32 }
 0x2fc   :  { %v4037_v4 = vpop.f32.mrf.mxu2 }
 0x2fd   :  { %v4038_v37 = vadd.f32 %v4037_v4, %v3989_v3  ;;  %v4086_v2 = vpop.f32.mrf.mxu3  ;;  %v3941_v49 = vpop.f32.mrf.mxu0  ;;  %v7411_v3 = vld [vmem:[#allocation44_spill] sm:$0xff]  ;;  %v6021_v4 = vld [vmem:[#allocation8 + $0x280] sm:$0xff] }
 0x2fe   :  { %v3990_v59 = vpop.f32.mrf.mxu1  ;;  %4407 = vmatpush.bf16.msra.mxu2 %v6021_v4  ;;  %v7414_v4 = vld [vmem:[#allocation47_spill] sm:$0xff] }
 0x2ff   :  { %v7098_v52 = vadd.f32 %v4086_v2, %v4038_v37  ;;  %v3991_v41 = vadd.f32 %v3990_v59, %v3941_v49  ;;  %v6005_v37 = vld [vmem:[#allocation8 + $0x200] sm:$0xff] }
 0x300   :  { %v6029_v2 = vld [vmem:[#allocation8 + $0x2c0] sm:$0xff]  ;;  %4309 = vmatpush.bf16.msra.mxu0 %v6005_v37  ;;  %v7416_v37 = vld [vmem:[#allocation49_spill] sm:$0xff] }
 0x301   :  { %4456 = vmatpush.bf16.msra.mxu3 %v6029_v2  ;;  %v7417_v2 = vld [vmem:[#allocation50_spill] sm:$0xff] }
 0x304   :  { %v4039_v44 = vpop.f32.mrf.mxu2 }
 0x305   :  { %v4040_v13 = vadd.f32 %v4039_v44, %v3991_v41  ;;  %v4088_v39 = vpop.f32.mrf.mxu3  ;;  %v3944_v31 = vpop.f32.mrf.mxu0 }
 0x306   :  { %v3993_v32 = vpop.f32.mrf.mxu1 }
 0x307   :  { %v7100_v50 = vadd.f32 %v4088_v39, %v4040_v13  ;;  %v3994_v18 = vadd.f32 %v3993_v32, %v3944_v31  ;;  %v6013_v31 = vld [vmem:[#allocation8 + $0x240] sm:$0xff] }
 0x308   :  { %4139 = vmatmul.bf16.gmra.mxu0 %v7410_v61  ;;  %4188 = vmatmul.bf16.gmra.mxu1 %v7411_v3 }
 0x309   :  { %4237 = vmatmul.bf16.gmra.mxu2 %v7412_v17  ;;  %4358 = vmatpush.bf16.msra.mxu1 %v6013_v31 }
 0x30a   :  { %4286 = vmatmul.bf16.gmra.mxu3 %v7413_v30 }
 0x30c   :  { %v4042_v49 = vpop.f32.mrf.mxu2 }
 0x30d   :  { %v4043_v59 = vadd.f32 %v4042_v49, %v3994_v18  ;;  %v4091_v41 = vpop.f32.mrf.mxu3  ;;  %v3946_v15 = vpop.f32.mrf.mxu0  ;;  %v7415_v18 = vld [vmem:[#allocation48_spill] sm:$0xff]  ;;  %v6060_v49 = vld [vmem:[#allocation8 + $0x3b8] sm:$0xff] }
 0x30e   :  { %v3995_v44 = vpop.f32.mrf.mxu1  ;;  %4596 = vmatpush.bf16.msrb.mxu2 %v6060_v49  ;;  %v7418_v49 = vld [vmem:[#allocation51_spill] sm:$0xff] }
 0x30f   :  { %v7106_v13 = vadd.f32 %v4091_v41, %v4043_v59  ;;  %v3996_v39 = vadd.f32 %v3995_v44, %v3946_v15  ;;  %v6044_v59 = vld [vmem:[#allocation8 + $0x338] sm:$0xff] }
 0x310   :  { %v6068_v41 = vld [vmem:[#allocation8 + $0x3f8] sm:$0xff]  ;;  %4498 = vmatpush.bf16.msrb.mxu0 %v6044_v59  ;;  %v6059_v59 = vld [vmem:[#allocation8 + $0x3b0] sm:$0xff] }
 0x311   :  { %4645 = vmatpush.bf16.msrb.mxu3 %v6068_v41  ;;  %v6043_v41 = vld [vmem:[#allocation8 + $0x330] sm:$0xff] }
 0x312   :  { %4597 = vmatpush.bf16.msrb.mxu2 %v6059_v59 }
 0x314   :  { %v4044_v32 = vpop.f32.mrf.mxu2  ;;  %4499 = vmatpush.bf16.msrb.mxu0 %v6043_v41  ;;  %v7421_v41 = vld [vmem:[#allocation54_spill] sm:$0xff] }
 0x315   :  { %v4045_v61 = vadd.f32 %v4044_v32, %v3996_v39  ;;  %v4093_v3 = vpop.f32.mrf.mxu3  ;;  %v3949_v17 = vpop.f32.mrf.mxu0 }
 0x316   :  { %v3998_v30 = vpop.f32.mrf.mxu1 }
 0x317   :  { %v7108_v1 = vadd.f32 %v4093_v3, %v4045_v61  ;;  %v3999_v56 = vadd.f32 %v3998_v30, %v3949_v17  ;;  %v6052_v17 = vld [vmem:[#allocation8 + $0x378] sm:$0xff] }
 0x318   :  { %4144 = vmatmul.bf16.gmra.mxu0 %v7414_v4  ;;  %4193 = vmatmul.bf16.gmra.mxu1 %v7415_v18 }
 0x319   :  { %4242 = vmatmul.bf16.gmra.mxu2 %v7416_v37  ;;  %4547 = vmatpush.bf16.msrb.mxu1 %v6052_v17 }
 0x31a   :  { %4291 = vmatmul.bf16.gmra.mxu3 %v7417_v2 }
 0x31c   :  { %v4047_v15 = vpop.f32.mrf.mxu2 }
 0x31d   :  { %v4048_v44 = vadd.f32 %v4047_v15, %v3999_v56  ;;  %v4096_v39 = vpop.f32.mrf.mxu3  ;;  %v3951_v31 = vpop.f32.mrf.mxu0  ;;  %v7419_v56 = vld [vmem:[#allocation52_spill] sm:$0xff] }
 0x31e   :  { %v4000_v32 = vpop.f32.mrf.mxu1  ;;  %v6067_v15 = vld [vmem:[#allocation8 + $0x3f0] sm:$0xff] }
 0x31f   :  { %v7114_v61 = vadd.f32 %v4096_v39, %v4048_v44  ;;  %v4001_v3 = vadd.f32 %v4000_v32, %v3951_v31  ;;  %4646 = vmatpush.bf16.msrb.mxu3 %v6067_v15  ;;  %v7422_v15 = vld [vmem:[#allocation55_spill] sm:$0xff] }
 0x324   :  { %v4049_v30 = vpop.f32.mrf.mxu2 }
 0x325   :  { %v4050_v4 = vadd.f32 %v4049_v30, %v4001_v3  ;;  %v4098_v18 = vpop.f32.mrf.mxu3  ;;  %v3954_v37 = vpop.f32.mrf.mxu0 }
 0x326   :  { %v4003_v2 = vpop.f32.mrf.mxu1 }
 0x327   :  { %v7116_v0 = vadd.f32 %v4098_v18, %v4050_v4  ;;  %v4004_v16 = vadd.f32 %v4003_v2, %v3954_v37  ;;  %v6051_v4 = vld [vmem:[#allocation8 + $0x370] sm:$0xff] }
 0x328   :  { %4149 = vmatmul.bf16.gmra.mxu0 %v7418_v49  ;;  %4198 = vmatmul.bf16.gmra.mxu1 %v7419_v56 }
 0x329   :  { %4247 = vmatmul.bf16.gmra.mxu2 %v6735_v58  ;;  %4548 = vmatpush.bf16.msrb.mxu1 %v6051_v4 }
 0x32a   :  { %4296 = vmatmul.bf16.gmra.mxu3 %v6737_v36 }
 0x32c   :  { %v4052_v44 = vpop.f32.mrf.mxu2 }
 0x32d   :  { %v4053_v39 = vadd.f32 %v4052_v44, %v4004_v16  ;;  %v4101_v31 = vpop.f32.mrf.mxu3  ;;  %v3956_v32 = vpop.f32.mrf.mxu0  ;;  %v7420_v16 = vld [vmem:[#allocation53_spill] sm:$0xff]  ;;  %v6058_v44 = vld [vmem:[#allocation8 + $0x3a8] sm:$0xff] }
 0x32e   :  { %v4005_v3 = vpop.f32.mrf.mxu1  ;;  %4598 = vmatpush.bf16.msrb.mxu2 %v6058_v44 }
 0x32f   :  { %v7122_v17 = vadd.f32 %v4101_v31, %v4053_v39  ;;  %v4006_v30 = vadd.f32 %v4005_v3, %v3956_v32  ;;  %v6042_v39 = vld [vmem:[#allocation8 + $0x328] sm:$0xff] }
 0x330   :  { %v6066_v31 = vld [vmem:[#allocation8 + $0x3e8] sm:$0xff]  ;;  %4500 = vmatpush.bf16.msrb.mxu0 %v6042_v39  ;;  %v7423_v39 = vld [vmem:[#allocation56_spill] sm:$0xff] }
 0x331   :  { %4647 = vmatpush.bf16.msrb.mxu3 %v6066_v31  ;;  %v7424_v31 = vld [vmem:[#allocation57_spill] sm:$0xff] }
 0x334   :  { %v4054_v18 = vpop.f32.mrf.mxu2 }
 0x335   :  { %v4055_v58 = vadd.f32 %v4054_v18, %v4006_v30  ;;  %v4103_v37 = vpop.f32.mrf.mxu3  ;;  %v4115_v36 = vpop.f32.mrf.mxu0 }
 0x336   :  { %v4116_v2 = vadd.f32 %v4115_v36, %v7066_v5  ;;  %v4164_v49 = vpop.f32.mrf.mxu1 }
 0x337   :  { %v7125_v56 = vadd.f32 %v4103_v37, %v4055_v58  ;;  %v6050_v58 = vld [vmem:[#allocation8 + $0x368] sm:$0xff] }
 0x338   :  { %v4165_v59 = vadd.f32 %v4164_v49, %v4116_v2  ;;  %4310 = vmatmul.bf16.vlgmr.msra.gmra.mxu0 %v6743_v47  ;;  %4359 = vmatmul.bf16.vlgmr.msra.gmra.mxu1 %v7420_v16 }
 0x339   :  { %4408 = vmatmul.bf16.vlgmr.msra.gmra.mxu2 %v7421_v41  ;;  %4549 = vmatpush.bf16.msrb.mxu1 %v6050_v58 }
 0x33a   :  { %4457 = vmatmul.bf16.vlgmr.msra.gmra.mxu3 %v7422_v15 }
 0x33c   :  { %v4213_v32 = vpop.f32.mrf.mxu2 }
 0x33d   :  { %v4214_v3 = vadd.f32 %v4213_v32, %v4165_v59  ;;  %v4262_v5 = vpop.f32.mrf.mxu3  ;;  %v4117_v30 = vpop.f32.mrf.mxu0  ;;  %v6057_v32 = vld [vmem:[#allocation8 + $0x3a0] sm:$0xff] }
 0x33e   :  { %v4118_v4 = vadd.f32 %v4117_v30, %v7068_v9  ;;  %v4166_v18 = vpop.f32.mrf.mxu1  ;;  %v7425_v9 = vld [vmem:[#allocation58_spill] sm:$0xff]  ;;  %4599 = vmatpush.bf16.msrb.mxu2 %v6057_v32  ;;  %v7426_v32 = vld [vmem:[#allocation59_spill] sm:$0xff] }
 0x33f   :  { %v7132_v47 = vadd.f32 %v4262_v5, %v4214_v3  ;;  %v6041_v3 = vld [vmem:[#allocation8 + $0x320] sm:$0xff] }
 0x340   :  { %v4167_v37 = vadd.f32 %v4166_v18, %v4118_v4  ;;  %v6065_v5 = vld [vmem:[#allocation8 + $0x3e0] sm:$0xff]  ;;  %4501 = vmatpush.bf16.msrb.mxu0 %v6041_v3  ;;  %v7427_v3 = vld [vmem:[#allocation60_spill] sm:$0xff] }
 0x341   :  { %4648 = vmatpush.bf16.msrb.mxu3 %v6065_v5  ;;  %v6056_v5 = vld [vmem:[#allocation8 + $0x398] sm:$0xff] }
 0x342   :  { %4600 = vmatpush.bf16.msrb.mxu2 %v6056_v5  ;;  %v7430_v5 = vld [vmem:[#allocation63_spill] sm:$0xff] }
 0x344   :  { %v4215_v36 = vpop.f32.mrf.mxu2 }
 0x345   :  { %v4216_v2 = vadd.f32 %v4215_v36, %v4167_v37  ;;  %v4264_v49 = vpop.f32.mrf.mxu3  ;;  %v4120_v16 = vpop.f32.mrf.mxu0 }
 0x346   :  { %v4121_v41 = vadd.f32 %v4120_v16, %v7074_v42  ;;  %v4169_v15 = vpop.f32.mrf.mxu1 }
 0x347   :  { %v7135_v44 = vadd.f32 %v4264_v49, %v4216_v2  ;;  %v6049_v2 = vld [vmem:[#allocation8 + $0x360] sm:$0xff] }
 0x348   :  { %v4170_v59 = vadd.f32 %v4169_v15, %v4121_v41  ;;  %4315 = vmatmul.bf16.gmra.mxu0 %v7423_v39  ;;  %4364 = vmatmul.bf16.gmra.mxu1 %v7424_v31 }
 0x349   :  { %4413 = vmatmul.bf16.gmra.mxu2 %v6775_v34  ;;  %4550 = vmatpush.bf16.msrb.mxu1 %v6049_v2 }
 0x34a   :  { %4462 = vmatmul.bf16.gmra.mxu3 %v7425_v9 }
 0x34c   :  { %v4218_v30 = vpop.f32.mrf.mxu2 }
 0x34d   :  { %v4219_v4 = vadd.f32 %v4218_v30, %v4170_v59  ;;  %v4267_v42 = vpop.f32.mrf.mxu3  ;;  %v4122_v18 = vpop.f32.mrf.mxu0  ;;  %v6040_v30 = vld [vmem:[#allocation8 + $0x318] sm:$0xff] }
 0x34e   :  { %v4123_v58 = vadd.f32 %v4122_v18, %v7076_v57  ;;  %v4171_v37 = vpop.f32.mrf.mxu1  ;;  %v7428_v57 = vld [vmem:[#allocation61_spill] sm:$0xff]  ;;  %4502 = vmatpush.bf16.msrb.mxu0 %v6040_v30  ;;  %v6055_v30 = vld [vmem:[#allocation8 + $0x390] sm:$0xff] }
 0x34f   :  { %v7142_v36 = vadd.f32 %v4267_v42, %v4219_v4  ;;  %v6064_v4 = vld [vmem:[#allocation8 + $0x3d8] sm:$0xff]  ;;  %4601 = vmatpush.bf16.msrb.mxu2 %v6055_v30  ;;  %v6054_v30 = vld [vmem:[#allocation8 + $0x388] sm:$0xff] }
 0x350   :  { %v4172_v49 = vadd.f32 %v4171_v37, %v4123_v58  ;;  %4649 = vmatpush.bf16.msrb.mxu3 %v6064_v4  ;;  %v6039_v4 = vld [vmem:[#allocation8 + $0x310] sm:$0xff] }
 0x352   :  { %4503 = vmatpush.bf16.msrb.mxu0 %v6039_v4  ;;  %v6038_v4 = vld [vmem:[#allocation8 + $0x308] sm:$0xff] }
 0x353   :  { %4602 = vmatpush.bf16.msrb.mxu2 %v6054_v30  ;;  %v6061_v30 = vld [vmem:[#allocation8 + $0x3c0] sm:$0xff] }
 0x354   :  { %v4220_v34 = vpop.f32.mrf.mxu2 }
 0x355   :  { %v4221_v16 = vadd.f32 %v4220_v34, %v4172_v49  ;;  %v4269_v41 = vpop.f32.mrf.mxu3  ;;  %v4125_v15 = vpop.f32.mrf.mxu0  ;;  %v6048_v34 = vld [vmem:[#allocation8 + $0x358] sm:$0xff] }
 0x356   :  { %v4126_v39 = vadd.f32 %v4125_v15, %v7082_v14  ;;  %v4174_v31 = vpop.f32.mrf.mxu1  ;;  %4551 = vmatpush.bf16.msrb.mxu1 %v6048_v34  ;;  %4504 = vmatpush.bf16.msrb.mxu0 %v6038_v4 }
 0x357   :  { %v7145_v9 = vadd.f32 %v4269_v41, %v4221_v16 }
 0x358   :  { %v4175_v59 = vadd.f32 %v4174_v31, %v4126_v39  ;;  %4320 = vmatmul.bf16.gmra.mxu0 %v7426_v32  ;;  %4369 = vmatmul.bf16.gmra.mxu1 %v7427_v3 }
 0x359   :  { %4418 = vmatmul.bf16.gmra.mxu2 %v6795_v10 }
 0x35a   :  { %4467 = vmatmul.bf16.gmra.mxu3 %v7428_v57  ;;  %v7429_v57 = vld [vmem:[#allocation62_spill] sm:$0xff] }
 0x35c   :  { %v4223_v42 = vpop.f32.mrf.mxu2 }
 0x35d   :  { %v4224_v18 = vadd.f32 %v4223_v42, %v4175_v59  ;;  %v4272_v14 = vpop.f32.mrf.mxu3  ;;  %v4127_v58 = vpop.f32.mrf.mxu0  ;;  %v6063_v42 = vld [vmem:[#allocation8 + $0x3d0] sm:$0xff] }
 0x35e   :  { %v4128_v37 = vadd.f32 %v4127_v58, %v7084_v38  ;;  %v4176_v2 = vpop.f32.mrf.mxu1  ;;  %v7431_v38 = vld [vmem:[#allocation64_spill] sm:$0xff]  ;;  %4650 = vmatpush.bf16.msrb.mxu3 %v6063_v42  ;;  %v6062_v42 = vld [vmem:[#allocation8 + $0x3c8] sm:$0xff] }
 0x35f   :  { %v7152_v49 = vadd.f32 %v4272_v14, %v4224_v18 }
 0x360   :  { %v4177_v16 = vadd.f32 %v4176_v2, %v4128_v37 }
 0x362   :  { %4651 = vmatpush.bf16.msrb.mxu3 %v6062_v42 }
 0x364   :  { %v4225_v10 = vpop.f32.mrf.mxu2 }
 0x365   :  { %v4226_v41 = vadd.f32 %v4225_v10, %v4177_v16  ;;  %v4274_v15 = vpop.f32.mrf.mxu3  ;;  %v4130_v39 = vpop.f32.mrf.mxu0  ;;  %v6047_v16 = vld [vmem:[#allocation8 + $0x350] sm:$0xff] }
 0x366   :  { %v4131_v31 = vadd.f32 %v4130_v39, %v7090_v23  ;;  %v4179_v32 = vpop.f32.mrf.mxu1  ;;  %4552 = vmatpush.bf16.msrb.mxu1 %v6047_v16  ;;  %v6046_v16 = vld [vmem:[#allocation8 + $0x348] sm:$0xff]  ;;  %4652 = vmatpush.bf16.msrb.mxu3 %v6061_v30 }
 0x367   :  { %v7155_v3 = vadd.f32 %v4274_v15, %v4226_v41 }
 0x368   :  { %v4180_v59 = vadd.f32 %v4179_v32, %v4131_v31  ;;  %4325 = vmatmul.bf16.gmra.mxu0 %v7429_v57  ;;  %4374 = vmatmul.bf16.gmra.mxu1 %v7430_v5  ;;  %v7432_v5 = vld [vmem:[#allocation65_spill] sm:$0xff] }
 0x369   :  { %4423 = vmatmul.bf16.gmra.mxu2 %v6815_v60 }
 0x36a   :  { %4472 = vmatmul.bf16.gmra.mxu3 %v7431_v38  ;;  %v7433_v38 = vld [vmem:[#allocation66_spill] sm:$0xff]  ;;  %4553 = vmatpush.bf16.msrb.mxu1 %v6046_v16 }
 0x36c   :  { %v4228_v18 = vpop.f32.mrf.mxu2 }
 0x36d   :  { %v4229_v14 = vadd.f32 %v4228_v18, %v4180_v59  ;;  %v4277_v23 = vpop.f32.mrf.mxu3  ;;  %v4132_v58 = vpop.f32.mrf.mxu0 }
 0x36e   :  { %v4133_v37 = vadd.f32 %v4132_v58, %v7092_v19  ;;  %v4181_v2 = vpop.f32.mrf.mxu1  ;;  %v7434_v19 = vld [vmem:[#allocation67_spill] sm:$0xff] }
 0x36f   :  { %v7162_v34 = vadd.f32 %v4277_v23, %v4229_v14 }
 0x370   :  { %v4182_v10 = vadd.f32 %v4181_v2, %v4133_v37 }
 0x374   :  { %v4230_v60 = vpop.f32.mrf.mxu2 }
 0x375   :  { %v4231_v41 = vadd.f32 %v4230_v60, %v4182_v10  ;;  %v4279_v15 = vpop.f32.mrf.mxu3  ;;  %v4135_v39 = vpop.f32.mrf.mxu0 }
 0x376   :  { %v4136_v31 = vadd.f32 %v4135_v39, %v7098_v52  ;;  %v4184_v32 = vpop.f32.mrf.mxu1 }
 0x377   :  { %v7165_v57 = vadd.f32 %v4279_v15, %v4231_v41 }
 0x378   :  { %v4185_v59 = vadd.f32 %v4184_v32, %v4136_v31  ;;  %4330 = vmatmul.bf16.gmra.mxu0 %v7432_v5  ;;  %4379 = vmatmul.bf16.gmra.mxu1 %v7433_v38  ;;  %v7435_v5 = vld [vmem:[#allocation68_spill] sm:$0xff]  ;;  %v7436_v38 = vld [vmem:[#allocation69_spill] sm:$0xff] }
 0x379   :  { %4428 = vmatmul.bf16.gmra.mxu2 %v6835_v7 }
 0x37a   :  { %4477 = vmatmul.bf16.gmra.mxu3 %v7434_v19  ;;  %v6037_v19 = vld [vmem:[#allocation8 + $0x300] sm:$0xff] }
 0x37b   :  { %4505 = vmatpush.bf16.msrb.mxu0 %v6037_v19 }
 0x37c   :  { %v4233_v18 = vpop.f32.mrf.mxu2 }
 0x37d   :  { %v4234_v14 = vadd.f32 %v4233_v18, %v4185_v59  ;;  %v4282_v52 = vpop.f32.mrf.mxu3  ;;  %v4137_v23 = vpop.f32.mrf.mxu0 }
 0x37e   :  { %v4138_v58 = vadd.f32 %v4137_v23, %v7100_v50  ;;  %v4186_v37 = vpop.f32.mrf.mxu1  ;;  %v6053_v50 = vld [vmem:[#allocation8 + $0x380] sm:$0xff] }
 0x37f   :  { %v7172_v2 = vadd.f32 %v4282_v52, %v4234_v14  ;;  %4603 = vmatpush.bf16.msrb.mxu2 %v6053_v50 }
 0x380   :  { %v4187_v10 = vadd.f32 %v4186_v37, %v4138_v58  ;;  %v6045_v58 = vld [vmem:[#allocation8 + $0x340] sm:$0xff] }
 0x381   :  { %4554 = vmatpush.bf16.msrb.mxu1 %v6045_v58 }
 0x384   :  { %v4235_v7 = vpop.f32.mrf.mxu2 }
 0x385   :  { %v4236_v60 = vadd.f32 %v4235_v7, %v4187_v10  ;;  %v4284_v41 = vpop.f32.mrf.mxu3  ;;  %v4140_v15 = vpop.f32.mrf.mxu0 }
 0x386   :  { %v4141_v39 = vadd.f32 %v4140_v15, %v7106_v13  ;;  %v4189_v31 = vpop.f32.mrf.mxu1 }
 0x387   :  { %v7175_v32 = vadd.f32 %v4284_v41, %v4236_v60 }
 0x388   :  { %v4190_v59 = vadd.f32 %v4189_v31, %v4141_v39  ;;  %4335 = vmatmul.bf16.gmra.mxu0 %v7435_v5  ;;  %4384 = vmatmul.bf16.gmra.mxu1 %v7436_v38  ;;  %v7437_v39 = vld [vmem:[#allocation70_spill] sm:$0xff] }
 0x389   :  { %4433 = vmatmul.bf16.gmra.mxu2 %v6855_v24 }
 0x38a   :  { %4482 = vmatmul.bf16.gmra.mxu3 %v6857_v8 }
 0x38c   :  { %v4238_v4 = vpop.f32.mrf.mxu2 }
 0x38d   :  { %v4239_v42 = vadd.f32 %v4238_v4, %v4190_v59  ;;  %v4287_v13 = vpop.f32.mrf.mxu3  ;;  %v4142_v18 = vpop.f32.mrf.mxu0 }
 0x38e   :  { %v4143_v14 = vadd.f32 %v4142_v18, %v7108_v1  ;;  %v4191_v52 = vpop.f32.mrf.mxu1 }
 0x38f   :  { %v7182_v23 = vadd.f32 %v4287_v13, %v4239_v42 }
 0x390   :  { %v4192_v37 = vadd.f32 %v4191_v52, %v4143_v14  ;;  %v7438_v14 = vld [vmem:[#allocation71_spill] sm:$0xff]  ;;  %v7439_v52 = vld [vmem:[#allocation72_spill] sm:$0xff] }
 0x394   :  { %v4240_v24 = vpop.f32.mrf.mxu2 }
 0x395   :  { %v4241_v8 = vadd.f32 %v4240_v24, %v4192_v37  ;;  %v4289_v16 = vpop.f32.mrf.mxu3  ;;  %v4145_v10 = vpop.f32.mrf.mxu0 }
 0x396   :  { %v4146_v7 = vadd.f32 %v4145_v10, %v7114_v61  ;;  %v4194_v60 = vpop.f32.mrf.mxu1 }
 0x397   :  { %v7185_v41 = vadd.f32 %v4289_v16, %v4241_v8 }
 0x398   :  { %v4195_v15 = vadd.f32 %v4194_v60, %v4146_v7  ;;  %4340 = vmatmul.bf16.gmra.mxu0 %v6864_v48  ;;  %4389 = vmatmul.bf16.gmra.mxu1 %v7437_v39 }
 0x399   :  { %4438 = vmatmul.bf16.gmra.mxu2 %v6875_v22 }
 0x39a   :  { %4487 = vmatmul.bf16.gmra.mxu3 %v6877_v27 }
 0x39c   :  { %v4243_v1 = vpop.f32.mrf.mxu2 }
 0x39d   :  { %v4244_v31 = vadd.f32 %v4243_v1, %v4195_v15  ;;  %v4292_v59 = vpop.f32.mrf.mxu3  ;;  %v4147_v5 = vpop.f32.mrf.mxu0 }
 0x39e   :  { %v4148_v38 = vadd.f32 %v4147_v5, %v7116_v0  ;;  %v4196_v50 = vpop.f32.mrf.mxu1 }
 0x39f   :  { %v7192_v61 = vadd.f32 %v4292_v59, %v4244_v31 }
 0x3a0   :  { %v4197_v19 = vadd.f32 %v4196_v50, %v4148_v38 }
 0x3a4   :  { %v4245_v30 = vpop.f32.mrf.mxu2 }
 0x3a5   :  { %v4246_v4 = vadd.f32 %v4245_v30, %v4197_v19  ;;  %v4294_v42 = vpop.f32.mrf.mxu3  ;;  %v4150_v48 = vpop.f32.mrf.mxu0 }
 0x3a6   :  { %v4151_v13 = vadd.f32 %v4150_v48, %v7122_v17  ;;  %v4199_v18 = vpop.f32.mrf.mxu1 }
 0x3a7   :  { %v7195_v22 = vadd.f32 %v4294_v42, %v4246_v4 }
 0x3a8   :  { %v4200_v27 = vadd.f32 %v4199_v18, %v4151_v13  ;;  %4345 = vmatmul.bf16.gmra.mxu0 %v7438_v14  ;;  %4394 = vmatmul.bf16.gmra.mxu1 %v7439_v52 }
 0x3a9   :  { %4443 = vmatmul.bf16.gmra.mxu2 %v6907_v12 }
 0x3aa   :  { %4492 = vmatmul.bf16.gmra.mxu3 %v6909_v6 }
 0x3ac   :  { %v4248_v0 = vpop.f32.mrf.mxu2 }
 0x3ad   :  { %v4249_v58 = vadd.f32 %v4248_v0, %v4200_v27  ;;  %v4297_v37 = vpop.f32.mrf.mxu3  ;;  %v4152_v24 = vpop.f32.mrf.mxu0 }
 0x3ae   :  { %v4153_v8 = vadd.f32 %v4152_v24, %v7125_v56  ;;  %v4201_v16 = vpop.f32.mrf.mxu1 }
 0x3af   :  { %v7202_v17 = vadd.f32 %v4297_v37, %v4249_v58 }
 0x3b0   :  { %v4202_v10 = vadd.f32 %v4201_v16, %v4153_v8 }
 0x3b4   :  { %v4250_v7 = vpop.f32.mrf.mxu2 }
 0x3b5   :  { %v4251_v60 = vadd.f32 %v4250_v7, %v4202_v10  ;;  %v4299_v15 = vpop.f32.mrf.mxu3  ;;  %v4311_v39 = vpop.f32.mrf.mxu0 }
 0x3b6   :  { %v4312_v1 = vadd.f32 %v4311_v39, %v7132_v47  ;;  %v4360_v31 = vpop.f32.mrf.mxu1 }
 0x3b7   :  { %v7205_v12 = vadd.f32 %v4299_v15, %v4251_v60 }
 0x3b8   :  { %v4361_v6 = vadd.f32 %v4360_v31, %v4312_v1  ;;  %4506 = vmatmul.bf16.vlgmr.msrb.gmra.mxu0 %v6915_v55  ;;  %4555 = vmatmul.bf16.vlgmr.msrb.gmra.mxu1 %v6917_v45 }
 0x3b9   :  { %4604 = vmatmul.bf16.vlgmr.msrb.gmra.mxu2 %v6925_v29 }
 0x3ba   :  { %4653 = vmatmul.bf16.vlgmr.msrb.gmra.mxu3 %v6927_v62 }
 0x3bc   :  { %v4409_v56 = vpop.f32.mrf.mxu2 }
 0x3bd   :  { %v4410_v59 = vadd.f32 %v4409_v56, %v4361_v6  ;;  %v4458_v5 = vpop.f32.mrf.mxu3  ;;  %v4313_v38 = vpop.f32.mrf.mxu0 }
 0x3be   :  { %v4314_v50 = vadd.f32 %v4313_v38, %v7135_v44  ;;  %v4362_v19 = vpop.f32.mrf.mxu1 }
 0x3bf   :  { %v7212_v47 = vadd.f32 %v4458_v5, %v4410_v59 }
 0x3c0   :  { %v4363_v30 = vadd.f32 %v4362_v19, %v4314_v50 }
 0x3c4   :  { %v4411_v4 = vpop.f32.mrf.mxu2 }
 0x3c5   :  { %v4412_v42 = vadd.f32 %v4411_v4, %v4363_v30  ;;  %v4460_v48 = vpop.f32.mrf.mxu3  ;;  %v4316_v55 = vpop.f32.mrf.mxu0 }
 0x3c6   :  { %v4317_v45 = vadd.f32 %v4316_v55, %v7142_v36  ;;  %v4365_v13 = vpop.f32.mrf.mxu1 }
 0x3c7   :  { %v7215_v29 = vadd.f32 %v4460_v48, %v4412_v42 }
 0x3c8   :  { %v4366_v62 = vadd.f32 %v4365_v13, %v4317_v45  ;;  %4511 = vmatmul.bf16.gmra.mxu0 %v6936_v63  ;;  %4560 = vmatmul.bf16.gmra.mxu1 %v6938_v35 }
 0x3c9   :  { %4609 = vmatmul.bf16.gmra.mxu2 %v6947_v28 }
 0x3ca   :  { %4658 = vmatmul.bf16.gmra.mxu3 %v6949_v20 }
 0x3cc   :  { %v4414_v44 = vpop.f32.mrf.mxu2 }
 0x3cd   :  { %v4415_v18 = vadd.f32 %v4414_v44, %v4366_v62  ;;  %v4463_v27 = vpop.f32.mrf.mxu3  ;;  %v4318_v14 = vpop.f32.mrf.mxu0 }
 0x3ce   :  { %v4319_v52 = vadd.f32 %v4318_v14, %v7145_v9  ;;  %v4367_v0 = vpop.f32.mrf.mxu1 }
 0x3cf   :  { %v7222_v36 = vadd.f32 %v4463_v27, %v4415_v18 }
 0x3d0   :  { %v4368_v58 = vadd.f32 %v4367_v0, %v4319_v52 }
 0x3d4   :  { %v4416_v37 = vpop.f32.mrf.mxu2 }
 0x3d5   :  { %v4417_v24 = vadd.f32 %v4416_v37, %v4368_v58  ;;  %v4465_v8 = vpop.f32.mrf.mxu3  ;;  %v4321_v63 = vpop.f32.mrf.mxu0 }
 0x3d6   :  { %v4322_v35 = vadd.f32 %v4321_v63, %v7152_v49  ;;  %v4370_v16 = vpop.f32.mrf.mxu1  ;;  %v7441_v63 = vld [vmem:[#allocation74_spill] sm:$0xff] }
 0x3d7   :  { %v7225_v28 = vadd.f32 %v4465_v8, %v4417_v24 }
 0x3d8   :  { %v4371_v20 = vadd.f32 %v4370_v16, %v4322_v35  ;;  %4516 = vmatmul.bf16.gmra.mxu0 %v6956_v11  ;;  %4565 = vmatmul.bf16.gmra.mxu1 %v6958_v33  ;;  %v7442_v35 = vld [vmem:[#allocation75_spill] sm:$0xff]  ;;  %v7443_v16 = vld [vmem:[#allocation18_spill] sm:$0xff] }
 0x3d9   :  { %4614 = vmatmul.bf16.gmra.mxu2 %v6967_v51 }
 0x3da   :  { %4663 = vmatmul.bf16.gmra.mxu3 %v6969_v53 }
 0x3dc   :  { %v4419_v9 = vpop.f32.mrf.mxu2 }
 0x3dd   :  { %v4420_v10 = vadd.f32 %v4419_v9, %v4371_v20  ;;  %v4468_v7 = vpop.f32.mrf.mxu3  ;;  %v4323_v60 = vpop.f32.mrf.mxu0 }
 0x3de   :  { %v4324_v15 = vadd.f32 %v4323_v60, %v7155_v3  ;;  %v4372_v39 = vpop.f32.mrf.mxu1 }
 0x3df   :  { %v7232_v49 = vadd.f32 %v4468_v7, %v4420_v10 }
 0x3e0   :  { %v4373_v1 = vadd.f32 %v4372_v39, %v4324_v15 }
 0x3e4   :  { %v4421_v31 = vpop.f32.mrf.mxu2 }
 0x3e5   :  { %v4422_v6 = vadd.f32 %v4421_v31, %v4373_v1  ;;  %v4470_v56 = vpop.f32.mrf.mxu3  ;;  %v4326_v11 = vpop.f32.mrf.mxu0 }
 0x3e6   :  { %v4327_v33 = vadd.f32 %v4326_v11, %v7162_v34  ;;  %v4375_v59 = vpop.f32.mrf.mxu1 }
 0x3e7   :  { %v7235_v51 = vadd.f32 %v4470_v56, %v4422_v6 }
 0x3e8   :  { %v4376_v53 = vadd.f32 %v4375_v59, %v4327_v33  ;;  %4521 = vmatmul.bf16.gmra.mxu0 %v6976_v21  ;;  %4570 = vmatmul.bf16.gmra.mxu1 %v6978_v40 }
 0x3e9   :  { %4619 = vmatmul.bf16.gmra.mxu2 %v6987_v26 }
 0x3ea   :  { %4668 = vmatmul.bf16.gmra.mxu3 %v6989_v54 }
 0x3ec   :  { %v4424_v3 = vpop.f32.mrf.mxu2 }
 0x3ed   :  { %v4425_v5 = vadd.f32 %v4424_v3, %v4376_v53  ;;  %v4473_v38 = vpop.f32.mrf.mxu3  ;;  %v4328_v50 = vpop.f32.mrf.mxu0  ;;  %v7445_v3 = vld [vmem:[#allocation77_spill] sm:$0xff] }
 0x3ee   :  { %v4329_v19 = vadd.f32 %v4328_v50, %v7165_v57  ;;  %v4377_v30 = vpop.f32.mrf.mxu1  ;;  %v7440_v57 = vld [vmem:[#allocation73_spill] sm:$0xff] }
 0x3ef   :  { %v7242_v34 = vadd.f32 %v4473_v38, %v4425_v5  ;;  %v7446_v5 = vld [vmem:[#allocation78_spill] sm:$0xff]  ;;  %v7447_v38 = vld [vmem:[#allocation19_spill] sm:$0xff] }
 0x3f0   :  { %v4378_v4 = vadd.f32 %v4377_v30, %v4329_v19 }
 0x3f4   :  { %v4426_v42 = vpop.f32.mrf.mxu2 }
 0x3f5   :  { %v4427_v48 = vadd.f32 %v4426_v42, %v4378_v4  ;;  %v4475_v55 = vpop.f32.mrf.mxu3  ;;  %v4331_v21 = vpop.f32.mrf.mxu0 }
 0x3f6   :  { %v4332_v40 = vadd.f32 %v4331_v21, %v7172_v2  ;;  %v4380_v45 = vpop.f32.mrf.mxu1 }
 0x3f7   :  { %v7245_v26 = vadd.f32 %v4475_v55, %v4427_v48 }
 0x3f8   :  { %v4381_v54 = vadd.f32 %v4380_v45, %v4332_v40  ;;  %4526 = vmatmul.bf16.gmra.mxu0 %v6996_v43  ;;  %4575 = vmatmul.bf16.gmra.mxu1 %v6998_v46 }
 0x3f9   :  { %4624 = vmatmul.bf16.gmra.mxu2 %v7007_v25 }
 0x3fa   :  { %4673 = vmatmul.bf16.gmra.mxu3 %v7440_v57 }
 0x3fc   :  { %v4429_v13 = vpop.f32.mrf.mxu2 }
 0x3fd   :  { %v4430_v62 = vadd.f32 %v4429_v13, %v4381_v54  ;;  %v4478_v44 = vpop.f32.mrf.mxu3  ;;  %v4333_v18 = vpop.f32.mrf.mxu0 }
 0x3fe   :  { %v4334_v27 = vadd.f32 %v4333_v18, %v7175_v32  ;;  %v4382_v14 = vpop.f32.mrf.mxu1  ;;  %v7444_v32 = vld [vmem:[#allocation76_spill] sm:$0xff]  ;;  %v7449_v18 = vld [vmem:[#allocation21_spill] sm:$0xff] }
 0x3ff   :  { %v7252_v2 = vadd.f32 %v4478_v44, %v4430_v62 }
 0x400   :  { %v4383_v52 = vadd.f32 %v4382_v14, %v4334_v27  ;;  %v7450_v27 = vld [vmem:[#allocation22_spill] sm:$0xff]  ;;  %v7451_v14 = vld [vmem:[#allocation23_spill] sm:$0xff] }
 0x404   :  { %v4431_v0 = vpop.f32.mrf.mxu2 }
 0x405   :  { %v4432_v58 = vadd.f32 %v4431_v0, %v4383_v52  ;;  %v4480_v37 = vpop.f32.mrf.mxu3  ;;  %v4336_v43 = vpop.f32.mrf.mxu0 }
 0x406   :  { %v4337_v46 = vadd.f32 %v4336_v43, %v7182_v23  ;;  %v4385_v24 = vpop.f32.mrf.mxu1 }
 0x407   :  { %v7255_v25 = vadd.f32 %v4480_v37, %v4432_v58 }
 0x408   :  { %v4386_v8 = vadd.f32 %v4385_v24, %v4337_v46  ;;  %4531 = vmatmul.bf16.gmra.mxu0 %v7441_v63  ;;  %4580 = vmatmul.bf16.gmra.mxu1 %v7442_v35 }
 0x409   :  { %4629 = vmatmul.bf16.gmra.mxu2 %v7443_v16 }
 0x40a   :  { %4678 = vmatmul.bf16.gmra.mxu3 %v7444_v32 }
 0x40c   :  { %v4434_v20 = vpop.f32.mrf.mxu2 }
 0x40d   :  { %v4435_v9 = vadd.f32 %v4434_v20, %v4386_v8  ;;  %v4483_v10 = vpop.f32.mrf.mxu3  ;;  %v4338_v7 = vpop.f32.mrf.mxu0 }
 0x40e   :  { %v4339_v60 = vadd.f32 %v4338_v7, %v7185_v41  ;;  %v4387_v15 = vpop.f32.mrf.mxu1  ;;  %v7448_v41 = vld [vmem:[#allocation20_spill] sm:$0xff] }
 0x40f   :  { %v7262_v23 = vadd.f32 %v4483_v10, %v4435_v9 }
 0x410   :  { %v4388_v39 = vadd.f32 %v4387_v15, %v4339_v60 }
 0x414   :  { %v4436_v1 = vpop.f32.mrf.mxu2 }
 0x415   :  { %v4437_v31 = vadd.f32 %v4436_v1, %v4388_v39  ;;  %v4485_v6 = vpop.f32.mrf.mxu3  ;;  %v4341_v56 = vpop.f32.mrf.mxu0 }
 0x416   :  { %v4342_v11 = vadd.f32 %v4341_v56, %v7192_v61  ;;  %v4390_v33 = vpop.f32.mrf.mxu1 }
 0x417   :  { %v7265_v59 = vadd.f32 %v4485_v6, %v4437_v31 }
 0x418   :  { %v4391_v53 = vadd.f32 %v4390_v33, %v4342_v11  ;;  %4536 = vmatmul.bf16.gmra.mxu0 %v7445_v3  ;;  %4585 = vmatmul.bf16.gmra.mxu1 %v7446_v5 }
 0x419   :  { %4634 = vmatmul.bf16.gmra.mxu2 %v7447_v38 }
 0x41a   :  { %4683 = vmatmul.bf16.gmra.mxu3 %v7448_v41 }
 0x41c   :  { %v4439_v50 = vpop.f32.mrf.mxu2 }
 0x41d   :  { %v4440_v19 = vadd.f32 %v4439_v50, %v4391_v53  ;;  %v4488_v30 = vpop.f32.mrf.mxu3  ;;  %v4343_v4 = vpop.f32.mrf.mxu0 }
 0x41e   :  { %v4344_v42 = vadd.f32 %v4343_v4, %v7195_v22  ;;  %v4392_v48 = vpop.f32.mrf.mxu1  ;;  %v7452_v22 = vld [vmem:[#allocation24_spill] sm:$0xff] }
 0x41f   :  { %v7272_v61 = vadd.f32 %v4488_v30, %v4440_v19 }
 0x420   :  { %v4393_v55 = vadd.f32 %v4392_v48, %v4344_v42 }
 0x424   :  { %v4441_v21 = vpop.f32.mrf.mxu2 }
 0x425   :  { %v4442_v40 = vadd.f32 %v4441_v21, %v4393_v55  ;;  %v4490_v45 = vpop.f32.mrf.mxu3  ;;  %v4346_v54 = vpop.f32.mrf.mxu0 }
 0x426   :  { %v4347_v57 = vadd.f32 %v4346_v54, %v7202_v17  ;;  %v4395_v13 = vpop.f32.mrf.mxu1 }
 0x427   :  { %v7275_v62 = vadd.f32 %v4490_v45, %v4442_v40 }
 0x428   :  { %v4396_v44 = vadd.f32 %v4395_v13, %v4347_v57  ;;  %4541 = vmatmul.bf16.gmra.mxu0 %v7449_v18  ;;  %4590 = vmatmul.bf16.gmra.mxu1 %v7450_v27 }
 0x429   :  { %4639 = vmatmul.bf16.gmra.mxu2 %v7451_v14 }
 0x42a   :  { %4688 = vmatmul.bf16.gmra.mxu3 %v7452_v22 }
 0x42c   :  { %v4444_v52 = vpop.f32.mrf.mxu2 }
 0x42d   :  { %v4445_v0 = vadd.f32 %v4444_v52, %v4396_v44  ;;  %v4493_v58 = vpop.f32.mrf.mxu3  ;;  %v4348_v37 = vpop.f32.mrf.mxu0 }
 0x42e   :  { %v4349_v43 = vadd.f32 %v4348_v37, %v7205_v12  ;;  %v4397_v46 = vpop.f32.mrf.mxu1 }
 0x42f   :  { %v7282_v17 = vadd.f32 %v4493_v58, %v4445_v0 }
 0x430   :  { %v4398_v24 = vadd.f32 %v4397_v46, %v4349_v43 }
 0x434   :  { %v4446_v8 = vpop.f32.mrf.mxu2 }
 0x435   :  { %v4447_v63 = vadd.f32 %v4446_v8, %v4398_v24  ;;  %v4495_v35 = vpop.f32.mrf.mxu3  ;;  %v4507_v16 = vpop.f32.mrf.mxu0 }
 0x436   :  { %v4556_v32 = vpop.f32.mrf.mxu1  ;;  %v4508_v9 = vadd.f32 %v4507_v16, %v7212_v47 }
 0x437   :  { %v7284_v20 = vadd.f32 %v4495_v35, %v4447_v63 }
 0x438   :  { %v4557_v10 = vadd.f32 %v4556_v32, %v4508_v9 }
 0x43c   :  { %v4605_v7 = vpop.f32.mrf.mxu2 }
 0x43d   :  { %v4606_v60 = vadd.f32 %v4605_v7, %v4557_v10  ;;  %v4654_v15 = vpop.f32.mrf.mxu3  ;;  %v4509_v39 = vpop.f32.mrf.mxu0 }
 0x43e   :  { %v4558_v12 = vpop.f32.mrf.mxu1  ;;  %v4510_v31 = vadd.f32 %v4509_v39, %v7215_v29 }
 0x43f   :  { %v4655_v1 = vadd.f32 %v4654_v15, %v4606_v60 }
 0x440   :  { %v4559_v47 = vadd.f32 %v4558_v12, %v4510_v31 }
 0x441   :  { %4694 = vst [vmem:[#allocation10] sm:$0xff] %v4655_v1 }
 0x444   :  { %v4607_v6 = vpop.f32.mrf.mxu2 }
 0x445   :  { %v4608_v56 = vadd.f32 %v4607_v6, %v4559_v47  ;;  %v4656_v11 = vpop.f32.mrf.mxu3  ;;  %v4512_v33 = vpop.f32.mrf.mxu0 }
 0x446   :  { %v4561_v53 = vpop.f32.mrf.mxu1  ;;  %v4513_v5 = vadd.f32 %v4512_v33, %v7222_v36 }
 0x447   :  { %v4657_v3 = vadd.f32 %v4656_v11, %v4608_v56 }
 0x448   :  { %v4562_v38 = vadd.f32 %v4561_v53, %v4513_v5 }
 0x449   :  { %4695 = vst [vmem:[#allocation10 + $0x8] sm:$0xff] %v4657_v3 }
 0x44c   :  { %v4610_v41 = vpop.f32.mrf.mxu2 }
 0x44d   :  { %v4611_v50 = vadd.f32 %v4610_v41, %v4562_v38  ;;  %v4659_v19 = vpop.f32.mrf.mxu3  ;;  %v4514_v29 = vpop.f32.mrf.mxu0 }
 0x44e   :  { %v4563_v30 = vpop.f32.mrf.mxu1  ;;  %v4515_v42 = vadd.f32 %v4514_v29, %v7225_v28 }
 0x44f   :  { %v4660_v4 = vadd.f32 %v4659_v19, %v4611_v50 }
 0x450   :  { %v4564_v48 = vadd.f32 %v4563_v30, %v4515_v42 }
 0x451   :  { %4696 = vst [vmem:[#allocation10 + $0x10] sm:$0xff] %v4660_v4 }
 0x454   :  { %v4612_v55 = vpop.f32.mrf.mxu2 }
 0x455   :  { %v4613_v21 = vadd.f32 %v4612_v55, %v4564_v48  ;;  %v4661_v40 = vpop.f32.mrf.mxu3  ;;  %v4517_v45 = vpop.f32.mrf.mxu0 }
 0x456   :  { %v4566_v54 = vpop.f32.mrf.mxu1  ;;  %v4518_v36 = vadd.f32 %v4517_v45, %v7232_v49 }
 0x457   :  { %v4662_v57 = vadd.f32 %v4661_v40, %v4613_v21 }
 0x458   :  { %v4567_v13 = vadd.f32 %v4566_v54, %v4518_v36 }
 0x459   :  { %4697 = vst [vmem:[#allocation10 + $0x18] sm:$0xff] %v4662_v57 }
 0x45c   :  { %v4615_v44 = vpop.f32.mrf.mxu2 }
 0x45d   :  { %v4616_v18 = vadd.f32 %v4615_v44, %v4567_v13  ;;  %v4664_v27 = vpop.f32.mrf.mxu3  ;;  %v4519_v14 = vpop.f32.mrf.mxu0 }
 0x45e   :  { %v4568_v22 = vpop.f32.mrf.mxu1  ;;  %v4520_v28 = vadd.f32 %v4519_v14, %v7235_v51 }
 0x45f   :  { %v4665_v52 = vadd.f32 %v4664_v27, %v4616_v18 }
 0x460   :  { %v4569_v0 = vadd.f32 %v4568_v22, %v4520_v28 }
 0x461   :  { %4698 = vst [vmem:[#allocation10 + $0x20] sm:$0xff] %v4665_v52 }
 0x464   :  { %v4617_v58 = vpop.f32.mrf.mxu2 }
 0x465   :  { %v4618_v37 = vadd.f32 %v4617_v58, %v4569_v0  ;;  %v4666_v43 = vpop.f32.mrf.mxu3  ;;  %v4522_v46 = vpop.f32.mrf.mxu0 }
 0x466   :  { %v4571_v24 = vpop.f32.mrf.mxu1  ;;  %v4523_v49 = vadd.f32 %v4522_v46, %v7242_v34 }
 0x467   :  { %v4667_v8 = vadd.f32 %v4666_v43, %v4618_v37 }
 0x468   :  { %v4572_v63 = vadd.f32 %v4571_v24, %v4523_v49 }
 0x469   :  { %4699 = vst [vmem:[#allocation10 + $0x28] sm:$0xff] %v4667_v8 }
 0x46c   :  { %v4620_v35 = vpop.f32.mrf.mxu2 }
 0x46d   :  { %v4621_v16 = vadd.f32 %v4620_v35, %v4572_v63  ;;  %v4669_v32 = vpop.f32.mrf.mxu3  ;;  %v4524_v9 = vpop.f32.mrf.mxu0 }
 0x46e   :  { %v4573_v10 = vpop.f32.mrf.mxu1  ;;  %v4525_v51 = vadd.f32 %v4524_v9, %v7245_v26 }
 0x46f   :  { %v4670_v7 = vadd.f32 %v4669_v32, %v4621_v16 }
 0x470   :  { %v4574_v60 = vadd.f32 %v4573_v10, %v4525_v51 }
 0x471   :  { %4700 = vst [vmem:[#allocation10 + $0x30] sm:$0xff] %v4670_v7 }
 0x474   :  { %v4622_v15 = vpop.f32.mrf.mxu2 }
 0x475   :  { %v4623_v39 = vadd.f32 %v4622_v15, %v4574_v60  ;;  %v4671_v12 = vpop.f32.mrf.mxu3  ;;  %v4527_v1 = vpop.f32.mrf.mxu0 }
 0x476   :  { %v4576_v31 = vpop.f32.mrf.mxu1  ;;  %v4528_v34 = vadd.f32 %v4527_v1, %v7252_v2 }
 0x477   :  { %v4672_v47 = vadd.f32 %v4671_v12, %v4623_v39 }
 0x478   :  { %v4577_v6 = vadd.f32 %v4576_v31, %v4528_v34 }
 0x479   :  { %4701 = vst [vmem:[#allocation10 + $0x38] sm:$0xff] %v4672_v47 }
 0x47c   :  { %v4625_v56 = vpop.f32.mrf.mxu2 }
 0x47d   :  { %v4626_v11 = vadd.f32 %v4625_v56, %v4577_v6  ;;  %v4674_v33 = vpop.f32.mrf.mxu3  ;;  %v4529_v53 = vpop.f32.mrf.mxu0 }
 0x47e   :  { %v4578_v3 = vpop.f32.mrf.mxu1  ;;  %v4530_v26 = vadd.f32 %v4529_v53, %v7255_v25 }
 0x47f   :  { %v4675_v5 = vadd.f32 %v4674_v33, %v4626_v11 }
 0x480   :  { %v4579_v38 = vadd.f32 %v4578_v3, %v4530_v26 }
 0x481   :  { %4702 = vst [vmem:[#allocation10 + $0x40] sm:$0xff] %v4675_v5 }
 0x484   :  { %v4627_v41 = vpop.f32.mrf.mxu2 }
 0x485   :  { %v4628_v50 = vadd.f32 %v4627_v41, %v4579_v38  ;;  %v4676_v19 = vpop.f32.mrf.mxu3  ;;  %v4532_v29 = vpop.f32.mrf.mxu0 }
 0x486   :  { %v4581_v30 = vpop.f32.mrf.mxu1  ;;  %v4533_v2 = vadd.f32 %v4532_v29, %v7262_v23 }
 0x487   :  { %v4677_v4 = vadd.f32 %v4676_v19, %v4628_v50 }
 0x488   :  { %v4582_v42 = vadd.f32 %v4581_v30, %v4533_v2 }
 0x489   :  { %4703 = vst [vmem:[#allocation10 + $0x48] sm:$0xff] %v4677_v4 }
 0x48c   :  { %v4630_v48 = vpop.f32.mrf.mxu2 }
 0x48d   :  { %v4631_v55 = vadd.f32 %v4630_v48, %v4582_v42  ;;  %v4679_v21 = vpop.f32.mrf.mxu3  ;;  %v4534_v40 = vpop.f32.mrf.mxu0 }
 0x48e   :  { %v4583_v45 = vpop.f32.mrf.mxu1  ;;  %v4535_v25 = vadd.f32 %v4534_v40, %v7265_v59 }
 0x48f   :  { %v4680_v54 = vadd.f32 %v4679_v21, %v4631_v55 }
 0x490   :  { %v4584_v57 = vadd.f32 %v4583_v45, %v4535_v25 }
 0x491   :  { %4704 = vst [vmem:[#allocation10 + $0x50] sm:$0xff] %v4680_v54 }
 0x494   :  { %v4632_v36 = vpop.f32.mrf.mxu2 }
 0x495   :  { %v4633_v13 = vadd.f32 %v4632_v36, %v4584_v57  ;;  %v4681_v44 = vpop.f32.mrf.mxu3  ;;  %v4537_v18 = vpop.f32.mrf.mxu0 }
 0x496   :  { %v4586_v27 = vpop.f32.mrf.mxu1  ;;  %v4538_v23 = vadd.f32 %v4537_v18, %v7272_v61 }
 0x497   :  { %v4682_v14 = vadd.f32 %v4681_v44, %v4633_v13 }
 0x498   :  { %v4587_v22 = vadd.f32 %v4586_v27, %v4538_v23 }
 0x499   :  { %4705 = vst [vmem:[#allocation10 + $0x58] sm:$0xff] %v4682_v14 }
 0x49c   :  { %v4635_v52 = vpop.f32.mrf.mxu2 }
 0x49d   :  { %v4636_v28 = vadd.f32 %v4635_v52, %v4587_v22  ;;  %v4684_v0 = vpop.f32.mrf.mxu3  ;;  %v4539_v58 = vpop.f32.mrf.mxu0 }
 0x49e   :  { %v4588_v37 = vpop.f32.mrf.mxu1  ;;  %v4540_v59 = vadd.f32 %v4539_v58, %v7275_v62 }
 0x49f   :  { %v4685_v43 = vadd.f32 %v4684_v0, %v4636_v28 }
 0x4a0   :  { %v4589_v46 = vadd.f32 %v4588_v37, %v4540_v59 }
 0x4a1   :  { %4706 = vst [vmem:[#allocation10 + $0x60] sm:$0xff] %v4685_v43 }
 0x4a4   :  { %v4637_v24 = vpop.f32.mrf.mxu2 }
 0x4a5   :  { %v4638_v8 = vadd.f32 %v4637_v24, %v4589_v46  ;;  %v4686_v49 = vpop.f32.mrf.mxu3  ;;  %v4542_v63 = vpop.f32.mrf.mxu0 }
 0x4a6   :  { %v4543_v16 = vadd.f32 %v4542_v63, %v7282_v17  ;;  %v4591_v61 = vpop.f32.mrf.mxu1 }
 0x4a7   :  { %v4687_v35 = vadd.f32 %v4686_v49, %v4638_v8 }
 0x4a8   :  { %v4592_v32 = vadd.f32 %v4591_v61, %v4543_v16 }
 0x4a9   :  { %4707 = vst [vmem:[#allocation10 + $0x68] sm:$0xff] %v4687_v35 }
 0x4ac   :  { %v4640_v9 = vpop.f32.mrf.mxu2 }
 0x4ad   :  { %v4641_v10 = vadd.f32 %v4640_v9, %v4592_v32  ;;  %v4689_v7 = vpop.f32.mrf.mxu3  ;;  %v4544_v51 = vpop.f32.mrf.mxu0 }
 0x4ae   :  { %v4545_v15 = vadd.f32 %v4544_v51, %v7284_v20  ;;  %v4593_v62 = vpop.f32.mrf.mxu1 }
 0x4af   :  { %v4690_v60 = vadd.f32 %v4689_v7, %v4641_v10 }
 0x4b0   :  { %v4594_v39 = vadd.f32 %v4593_v62, %v4545_v15 }
 0x4b1   :  { %4708 = vst [vmem:[#allocation10 + $0x70] sm:$0xff] %v4690_v60 }
 0x4b4   :  { %v4642_v17 = vpop.f32.mrf.mxu2 }
 0x4b5   :  { %v4643_v12 = vadd.f32 %v4642_v17, %v4594_v39  ;;  %v4691_v1 = vpop.f32.mrf.mxu3 }
 0x4b7   :  { %v4692_v31 = vadd.f32 %v4691_v1, %v4643_v12 }
 0x4b9   :  { %4709 = vst [vmem:[#allocation10 + $0x78] sm:$0xff] %v4692_v31 }
 0x4ba   :  { %4722 = dma.vmem_to_hbm [thread:$0]  %s4715_s17, 2048, %s4717_s20, [#allocation4], %s6252_s21, %s6252_s21, %s6253_s22  }
 0x4bb   :  { %6239 = dma.done.wait [#allocation4], 2048  }
 0x4bc   :  { %6240 = vsyncadd [#allocation4], 4294965248 }
 0x4bd   :  { %6241 = dma.done.wait [#allocation12], 16384  }
 0x4be   :  { %6242 = vsyncadd [#allocation12], 4294950912 }
 0x4bf   :  { %4744 = vsyncpa [#allocation3], 1 }
 0x4c0   :  { %4745 = vsyncpa [#allocation6], 1 }
 0x4c1   :  { %4746 = vsyncpa [#allocation9], 1 }
 0x4c2   :  { %4747 = vsyncpa [#allocation4], 1 }
 0x4c3   :  { %4748 = vsyncpa [#allocation12], 1 }

</bundles_post_ra>
